<compile_context>
chip_gen: v7x
topology: tpu7x:2x2x1
jax: 0.10.0
libtpu: 0.0.40
codegen_flags: <defaults>
</compile_context>

<pallas_src>
import functools

import jax
import jax.numpy as jnp
from jax.experimental import pallas as pl
from jax.experimental.pallas import tpu as pltpu


# ---------------------------------------------------------------------------
# Kernels
# ---------------------------------------------------------------------------
def _conv_taps(x_ref, w_ref, b_ref, *, th, w_dim, cin):
    """One fused matmul producing all 4 transposed-conv phases for this block.

    x_ref : (1, TH+2, W+2, Cin)   zero-padded input rows (2-row halo)
    w_ref : (9*Cin, 4*Cout)       fused, zero-padded tap/phase weight
    b_ref : (1, 4*Cout)           conv bias, replicated per phase
    returns (TH*W, 4*Cout) f32
    """
    xp = x_ref[0]                                            # (TH+2, W+2, Cin)
    rows = []
    for rh in range(3):
        slab = xp[rh:rh + th]                                # (TH, W+2, Cin)
        rows.append(jnp.concatenate(
            [slab[:, rw:rw + w_dim, :] for rw in range(3)], axis=-1))
    # column order = (rh, rw, ci)  -> matches the fused-weight row order.
    xmat = jnp.concatenate(rows, axis=-1).reshape(th * w_dim, 9 * cin)
    return jnp.dot(xmat, w_ref[...],
                   preferred_element_type=jnp.float32) + b_ref[...]


def _conv_stats_kernel(x_ref, w_ref, b_ref, stats_ref, *, th, w_dim, cin):
    """Pass 1 (bn=True): conv-transpose + per-block BN partial sums only."""
    y = _conv_taps(x_ref, w_ref, b_ref, th=th, w_dim=w_dim, cin=cin)
    stats_ref[0] = jnp.concatenate(
        [jnp.sum(y, axis=0, keepdims=True),
         jnp.sum(y * y, axis=0, keepdims=True)], axis=0)     # (2, 4*Cout)


def _conv_bn_act_kernel(x_ref, w_ref, b_ref, scale_ref, shift_ref, o_ref, *,
                        th, w_dim, cin, slope):
    """Pass 2 (bn=True): recompute conv, apply BN scale/shift + LeakyReLU."""
    y = _conv_taps(x_ref, w_ref, b_ref, th=th, w_dim=w_dim, cin=cin)
    y = y * scale_ref[...] + shift_ref[...]
    o_ref[0] = jnp.where(y >= 0, y, slope * y)               # written exactly once


def _conv_act_kernel(x_ref, w_ref, b_ref, o_ref, *, th, w_dim, cin, slope):
    """Single pass (bn=False): conv-transpose + LeakyReLU fused."""
    y = _conv_taps(x_ref, w_ref, b_ref, th=th, w_dim=w_dim, cin=cin)
    o_ref[0] = jnp.where(y >= 0, y, slope * y)


# ---------------------------------------------------------------------------
# Wrapper
# ---------------------------------------------------------------------------
def _pick_th(h, w, cin, c4, budget_bytes=4 << 20):
    """Largest divisor of h whose double-buffered block fits the VMEM budget."""
    th = 1
    for cand in range(1, h + 1):
        if h % cand:
            continue
        blk_bytes = 4 * (cand * w * c4 + (cand + 2) * (w + 2) * cin)
        if 2 * blk_bytes <= budget_bytes:
            th = cand
    return th


def decoder_block(x, weight, bias, gamma, beta, *, bn=True, eps=0.8, slope=0.2):
    """x: (N, Cin, H, W) f32, weight: (Cin, Cout, 4, 4) -> (N, Cout, 2H, 2W) f32."""
    N, Cin, H, W = x.shape
    Cout = weight.shape[1]
    C4 = 4 * Cout
    TH = _pick_th(H, W, Cin, C4)
    HB = H // TH
    NB = N * HB
    M = TH * W

    # NHWC + spatial zero-pad by 1 (the only input-side data movement in XLA).
    xp = jnp.pad(jnp.transpose(x, (0, 2, 3, 1)),
                 ((0, 0), (1, 1), (1, 1), (0, 0)))           # (N, H+2, W+2, Cin)
    # Overlapping row-blocks with a 2-row halo (duplication factor (TH+2)/TH).
    if HB == 1:
        xb = xp.reshape(NB, TH + 2, W + 2, Cin)
    else:
        xb = jnp.stack([xp[:, hb * TH: hb * TH + TH + 2] for hb in range(HB)],
                       axis=1).reshape(NB, TH + 2, W + 2, Cin)

    # Fused zero-padded weight: rows = (rh, rw, ci) taps, cols = (phase, co).
    # For output row-phase ph, contributing (kernel row kh, padded-row offset rh):
    #   ph=0: kh=1 @ rh=1, kh=3 @ rh=0 ;  ph=1: kh=0 @ rh=2, kh=2 @ rh=1
    taps = {0: ((1, 1), (3, 0)), 1: ((0, 2), (2, 1))}
    wf = jnp.zeros((9 * Cin, C4), jnp.float32)
    for ph in range(2):
        for pw in range(2):
            p = 2 * ph + pw
            for kh, rh in taps[ph]:
                for kw, rw in taps[pw]:
                    t = rh * 3 + rw
                    wf = wf.at[t * Cin:(t + 1) * Cin,
                               p * Cout:(p + 1) * Cout].set(weight[:, :, kh, kw])
    bias_f = jnp.tile(bias, 4).reshape(1, C4)

    x_spec = pl.BlockSpec((1, TH + 2, W + 2, Cin), lambda b: (b, 0, 0, 0))
    w_spec = pl.BlockSpec((9 * Cin, C4), lambda b: (0, 0))
    v_spec = pl.BlockSpec((1, C4), lambda b: (0, 0))
    y_spec = pl.BlockSpec((1, M, C4), lambda b: (b, 0, 0))
    s_spec = pl.BlockSpec((1, 2, C4), lambda b: (b, 0, 0))
    params = pltpu.CompilerParams(dimension_semantics=("parallel",))

    if bn:
        # Pass 1: per-block (sum, sum_sq) partials only — no full activation in HBM.
        stats = pl.pallas_call(
            functools.partial(_conv_stats_kernel, th=TH, w_dim=W, cin=Cin),
            grid=(NB,),
            in_specs=[x_spec, w_spec, v_spec],
            out_specs=s_spec,
            out_shape=jax.ShapeDtypeStruct((NB, 2, C4), jnp.float32),
            compiler_params=params,
        )(xb, wf, bias_f)

        # Tiny cross-block / cross-phase reduction (Cout-sized) in XLA.
        count = jnp.float32(N * 4 * H * W)                   # = N * 2H * 2W
        s = stats[:, 0, :].reshape(NB * 4, Cout).sum(axis=0)
        ss = stats[:, 1, :].reshape(NB * 4, Cout).sum(axis=0)
        mean = s / count
        var = ss / count - mean * mean                       # biased (train-mode) var
        inv = jax.lax.rsqrt(var + eps)
        scale_c = gamma * inv
        shift_c = beta - mean * scale_c
        scale = jnp.tile(scale_c, 4).reshape(1, C4)
        shift = jnp.tile(shift_c, 4).reshape(1, C4)

        # Pass 2: recompute conv (cheap, contraction = 9*Cin) and write the
        # normalized, activated output exactly once.
        out_flat = pl.pallas_call(
            functools.partial(_conv_bn_act_kernel, th=TH, w_dim=W, cin=Cin,
                              slope=slope),
            grid=(NB,),
            in_specs=[x_spec, w_spec, v_spec, v_spec, v_spec],
            out_specs=y_spec,
            out_shape=jax.ShapeDtypeStruct((NB, M, C4), jnp.float32),
            compiler_params=params,
        )(xb, wf, bias_f, scale, shift)
    else:
        out_flat = pl.pallas_call(
            functools.partial(_conv_act_kernel, th=TH, w_dim=W, cin=Cin,
                              slope=slope),
            grid=(NB,),
            in_specs=[x_spec, w_spec, v_spec],
            out_specs=y_spec,
            out_shape=jax.ShapeDtypeStruct((NB, M, C4), jnp.float32),
            compiler_params=params,
        )(xb, wf, bias_f)

    # (NB, TH*W, 4*Cout) -> (N, Cout, 2H, 2W): one fused reshape/transpose.
    out = out_flat.reshape(N, HB, TH, W, 2, 2, Cout)
    out = jnp.transpose(out, (0, 6, 1, 2, 4, 3, 5))
    return out.reshape(N, Cout, 2 * H, 2 * W)


# ---------------------------------------------------------------------------
# Pure-JAX reference (for verification)
# ---------------------------------------------------------------------------
def _reference(x, weight, bias, gamma, beta, *, bn=True, eps=0.8, slope=0.2):
    w_conv = jnp.transpose(weight, (1, 0, 2, 3))[:, :, ::-1, ::-1]
    y = jax.lax.conv_general_dilated(
        x, w_conv, window_strides=(1, 1), padding=((2, 2), (2, 2)),
        lhs_dilation=(2, 2), dimension_numbers=('NCHW', 'OIHW', 'NCHW'))
    y = y + bias.reshape(1, -1, 1, 1)
    if bn:
        mean = y.mean(axis=(0, 2, 3), keepdims=True)
        var = ((y - mean) ** 2).mean(axis=(0, 2, 3), keepdims=True)
        y = (y - mean) / jnp.sqrt(var + eps)
        y = y * gamma.reshape(1, -1, 1, 1) + beta.reshape(1, -1, 1, 1)
    return jnp.where(y >= 0, y, slope * y)


if __name__ == "__main__":
    key = jax.random.PRNGKey(0)
    kx, kw, kb, kg, kbt = jax.random.split(key, 5)
    N, Cin, Cout, H, W = 2, 4, 8, 16, 16

    x = jax.random.normal(kx, (N, Cin, H, W), jnp.float32)
    weight = 0.1 * jax.random.normal(kw, (Cin, Cout, 4, 4), jnp.float32)
    bias = 0.1 * jax.random.normal(kb, (Cout,), jnp.float32)
    gamma = 1.0 + 0.1 * jax.random.normal(kg, (Cout,), jnp.float32)
    beta = 0.1 * jax.random.normal(kbt, (Cout,), jnp.float32)

    # bn=True (default in the PyTorch module)
    out = jax.block_until_ready(
        jax.jit(decoder_block)(x, weight, bias, gamma, beta))
    ref = _reference(x, weight, bias, gamma, beta)
    assert out.shape == (N, Cout, 2 * H, 2 * W), out.shape
    err_bn = float(jnp.max(jnp.abs(out - ref)))
    assert jnp.allclose(out, ref, atol=2e-4, rtol=2e-4), err_bn

    # bn=False path (same conv+act kernel, no normalization)
    out_nb = jax.block_until_ready(
        jax.jit(functools.partial(decoder_block, bn=False))(
            x, weight, bias, gamma, beta))
    ref_nb = _reference(x, weight, bias, gamma, beta, bn=False)
    err_nb = float(jnp.max(jnp.abs(out_nb - ref_nb)))
    assert jnp.allclose(out_nb, ref_nb, atol=2e-4, rtol=2e-4), err_nb

    print("KERNEL_OK")
</pallas_src>

<mosaic_0001>
module attributes {stable_mosaic.version = 11 : i64} {
  func.func @_conv_stats_kernel(%arg0: i32, %arg1: memref<1x18x18x4xf32, #tpu.memory_space<vmem>>, %arg2: memref<36x32xf32, #tpu.memory_space<vmem>>, %arg3: memref<1x32xf32, #tpu.memory_space<vmem>>, %arg4: memref<1x2x32xf32, #tpu.memory_space<vmem>>) attributes {dimension_semantics = [#tpu.dimension_semantics<parallel>], iteration_bounds = array<i64: 2>, scalar_prefetch = 0 : i64, scratch_operands = 0 : i64, tpu.core_type = #tpu.core_type<tc>, window_params = [{transform_indices = @transform_0, window_bounds = array<i64: 1, 18, 18, 4>}, {pipeline_mode = #tpu.pipeline_mode<synchronous>, transform_indices = @transform_1, window_bounds = array<i64: 36, 32>}, {pipeline_mode = #tpu.pipeline_mode<synchronous>, transform_indices = @transform_2, window_bounds = array<i64: 1, 32>}, {transform_indices = @transform_3, window_bounds = array<i64: 1, 2, 32>}]} {
    %c0 = arith.constant 0 : index
    %c0_0 = arith.constant 0 : index
    %c0_1 = arith.constant 0 : index
    %c0_2 = arith.constant 0 : index
    %0 = vector.load %arg1[%c0, %c0_0, %c0_1, %c0_2] : memref<1x18x18x4xf32, #tpu.memory_space<vmem>>, vector<1x18x18x4xf32>
    %1 = vector.shape_cast %0 : vector<1x18x18x4xf32> to vector<18x18x4xf32>
    %2 = vector.extract_strided_slice %1 {offsets = [0, 0, 0], sizes = [16, 18, 4], strides = [1, 1, 1]} : vector<18x18x4xf32> to vector<16x18x4xf32>
    %3 = vector.extract_strided_slice %2 {offsets = [0, 0, 0], sizes = [16, 16, 4], strides = [1, 1, 1]} : vector<16x18x4xf32> to vector<16x16x4xf32>
    %4 = vector.extract_strided_slice %2 {offsets = [0, 1, 0], sizes = [16, 16, 4], strides = [1, 1, 1]} : vector<16x18x4xf32> to vector<16x16x4xf32>
    %5 = vector.extract_strided_slice %2 {offsets = [0, 2, 0], sizes = [16, 16, 4], strides = [1, 1, 1]} : vector<16x18x4xf32> to vector<16x16x4xf32>
    %6 = tpu.concatenate %3, %4, %5 in 2 : vector<16x16x4xf32>, vector<16x16x4xf32>, vector<16x16x4xf32> -> vector<16x16x12xf32>
    %7 = vector.extract_strided_slice %1 {offsets = [1, 0, 0], sizes = [16, 18, 4], strides = [1, 1, 1]} : vector<18x18x4xf32> to vector<16x18x4xf32>
    %8 = vector.extract_strided_slice %7 {offsets = [0, 0, 0], sizes = [16, 16, 4], strides = [1, 1, 1]} : vector<16x18x4xf32> to vector<16x16x4xf32>
    %9 = vector.extract_strided_slice %7 {offsets = [0, 1, 0], sizes = [16, 16, 4], strides = [1, 1, 1]} : vector<16x18x4xf32> to vector<16x16x4xf32>
    %10 = vector.extract_strided_slice %7 {offsets = [0, 2, 0], sizes = [16, 16, 4], strides = [1, 1, 1]} : vector<16x18x4xf32> to vector<16x16x4xf32>
    %11 = tpu.concatenate %8, %9, %10 in 2 : vector<16x16x4xf32>, vector<16x16x4xf32>, vector<16x16x4xf32> -> vector<16x16x12xf32>
    %12 = vector.extract_strided_slice %1 {offsets = [2, 0, 0], sizes = [16, 18, 4], strides = [1, 1, 1]} : vector<18x18x4xf32> to vector<16x18x4xf32>
    %13 = vector.extract_strided_slice %12 {offsets = [0, 0, 0], sizes = [16, 16, 4], strides = [1, 1, 1]} : vector<16x18x4xf32> to vector<16x16x4xf32>
    %14 = vector.extract_strided_slice %12 {offsets = [0, 1, 0], sizes = [16, 16, 4], strides = [1, 1, 1]} : vector<16x18x4xf32> to vector<16x16x4xf32>
    %15 = vector.extract_strided_slice %12 {offsets = [0, 2, 0], sizes = [16, 16, 4], strides = [1, 1, 1]} : vector<16x18x4xf32> to vector<16x16x4xf32>
    %16 = tpu.concatenate %13, %14, %15 in 2 : vector<16x16x4xf32>, vector<16x16x4xf32>, vector<16x16x4xf32> -> vector<16x16x12xf32>
    %17 = tpu.concatenate %6, %11, %16 in 2 : vector<16x16x12xf32>, vector<16x16x12xf32>, vector<16x16x12xf32> -> vector<16x16x36xf32>
    %18 = vector.shape_cast %17 : vector<16x16x36xf32> to vector<256x36xf32>
    %c0_3 = arith.constant 0 : index
    %c0_4 = arith.constant 0 : index
    %19 = vector.load %arg2[%c0_3, %c0_4] : memref<36x32xf32, #tpu.memory_space<vmem>>, vector<36x32xf32>
    %cst = arith.constant dense<0.000000e+00> : vector<256x32xf32>
    %20 = tpu.matmul %18, %19, %cst {dimension_numbers = #tpu.dot_dimension_numbers<[1], [0], [0], [1], [0, 0, 1, 1], [], []>} : vector<256x36xf32>, vector<36x32xf32>, vector<256x32xf32> -> vector<256x32xf32>
    %c0_5 = arith.constant 0 : index
    %c0_6 = arith.constant 0 : index
    %21 = vector.load %arg3[%c0_5, %c0_6] : memref<1x32xf32, #tpu.memory_space<vmem>>, vector<1x32xf32>
    %22 = vector.broadcast %21 : vector<1x32xf32> to vector<256x32xf32>
    %23 = arith.addf %20, %22 : vector<256x32xf32>
    %cst_7 = arith.constant dense<0.000000e+00> : vector<32xf32>
    %24 = vector.multi_reduction <add>, %23, %cst_7 [0] : vector<256x32xf32> to vector<32xf32>
    %25 = vector.shape_cast %24 : vector<32xf32> to vector<1x32xf32>
    %26 = arith.mulf %23, %23 : vector<256x32xf32>
    %cst_8 = arith.constant dense<0.000000e+00> : vector<32xf32>
    %27 = vector.multi_reduction <add>, %26, %cst_8 [0] : vector<256x32xf32> to vector<32xf32>
    %28 = vector.shape_cast %27 : vector<32xf32> to vector<1x32xf32>
    %29 = tpu.concatenate %25, %28 in 0 : vector<1x32xf32>, vector<1x32xf32> -> vector<2x32xf32>
    %c0_9 = arith.constant 0 : index
    %c0_10 = arith.constant 0 : index
    %c0_11 = arith.constant 0 : index
    %30 = vector.load %arg4[%c0_9, %c0_10, %c0_11] : memref<1x2x32xf32, #tpu.memory_space<vmem>>, vector<1x2x32xf32>
    %31 = vector.shape_cast %30 : vector<1x2x32xf32> to vector<2x32xf32>
    %32 = vector.shape_cast %29 : vector<2x32xf32> to vector<1x2x32xf32>
    tpu.vector_store %arg4[%c0_9, %c0_10, %c0_11], %32 {strides = array<i32>} : memref<1x2x32xf32, #tpu.memory_space<vmem>>, vector<1x2x32xf32>,
    return
  }
  func.func @transform_0(%arg0: i32) -> (i32, i32, i32, i32) {
    %c0_i32 = arith.constant 0 : i32
    %c0_i32_0 = arith.constant 0 : i32
    %c0_i32_1 = arith.constant 0 : i32
    %c0_i32_2 = arith.constant 0 : i32
    return %arg0, %c0_i32, %c0_i32_0, %c0_i32_1 : i32, i32, i32, i32
  }
  func.func @transform_1(%arg0: i32) -> (i32, i32) {
    %c0_i32 = arith.constant 0 : i32
    %c0_i32_0 = arith.constant 0 : i32
    %c0_i32_1 = arith.constant 0 : i32
    return %c0_i32, %c0_i32_0 : i32, i32
  }
  func.func @transform_2(%arg0: i32) -> (i32, i32) {
    %c0_i32 = arith.constant 0 : i32
    %c0_i32_0 = arith.constant 0 : i32
    %c0_i32_1 = arith.constant 0 : i32
    return %c0_i32, %c0_i32_0 : i32, i32
  }
  func.func @transform_3(%arg0: i32) -> (i32, i32, i32) {
    %c0_i32 = arith.constant 0 : i32
    %c0_i32_0 = arith.constant 0 : i32
    %c0_i32_1 = arith.constant 0 : i32
    return %arg0, %c0_i32, %c0_i32_0 : i32, i32, i32
  }
}

module attributes {stable_mosaic.version = 11 : i64} {
  func.func @_conv_bn_act_kernel(%arg0: i32, %arg1: memref<1x18x18x4xf32, #tpu.memory_space<vmem>>, %arg2: memref<36x32xf32, #tpu.memory_space<vmem>>, %arg3: memref<1x32xf32, #tpu.memory_space<vmem>>, %arg4: memref<1x32xf32, #tpu.memory_space<vmem>>, %arg5: memref<1x32xf32, #tpu.memory_space<vmem>>, %arg6: memref<1x256x32xf32, #tpu.memory_space<vmem>>) attributes {dimension_semantics = [#tpu.dimension_semantics<parallel>], iteration_bounds = array<i64: 2>, scalar_prefetch = 0 : i64, scratch_operands = 0 : i64, tpu.core_type = #tpu.core_type<tc>, window_params = [{transform_indices = @transform_0, window_bounds = array<i64: 1, 18, 18, 4>}, {pipeline_mode = #tpu.pipeline_mode<synchronous>, transform_indices = @transform_1, window_bounds = array<i64: 36, 32>}, {pipeline_mode = #tpu.pipeline_mode<synchronous>, transform_indices = @transform_2, window_bounds = array<i64: 1, 32>}, {pipeline_mode = #tpu.pipeline_mode<synchronous>, transform_indices = @transform_3, window_bounds = array<i64: 1, 32>}, {pipeline_mode = #tpu.pipeline_mode<synchronous>, transform_indices = @transform_4, window_bounds = array<i64: 1, 32>}, {transform_indices = @transform_5, window_bounds = array<i64: 1, 256, 32>}]} {
    %c0 = arith.constant 0 : index
    %c0_0 = arith.constant 0 : index
    %c0_1 = arith.constant 0 : index
    %c0_2 = arith.constant 0 : index
    %0 = vector.load %arg1[%c0, %c0_0, %c0_1, %c0_2] : memref<1x18x18x4xf32, #tpu.memory_space<vmem>>, vector<1x18x18x4xf32>
    %1 = vector.shape_cast %0 : vector<1x18x18x4xf32> to vector<18x18x4xf32>
    %2 = vector.extract_strided_slice %1 {offsets = [0, 0, 0], sizes = [16, 18, 4], strides = [1, 1, 1]} : vector<18x18x4xf32> to vector<16x18x4xf32>
    %3 = vector.extract_strided_slice %2 {offsets = [0, 0, 0], sizes = [16, 16, 4], strides = [1, 1, 1]} : vector<16x18x4xf32> to vector<16x16x4xf32>
    %4 = vector.extract_strided_slice %2 {offsets = [0, 1, 0], sizes = [16, 16, 4], strides = [1, 1, 1]} : vector<16x18x4xf32> to vector<16x16x4xf32>
    %5 = vector.extract_strided_slice %2 {offsets = [0, 2, 0], sizes = [16, 16, 4], strides = [1, 1, 1]} : vector<16x18x4xf32> to vector<16x16x4xf32>
    %6 = tpu.concatenate %3, %4, %5 in 2 : vector<16x16x4xf32>, vector<16x16x4xf32>, vector<16x16x4xf32> -> vector<16x16x12xf32>
    %7 = vector.extract_strided_slice %1 {offsets = [1, 0, 0], sizes = [16, 18, 4], strides = [1, 1, 1]} : vector<18x18x4xf32> to vector<16x18x4xf32>
    %8 = vector.extract_strided_slice %7 {offsets = [0, 0, 0], sizes = [16, 16, 4], strides = [1, 1, 1]} : vector<16x18x4xf32> to vector<16x16x4xf32>
    %9 = vector.extract_strided_slice %7 {offsets = [0, 1, 0], sizes = [16, 16, 4], strides = [1, 1, 1]} : vector<16x18x4xf32> to vector<16x16x4xf32>
    %10 = vector.extract_strided_slice %7 {offsets = [0, 2, 0], sizes = [16, 16, 4], strides = [1, 1, 1]} : vector<16x18x4xf32> to vector<16x16x4xf32>
    %11 = tpu.concatenate %8, %9, %10 in 2 : vector<16x16x4xf32>, vector<16x16x4xf32>, vector<16x16x4xf32> -> vector<16x16x12xf32>
    %12 = vector.extract_strided_slice %1 {offsets = [2, 0, 0], sizes = [16, 18, 4], strides = [1, 1, 1]} : vector<18x18x4xf32> to vector<16x18x4xf32>
    %13 = vector.extract_strided_slice %12 {offsets = [0, 0, 0], sizes = [16, 16, 4], strides = [1, 1, 1]} : vector<16x18x4xf32> to vector<16x16x4xf32>
    %14 = vector.extract_strided_slice %12 {offsets = [0, 1, 0], sizes = [16, 16, 4], strides = [1, 1, 1]} : vector<16x18x4xf32> to vector<16x16x4xf32>
    %15 = vector.extract_strided_slice %12 {offsets = [0, 2, 0], sizes = [16, 16, 4], strides = [1, 1, 1]} : vector<16x18x4xf32> to vector<16x16x4xf32>
    %16 = tpu.concatenate %13, %14, %15 in 2 : vector<16x16x4xf32>, vector<16x16x4xf32>, vector<16x16x4xf32> -> vector<16x16x12xf32>
    %17 = tpu.concatenate %6, %11, %16 in 2 : vector<16x16x12xf32>, vector<16x16x12xf32>, vector<16x16x12xf32> -> vector<16x16x36xf32>
    %18 = vector.shape_cast %17 : vector<16x16x36xf32> to vector<256x36xf32>
    %c0_3 = arith.constant 0 : index
    %c0_4 = arith.constant 0 : index
    %19 = vector.load %arg2[%c0_3, %c0_4] : memref<36x32xf32, #tpu.memory_space<vmem>>, vector<36x32xf32>
    %cst = arith.constant dense<0.000000e+00> : vector<256x32xf32>
    %20 = tpu.matmul %18, %19, %cst {dimension_numbers = #tpu.dot_dimension_numbers<[1], [0], [0], [1], [0, 0, 1, 1], [], []>} : vector<256x36xf32>, vector<36x32xf32>, vector<256x32xf32> -> vector<256x32xf32>
    %c0_5 = arith.constant 0 : index
    %c0_6 = arith.constant 0 : index
    %21 = vector.load %arg3[%c0_5, %c0_6] : memref<1x32xf32, #tpu.memory_space<vmem>>, vector<1x32xf32>
    %22 = vector.broadcast %21 : vector<1x32xf32> to vector<256x32xf32>
    %23 = arith.addf %20, %22 : vector<256x32xf32>
    %c0_7 = arith.constant 0 : index
    %c0_8 = arith.constant 0 : index
    %24 = vector.load %arg4[%c0_7, %c0_8] : memref<1x32xf32, #tpu.memory_space<vmem>>, vector<1x32xf32>
    %25 = vector.broadcast %24 : vector<1x32xf32> to vector<256x32xf32>
    %26 = arith.mulf %23, %25 : vector<256x32xf32>
    %c0_9 = arith.constant 0 : index
    %c0_10 = arith.constant 0 : index
    %27 = vector.load %arg5[%c0_9, %c0_10] : memref<1x32xf32, #tpu.memory_space<vmem>>, vector<1x32xf32>
    %28 = vector.broadcast %27 : vector<1x32xf32> to vector<256x32xf32>
    %29 = arith.addf %26, %28 : vector<256x32xf32>
    %cst_11 = arith.constant 0.000000e+00 : f32
    %30 = vector.broadcast %cst_11 : f32 to vector<256x32xf32>
    %31 = arith.cmpf oge, %29, %30 : vector<256x32xf32>
    %cst_12 = arith.constant 2.000000e-01 : f32
    %32 = vector.broadcast %cst_12 : f32 to vector<256x32xf32>
    %33 = arith.mulf %32, %29 : vector<256x32xf32>
    %34 = arith.select %31, %29, %33 : vector<256x32xi1>, vector<256x32xf32>
    %c0_13 = arith.constant 0 : index
    %c0_14 = arith.constant 0 : index
    %c0_15 = arith.constant 0 : index
    %35 = vector.load %arg6[%c0_13, %c0_14, %c0_15] : memref<1x256x32xf32, #tpu.memory_space<vmem>>, vector<1x256x32xf32>
    %36 = vector.shape_cast %35 : vector<1x256x32xf32> to vector<256x32xf32>
    %37 = vector.shape_cast %34 : vector<256x32xf32> to vector<1x256x32xf32>
    tpu.vector_store %arg6[%c0_13, %c0_14, %c0_15], %37 {strides = array<i32>} : memref<1x256x32xf32, #tpu.memory_space<vmem>>, vector<1x256x32xf32>,
    return
  }
  func.func @transform_0(%arg0: i32) -> (i32, i32, i32, i32) {
    %c0_i32 = arith.constant 0 : i32
    %c0_i32_0 = arith.constant 0 : i32
    %c0_i32_1 = arith.constant 0 : i32
    %c0_i32_2 = arith.constant 0 : i32
    return %arg0, %c0_i32, %c0_i32_0, %c0_i32_1 : i32, i32, i32, i32
  }
  func.func @transform_1(%arg0: i32) -> (i32, i32) {
    %c0_i32 = arith.constant 0 : i32
    %c0_i32_0 = arith.constant 0 : i32
    %c0_i32_1 = arith.constant 0 : i32
    return %c0_i32, %c0_i32_0 : i32, i32
  }
  func.func @transform_2(%arg0: i32) -> (i32, i32) {
    %c0_i32 = arith.constant 0 : i32
    %c0_i32_0 = arith.constant 0 : i32
    %c0_i32_1 = arith.constant 0 : i32
    return %c0_i32, %c0_i32_0 : i32, i32
  }
  func.func @transform_3(%arg0: i32) -> (i32, i32) {
    %c0_i32 = arith.constant 0 : i32
    %c0_i32_0 = arith.constant 0 : i32
    %c0_i32_1 = arith.constant 0 : i32
    return %c0_i32, %c0_i32_0 : i32, i32
  }
  func.func @transform_4(%arg0: i32) -> (i32, i32) {
    %c0_i32 = arith.constant 0 : i32
    %c0_i32_0 = arith.constant 0 : i32
    %c0_i32_1 = arith.constant 0 : i32
    return %c0_i32, %c0_i32_0 : i32, i32
  }
  func.func @transform_5(%arg0: i32) -> (i32, i32, i32) {
    %c0_i32 = arith.constant 0 : i32
    %c0_i32_0 = arith.constant 0 : i32
    %c0_i32_1 = arith.constant 0 : i32
    return %arg0, %c0_i32, %c0_i32_0 : i32, i32, i32
  }
}

</mosaic_0001>

<bundles_post_ra>
// kernel: tile.18
= control target key start
LH: loop header
LB: loop body
LE: loop exit
PB: predicated region body
PF: predicated region fallthrough
CT: control target
= control target key end

     0   :  { %s22_s0 = inlined_call_operand.vmem [shape: f32[8], index: 0, kind: input, shape index: {}]   ;;  %s23_s1 = inlined_call_operand.vmem [shape: f32[4,8], index: 1, kind: output, shape index: {}]  }
   0x1   :  { %v4_v0 = vld [vmem:[%s22_s0] ss:$0 sm:$0xff] }
   0x2   :  { %5 = vst [vmem:[%s23_s1] sm:$0xf] %v4_v0 }

// kernel: tile.19
= control target key start
LH: loop header
LB: loop body
LE: loop exit
PB: predicated region body
PF: predicated region fallthrough
CT: control target
= control target key end

     0   :  { %vm7_vm0 = vcmask 64512   ;;  %s37_s8 = smov 8   ;;  %s38_s9 = smov 16   ;;  %vm13_vm1 = vcmask 261312   ;;  %vm19_vm2 = vcmask 195712   ;;  %vm25_vm3 = vcmask 130112   ;;  %s55_s0 = inlined_call_operand.vmem [shape: f32[4,8], index: 0, kind: input, shape index: {}]   ;;  %s56_s1 = inlined_call_operand.vmem [shape: f32[1,32], index: 1, kind: output, shape index: {}]  }
   0x1   :  { %v4_v0 = vld [vmem:[%s55_s0] sm:$0xf]  ;;  %s36_s0 = smov 24  }
   0x2   :  { %5 = vst [vmem:[#allocation1] sm:$0xf] %v4_v0 }
   0x9   :  { %v10_v1 = vld [vmem:[#allocation1 + $0x3] sm:$0x1]   ;;  %v22_v2 = vld [vmem:[#allocation1 + $0x1] sm:$0x1]   ;;  %v6_v3 = vld [vmem:[#allocation1] sm:$0x1]  }
   0xa   :  { %11 = vrot.lane.b32.xlu0 %v10_v1, %s36_s0  ;;  %23 = vrot.lane.b32.xlu1 %v22_v2, %s37_s8  ;;  %v16_v4 = vld [vmem:[#allocation1 + $0x2] sm:$0x1]   ;;  %8 = vst.msk [vmem:[#allocation0] sm:$0x1] %vm7_vm0, %v6_v3  }
   0xe   :  { %17 = vrot.lane.b32.xlu0 %v16_v4, %s38_s9 }
  0x7c   :  { %v12_v5 = vpop.permute.xlu0 %11   ;;  %v24_v6 = vpop.permute.xlu1 %23  }
  0x7d   :  { %14 = vst.msk [vmem:[#allocation0] sm:$0x1] %vm13_vm1, %v12_v5  }
  0x80   :  { %v18_v7 = vpop.permute.xlu0 %17  }
  0x81   :  { %20 = vst.msk [vmem:[#allocation0] sm:$0x1] %vm19_vm2, %v18_v7  }
  0x82   :  { %26 = vst.msk [vmem:[#allocation0] sm:$0x1] %vm25_vm3, %v24_v6  }
  0x89   :  { %v30_v8 = vld [vmem:[#allocation0] sm:$0x1] }
  0x8a   :  { %32 = vst [vmem:[%s56_s1] sm:$0x1] %v30_v8 }

// kernel: squeeze.34
= control target key start
LH: loop header
LB: loop body
LE: loop exit
PB: predicated region body
PF: predicated region fallthrough
CT: control target
= control target key end

     0   :  { %s34_s8 = smov 104   ;;  %vm7_vm0 = vcmask 64512   ;;  %s35_s11 = smov 112   ;;  %s61_s0 = inlined_call_operand.vmem [shape: f32[2,32], index: 0, kind: input, shape index: {}]   ;;  %s62_s1 = inlined_call_operand.vmem [shape: f32[8,8], index: 1, kind: output, shape index: {}]  }
   0x1   :  { %v4_v0 = vld [vmem:[%s61_s0] sm:$0x3]  ;;  %s33_s0 = smov 120  }
   0x2   :  { %5 = vst [vmem:[#allocation0] sm:$0x3] %v4_v0 }
   0x9   :  { %v9_v1 = vld [vmem:[#allocation0] sm:$0x3]  }
   0xa   :  { %v21_v2 = vld [vmem:[#allocation0] sm:$0x3]   ;;  %10 = vrot.lane.b32.xlu0 %v9_v1, %s33_s0 }
   0xb   :  { %22 = vrot.lane.b32.xlu1 %v21_v2, %s34_s8  ;;  %v6_v3 = vld [vmem:[#allocation0] sm:$0x3]  }
   0xc   :  { %v15_v4 = vld [vmem:[#allocation0] sm:$0x3]   ;;  %8 = vst.msk [vmem:[%s62_s1] ss:$4 sm:$0x3] %vm7_vm0, %v6_v3  }
   0xe   :  { %16 = vrot.lane.b32.xlu0 %v15_v4, %s35_s11 }
  0x7c   :  { %v11_v5 = vpop.permute.xlu0 %10  }
  0x7d   :  { %v23_v6 = vpop.permute.xlu1 %22   ;;  %27 = vst.msk [vmem:[%s62_s1 + $0x1] ss:$4 sm:$0x3] %vm7_vm0, %v11_v5  }
  0x7e   :  { %29 = vst.msk [vmem:[%s62_s1 + $0x3] ss:$4 sm:$0x3] %vm7_vm0, %v23_v6  }
  0x80   :  { %v17_v7 = vpop.permute.xlu0 %16  }
  0x81   :  { %28 = vst.msk [vmem:[%s62_s1 + $0x2] ss:$4 sm:$0x3] %vm7_vm0, %v17_v7  }

// kernel: decoder_block.3
= control target key start
LH: loop header
LB: loop body
LE: loop exit
PB: predicated region body
PF: predicated region fallthrough
CT: control target
= control target key end

     0   :  { %s1908_s18 = smov 0   ;;  %s3042_s0 = inlined_call_operand.vmem [shape: f32[2,18,18,4], index: 0, kind: input, shape index: {}]   ;;  %s3043_s1 = inlined_call_operand.vmem [shape: f32[36,32], index: 1, kind: input, shape index: {}]   ;;  %s3044_s2 = inlined_call_operand.vmem [shape: f32[1,32], index: 2, kind: input, shape index: {}]   ;;  %s3045_s3 = inlined_call_operand.vmem [shape: f32[1,32], index: 3, kind: input, shape index: {}]   ;;  %s3046_s4 = inlined_call_operand.vmem [shape: f32[1,32], index: 4, kind: input, shape index: {}]   ;;  %s3047_s5 = inlined_call_operand.vmem [shape: f32[2,256,32], index: 5, kind: output, shape index: {}]  }
   0x1 LB: > { %s1697_s19 = sadd.s32 4294967295, %s1872_s18   ;;  %p1701_p0 = scmp.ge.s32.totalorder %s1872_s18, 1  ;;  %s1872_s18 = sphi %s1908_s18, %s15_s18  }
   0x2   : > { %p187_p1 = scmp.lt.s32.totalorder %s1872_s18, 3 }
   0x4   : > { %p188_p2 = pnand %p1701_p0, %p187_p1 }
   0x5   : > { %p215_p3 = scmp.lt.s32.totalorder (!%p188_p2), %s1697_s19, 1  ;;  %vm327_vm0 = vcmask (!%p188_p2), 1046528   ;;  %s1874_s24 = smov (!%p188_p2), 4   ;;  %vm504_vm1 = vcmask (!%p188_p2), 1045504   ;;  %vm681_vm2 = vcmask (!%p188_p2), 31744   ;;  %vm714_vm3 = vcmask (!%p188_p2), 64512  }
   0x6   : > { %191 = sbr.rel (%p188_p2) target bundleno = 629 (0x275), region = 40  ;;  %s1875_s25 = smov (!%p188_p2), 8   ;;  %vm1206_vm4 = vcmask (!%p188_p2), 1043456   ;;  %vm1031_vm5 = vcmask (!%p188_p2), 97280   ;;  %vm1064_vm6 = vcmask (!%p188_p2), 195584   ;;  %vm1109_vm7 = vcmask (!%p188_p2), 293888  }
   0x7   : > { %s1876_s11 = smov (!%p188_p2), 12   ;;  %s1877_s12 = smov (!%p188_p2), 24   ;;  %vm1609_vm8 = vcmask (!%p188_p2), 261120  }
   0xd   : > { %s3089_s19 = smov (!%p215_p3, %s1697_s19), 1 }
   0xe   : > { %s1853_s20 = smul.u32 432, %s3089_s19  ;;  %s1743_s21 = sshll.u32 %s3089_s19, 8 }
  0x10   : > { %s1922_s23 = scalar_lea.vmem %s3042_s0, %s1853_s20 }
  0x11   : > { %v1925_v0 = vld [vmem:[%s1922_s23 + $0x20] sm:$0xff]  ;;  %v1928_v1 = vld [vmem:[%s1922_s23 + $0x28] sm:$0x3]  ;;  %v1931_v2 = vld [vmem:[%s1922_s23 + $0x18] sm:$0xff] }
  0x12   : > { %v334_v3 = vrot.slane %v1925_v0, 1  ;;  %v336_v4 = vrot.slane %v1928_v1, 1  ;;  %v333_v5 = vrot.slane %v1931_v2, 1  ;;  %v1937_v6 = vld [vmem:[%s1922_s23 + $0x30] sm:$0xff]  ;;  %v1940_v7 = vld [vmem:[%s1922_s23 + $0x38] sm:$0xff]  ;;  %v1948_v11 = vld [vmem:[%s1922_s23 + $0xe0] sm:$0xff] }
  0x13   : > { %v1943_v8 = vld [vmem:[%s1922_s23 + $0xd8] sm:$0xff]  ;;  %v338_v9 = vrot.slane %v1937_v6, 1  ;;  %v339_v10 = vrot.slane %v1940_v7, 1  ;;  %v1952_v13 = vld [vmem:[%s1922_s23 + $0xf0] sm:$0xff]  ;;  %v374_v17 = vrot.slane %v1948_v11, 1  ;;  %v551_v25 = vrot.slane %v1948_v11, 2 }
  0x14   : > { %v373_v12 = vrot.slane %v1943_v8, 1  ;;  %v1955_v14 = vld [vmem:[%s1922_s23 + $0xf8] sm:$0xff]  ;;  %v337_v15 = vsel %vm327_vm0, %v334_v3, %v336_v4  ;;  %v335_v16 = vsel %vm327_vm0, %v333_v5, %v334_v3  ;;  %v254_v18 = vld [vmem:[%s1922_s23 + $0xe8] sm:$0x3]  ;;  %v378_v19 = vrot.slane %v1952_v13, 1  ;;  %v1993_v42 = vld [vmem:[%s1922_s23 + $0x140] sm:$0xff] }
  0x15   : > { %414 = vrot.lane.b32.xlu1 %v337_v15, %s1874_s24  ;;  %412 = vrot.lane.b32.xlu0 %v335_v16, %s1874_s24  ;;  %v340_v20 = vsel %vm327_vm0, %v338_v9, %v339_v10  ;;  %v379_v22 = vrot.slane %v1955_v14, 1  ;;  %v376_v23 = vrot.slane %v254_v18, 1  ;;  %v550_v24 = vrot.slane %v1943_v8, 2  ;;  %v257_v30 = vld [vmem:[%s1922_s23 + $0x100] sm:$0x3]  ;;  %v2009_v56 = vld [vmem:[%s1922_s23 + $0x108] sm:$0xff] }
  0x16   : > { %v375_v21 = vsel %vm327_vm0, %v373_v12, %v374_v17  ;;  %v510_v28 = vrot.slane %v1931_v2, 2  ;;  %v511_v29 = vrot.slane %v1925_v0, 2  ;;  %v1977_v31 = vld [vmem:[%s1922_s23 + $0x40] sm:$0x3]  ;;  %v381_v34 = vrot.slane %v257_v30, 1  ;;  %v2012_v57 = vld [vmem:[%s1922_s23 + $0x158] sm:$0xff] }
  0x17   : > { %v380_v26 = vsel %vm327_vm0, %v378_v19, %v379_v22  ;;  %v377_v27 = vsel %vm327_vm0, %v374_v17, %v376_v23  ;;  %v552_v32 = vsel %vm504_vm1, %v550_v24, %v551_v25  ;;  %v341_v35 = vrot.slane %v1977_v31, 1  ;;  %v1997_v44 = vld [vmem:[%s1922_s23 + $0x80] sm:$0xff]  ;;  %v266_v45 = vld [vmem:[%s1922_s23 + $0x148] sm:$0x3]  ;;  %v2015_v58 = vld [vmem:[%s1922_s23 + $0x98] sm:$0xff] }
  0x18   : > { %v512_v33 = vsel %vm504_vm1, %v510_v28, %v511_v29  ;;  %v515_v36 = vrot.slane %v1937_v6, 2  ;;  %v382_v37 = vsel %vm327_vm0, %v379_v22, %v381_v34  ;;  %v516_v39 = vrot.slane %v1940_v7, 2  ;;  %v242_v46 = vld [vmem:[%s1922_s23 + $0x88] sm:$0x3]  ;;  %v269_v63 = vld [vmem:[%s1922_s23 + $0x160] sm:$0x3] }
  0x19   : > { %416 = vrot.lane.b32.xlu1 %v340_v20, %s1874_s24  ;;  %444 = vrot.lane.b32.xlu0 %v375_v21, %s1874_s24  ;;  %v342_v38 = vsel %vm327_vm0, %v339_v10, %v341_v35  ;;  %v513_v40 = vrot.slane %v1928_v1, 2  ;;  %v555_v41 = vrot.slane %v1952_v13, 2  ;;  %v556_v43 = vrot.slane %v1955_v14, 2  ;;  %v245_v1 = vld [vmem:[%s1922_s23 + $0xa0] sm:$0x3]  ;;  %v2034_v3 = vld [vmem:[%s1922_s23 + $0x110] sm:$0xff] }
  0x1a   : > { %v553_v47 = vrot.slane %v254_v18, 2  ;;  %v517_v48 = vsel %vm504_vm1, %v515_v36, %v516_v39  ;;  %v3067_v50 = vrot.slane %v1993_v42, 1  ;;  %v3066_v51 = vrot.slane %v1997_v44, 1  ;;  %v2037_v4 = vld [vmem:[%s1922_s23 + $0x48] sm:$0xff]  ;;  %v2042_v15 = vld [vmem:[%s1922_s23 + $0x50] sm:$0xff] }
  0x1b   : > { %v514_v49 = vsel %vm504_vm1, %v511_v29, %v513_v40  ;;  %v396_v52 = vrot.slane %v266_v45, 1  ;;  %v356_v53 = vrot.slane %v242_v46, 1  ;;  %v557_v54 = vsel %vm504_vm1, %v555_v41, %v556_v43  ;;  %v2047_v18 = vld [vmem:[%s1922_s23 + $0x118] sm:$0x3]  ;;  %v2069_v28 = vld [vmem:[%s1922_s23 + $0xb0] sm:$0xff] }
  0x1c   : > { %v558_v55 = vrot.slane %v257_v30, 2  ;;  %v554_v59 = vsel %vm504_vm1, %v551_v25, %v553_v47  ;;  %v518_v60 = vrot.slane %v1977_v31, 2  ;;  %v3062_v5 = vrot.slane %v1993_v42, 2  ;;  %v248_v34 = vld [vmem:[%s1922_s23 + $0xb8] sm:$0x3] }
  0x1d   : > { %448 = vrot.lane.b32.xlu1 %v380_v26, %s1874_s24  ;;  %446 = vrot.lane.b32.xlu0 %v377_v27, %s1874_s24  ;;  %v2024_v61 = vsel %vm327_vm0, %v3067_v50, %v396_v52  ;;  %v2029_v62 = vsel %vm327_vm0, %v3066_v51, %v356_v53  ;;  %v3059_v9 = vrot.slane %v1997_v44, 2  ;;  %v573_v10 = vrot.slane %v266_v45, 2  ;;  %v2066_v27 = vld [vmem:[%s1922_s23 + $0x170] sm:$0xff]  ;;  %v2086_v35 = vld [vmem:[%s1922_s23 + $0x58] sm:$0x3] }
  0x1e   : > { %v533_v12 = vrot.slane %v242_v46, 2  ;;  %v3055_v16 = vrot.slane %v2012_v57, 1  ;;  %v3054_v17 = vrot.slane %v2015_v58, 1  ;;  %v401_v21 = vrot.slane %v269_v63, 1  ;;  %v2247_v51 = vld [vmem:[%s1922_s23 + $0x138] sm:$0xff] }
  0x1f   : > { %v2052_v19 = vsel %vm504_vm1, %v3062_v5, %v573_v10  ;;  %v361_v22 = vrot.slane %v245_v1, 1  ;;  %v559_v23 = vsel %vm504_vm1, %v556_v43, %v558_v55  ;;  %v383_v24 = vrot.slane %v2009_v56, 1  ;;  %v239_v5 = vld [vmem:[%s1922_s23 + $0x70] sm:$0x3]  ;;  %v2250_v50 = vld [vmem:[%s1922_s23 + $0x78] sm:$0xff] }
  0x20   : > { %v2057_v20 = vsel %vm504_vm1, %v3059_v9, %v533_v12  ;;  %v384_v25 = vrot.slane %v2034_v3, 1  ;;  %v343_v26 = vrot.slane %v2037_v4, 1  ;;  %v519_v29 = vsel %vm504_vm1, %v516_v39, %v518_v60 }
  0x21   : > { %621 = vrot.lane.b32.xlu1 %v552_v32, %s1875_s25  ;;  %589 = vrot.lane.b32.xlu0 %v512_v33, %s1875_s25  ;;  %v344_v30 = vrot.slane %v2042_v15, 1  ;;  %v2076_v31 = vsel %vm327_vm0, %v3055_v16, %v401_v21  ;;  %v2081_v32 = vsel %vm327_vm0, %v3054_v17, %v361_v22  ;;  %v272_v33 = vld [vmem:[%s1922_s23 + $0x178] sm:$0x3]  ;;  %v3053_v36 = vrot.slane %v2012_v57, 2  ;;  %v2174_v16 = vld [vmem:[%s1922_s23 + $0x128] sm:$0xff] }
  0x22   : > { %v538_v39 = vrot.slane %v245_v1, 2  ;;  %v386_v40 = vrot.slane %v2047_v18, 1  ;;  %v3051_v41 = vrot.slane %v2066_v27, 1  ;;  %v3050_v43 = vrot.slane %v2069_v28, 1  ;;  %v2124_v1 = vld [vmem:[%s1922_s23 + $0xc8] sm:$0xff] }
  0x23   : > { %v406_v47 = vrot.slane %v272_v33, 1  ;;  %v345_v52 = vsel %vm327_vm0, %v343_v26, %v344_v30  ;;  %v346_v53 = vrot.slane %v2086_v35, 1  ;;  %v561_v55 = vrot.slane %v2034_v3, 2 }
  0x24   : > { %v3049_v10 = vrot.slane %v2066_v27, 2  ;;  %v3048_v12 = vrot.slane %v2069_v28, 2  ;;  %v583_v21 = vrot.slane %v272_v33, 2  ;;  %v543_v22 = vrot.slane %v248_v34, 2 }
  0x25   : > { %450 = vrot.lane.b32.xlu1 %v382_v37, %s1874_s24  ;;  %418 = vrot.lane.b32.xlu0 %v342_v38, %s1874_s24  ;;  %v3052_v37 = vrot.slane %v2015_v58, 2  ;;  %v578_v38 = vrot.slane %v269_v63, 2  ;;  %v2121_v63 = vld [vmem:[%s1922_s23 + $0x188] sm:$0xff]  ;;  %v520_v26 = vrot.slane %v2037_v4, 2 }
  0x26   : > { %v2140_v33 = vsel %vm504_vm1, %v3049_v10, %v583_v21  ;;  %v3057_v21 = vrot.slane %v2121_v63, 2 }
  0x27   : > { %v2098_v45 = vsel %vm504_vm1, %v3053_v36, %v578_v38  ;;  %v2103_v46 = vsel %vm504_vm1, %v3052_v37, %v538_v39  ;;  %v275_v38 = vld [vmem:[%s1922_s23 + $0x190] sm:$0x3]  ;;  %v347_v39 = vsel %vm327_vm0, %v344_v30, %v346_v53  ;;  %v3058_v30 = vrot.slane %v2121_v63, 1  ;;  %v2168_v37 = vld [vmem:[%s1922_s23 + $0x8] sm:$0xff] }
  0x28   : > { %v3061_v53 = vrot.slane %v2124_v1, 2  ;;  %v227_v36 = vld [vmem:[%s1922_s23 + $0x10] sm:$0x3] }
  0x29   : > { %593 = vrot.lane.b32.xlu1 %v517_v48, %s1875_s25  ;;  %591 = vrot.lane.b32.xlu0 %v514_v49, %s1875_s25  ;;  %v366_v48 = vrot.slane %v248_v34, 1  ;;  %v385_v49 = vsel %vm327_vm0, %v383_v24, %v384_v25  ;;  %v387_v24 = vsel %vm327_vm0, %v384_v25, %v386_v40  ;;  %v2145_v34 = vsel %vm504_vm1, %v3048_v12, %v543_v22  ;;  %v2148_v25 = vld [vmem:[%s1922_s23 + $0x1a0] sm:$0xff]  ;;  %v278_v40 = vld [vmem:[%s1922_s23 + $0x1a8] sm:$0x3] }
  0x2a   : > { %v753_v22 = vrot.slane %v275_v38, 1  ;;  %v764_v12 = vrot.slane %v275_v38, 2  ;;  %v523_v38 = vrot.slane %v2086_v35, 2  ;;  %v331_v9 = vrot.slane %v227_v36, 1 }
  0x2b   : > { %v2118_v60 = vsel %vm327_vm0, %v3050_v43, %v366_v48  ;;  %v3060_v43 = vrot.slane %v2148_v25, 1 }
  0x2d   : > { %625 = vrot.lane.b32.xlu1 %v557_v54, %s1875_s25  ;;  %623 = vrot.lane.b32.xlu0 %v554_v59, %s1875_s25  ;;  %v560_v54 = vrot.slane %v2009_v56, 2  ;;  %v2113_v59 = vsel %vm327_vm0, %v3051_v41, %v406_v47  ;;  %v563_v47 = vrot.slane %v2047_v18, 2  ;;  %v3056_v18 = vrot.slane %v2124_v1, 1 }
  0x2e   : > { %v782_v41 = vrot.slane %v278_v40, 1 }
  0x2f   : > { %v562_v48 = vsel %vm504_vm1, %v560_v54, %v561_v55 }
  0x31   : > { %627 = vrot.lane.b32.xlu1 %v559_v23, %s1875_s25  ;;  %595 = vrot.lane.b32.xlu0 %v519_v29, %s1875_s25  ;;  %v251_v23 = vld [vmem:[%s1922_s23 + $0xd0] sm:$0x3]  ;;  %v521_v29 = vrot.slane %v2042_v15, 2 }
  0x32   : > { %v548_v10 = vrot.slane %v251_v23, 2 }
  0x33   : > { %v522_v17 = vsel %vm504_vm1, %v520_v26, %v521_v29  ;;  %v2200_v26 = vsel %vm327_vm0, %v3060_v43, %v782_v41  ;;  %v508_v43 = vrot.slane %v227_v36, 2 }
  0x34   : > { %v2195_v35 = vsel %vm504_vm1, %v3061_v53, %v548_v10  ;;  %v389_v10 = vrot.slane %v2174_v16, 1 }
  0x35   : > { %452 = vrot.lane.b32.xlu1 %v385_v49, %s1874_s24  ;;  %420 = vrot.lane.b32.xlu0 %v345_v52, %s1874_s24  ;;  %v371_v49 = vrot.slane %v251_v23, 1  ;;  %v2155_v52 = vld [vmem:[%s1922_s23 + $0x120] sm:$0xff]  ;;  %v2184_v23 = vsel %vm504_vm1, %v3057_v21, %v764_v12  ;;  %v564_v12 = vsel %vm504_vm1, %v561_v55, %v563_v47  ;;  %v524_v55 = vsel %vm504_vm1, %v521_v29, %v523_v38 }
  0x36   : > { %v388_v21 = vrot.slane %v2155_v52, 1 }
  0x37   : > { %v2164_v54 = vsel %vm327_vm0, %v3056_v18, %v371_v49  ;;  %v2190_v49 = vld [vmem:[%s1922_s23 + $0x68] sm:$0xff]  ;;  %v793_v18 = vrot.slane %v278_v40, 2  ;;  %v3064_v40 = vrot.slane %v2168_v37, 2 }
  0x38   : > { %v349_v53 = vrot.slane %v2190_v49, 1  ;;  %v390_v36 = vsel %vm327_vm0, %v388_v21, %v389_v10 }
  0x39   : > { %454 = vrot.lane.b32.xlu1 %v387_v24, %s1874_s24  ;;  %422 = vrot.lane.b32.xlu0 %v347_v39, %s1874_s24  ;;  %v2179_v24 = vsel %vm327_vm0, %v3058_v30, %v753_v22  ;;  %v2187_v39 = vld [vmem:[%s1922_s23 + $0x60] sm:$0xff]  ;;  %v3063_v22 = vrot.slane %v2148_v25, 2  ;;  %v3065_v30 = vrot.slane %v2168_v37, 1 }
  0x3a   : > { %v348_v47 = vrot.slane %v2187_v39, 1  ;;  %v525_v21 = vrot.slane %v2187_v39, 2 }
  0x3b   : > { %v2212_v41 = vsel %vm504_vm1, %v3063_v22, %v793_v18  ;;  %v2228_v18 = vsel %vm504_vm1, %v3064_v40, %v508_v43  ;;  %v351_v22 = vrot.slane %v239_v5, 1  ;;  %v566_v43 = vrot.slane %v2174_v16, 2 }
  0x3c   : > { %v350_v29 = vsel %vm327_vm0, %v348_v47, %v349_v53  ;;  %v526_v47 = vrot.slane %v2190_v49, 2 }
  0x3d   : > { %629 = vrot.lane.b32.xlu1 %v562_v48, %s1875_s25  ;;  %597 = vrot.lane.b32.xlu0 %v522_v17, %s1875_s25  ;;  %v2221_v17 = vsel %vm327_vm0, %v3065_v30, %v331_v9  ;;  %v263_v48 = vld [vmem:[%s1922_s23 + $0x130] sm:$0x3]  ;;  %v565_v9 = vrot.slane %v2155_v52, 2  ;;  %v528_v30 = vrot.slane %v239_v5, 2  ;;  %v3068_v5 = vrot.slane %v1993_v42, 1 }
  0x3e   : > { %v391_v38 = vrot.slane %v263_v48, 1  ;;  %v568_v40 = vrot.slane %v263_v48, 2 }
  0x41   : > { %631 = vrot.lane.b32.xlu1 %v564_v12, %s1875_s25  ;;  %599 = vrot.lane.b32.xlu0 %v524_v55, %s1875_s25  ;;  %v392_v12 = vsel %vm327_vm0, %v389_v10, %v391_v38  ;;  %v352_v55 = vsel %vm327_vm0, %v349_v53, %v351_v22  ;;  %v569_v53 = vsel %vm504_vm1, %v566_v43, %v568_v40  ;;  %v393_v10 = vrot.slane %v2247_v51, 1 }
  0x42   : > { %v529_v22 = vsel %vm504_vm1, %v526_v47, %v528_v30  ;;  %v353_v38 = vrot.slane %v2250_v50, 1  ;;  %v570_v30 = vrot.slane %v2247_v51, 2 }
  0x43   : > { %v395_v48 = vsel %vm327_vm0, %v393_v10, %v3068_v5  ;;  %v3073_v10 = vrot.slane %v2015_v58, 1 }
  0x45   : > { %456 = vrot.lane.b32.xlu1 %v390_v36, %s1874_s24  ;;  %424 = vrot.lane.b32.xlu0 %v350_v29, %s1874_s24  ;;  %v567_v36 = vsel %vm504_vm1, %v565_v9, %v566_v43  ;;  %v527_v29 = vsel %vm504_vm1, %v525_v21, %v526_v47  ;;  %v3069_v9 = vrot.slane %v1997_v44, 1  ;;  %v530_v43 = vrot.slane %v2250_v50, 2 }
  0x46   : > { %v3071_v21 = vrot.slane %v1997_v44, 2 }
  0x47   : > { %v355_v40 = vsel %vm327_vm0, %v353_v38, %v3069_v9  ;;  %v3075_v9 = vrot.slane %v2015_v58, 2 }
  0x48   : > { %v532_v47 = vsel %vm504_vm1, %v530_v43, %v3071_v21  ;;  %v2318_v43 = vld [vmem:[%s1922_s23 + $0xa8] sm:$0xff]  ;;  %v3077_v21 = vrot.slane %v2069_v28, 1 }
  0x49   : > { %458 = vrot.lane.b32.xlu1 %v392_v12, %s1874_s24  ;;  %426 = vrot.lane.b32.xlu0 %v352_v55, %s1874_s24  ;;  %v3070_v12 = vrot.slane %v1993_v42, 2 }
  0x4b   : > { %v572_v55 = vsel %vm504_vm1, %v570_v30, %v3070_v12  ;;  %v2315_v30 = vld [vmem:[%s1922_s23 + $0x168] sm:$0xff]  ;;  %v3076_v12 = vrot.slane %v2066_v27, 1 }
  0x4d   : > { %633 = vrot.lane.b32.xlu1 %v567_v36, %s1875_s25  ;;  %601 = vrot.lane.b32.xlu0 %v527_v29, %s1875_s25  ;;  %v2281_v36 = vld [vmem:[%s1922_s23 + $0x150] sm:$0xff] }
  0x4e   : > { %v2284_v29 = vld [vmem:[%s1922_s23 + $0x90] sm:$0xff]  ;;  %v575_v5 = vrot.slane %v2281_v36, 2 }
  0x51   : > { %635 = vrot.lane.b32.xlu1 %v569_v53, %s1875_s25  ;;  %603 = vrot.lane.b32.xlu0 %v529_v22, %s1875_s25  ;;  %v3072_v53 = vrot.slane %v2012_v57, 1 }
  0x55   : > { %460 = vrot.lane.b32.xlu1 %v395_v48, %s1874_s24  ;;  %428 = vrot.lane.b32.xlu0 %v355_v40, %s1874_s24  ;;  %v535_v48 = vrot.slane %v2284_v29, 2 }
  0x57   : > { %v537_v40 = vsel %vm504_vm1, %v535_v48, %v3075_v9 }
  0x59   : > { %462 = vrot.lane.b32.xlu1 %v2024_v61, %s1874_s24  ;;  %430 = vrot.lane.b32.xlu0 %v2029_v62, %s1874_s24  ;;  %v398_v61 = vrot.slane %v2281_v36, 1  ;;  %v358_v62 = vrot.slane %v2284_v29, 1 }
  0x5b   : > { %v400_v22 = vsel %vm327_vm0, %v398_v61, %v3072_v53  ;;  %v360_v38 = vsel %vm327_vm0, %v358_v62, %v3073_v10  ;;  %v580_v61 = vrot.slane %v2315_v30, 2  ;;  %v540_v62 = vrot.slane %v2318_v43, 2  ;;  %v2349_v10 = vld [vmem:[%s1922_s23 + $0x180] sm:$0xff] }
  0x5c   : > { %v3079_v53 = vrot.slane %v2069_v28, 2 }
  0x5d   : > { %637 = vrot.lane.b32.xlu1 %v572_v55, %s1875_s25  ;;  %605 = vrot.lane.b32.xlu0 %v532_v47, %s1875_s25 }
  0x61   : > { %639 = vrot.lane.b32.xlu1 %v2052_v19, %s1875_s25  ;;  %607 = vrot.lane.b32.xlu0 %v2057_v20, %s1875_s25  ;;  %v3074_v19 = vrot.slane %v2012_v57, 2 }
  0x63   : > { %v577_v20 = vsel %vm504_vm1, %v575_v5, %v3074_v19  ;;  %v3080_v5 = vrot.slane %v2121_v63, 1  ;;  %v3081_v19 = vrot.slane %v2124_v1, 1 }
  0x65   : > { %464 = vrot.lane.b32.xlu1 %v400_v22, %s1874_s24  ;;  %432 = vrot.lane.b32.xlu0 %v360_v38, %s1874_s24  ;;  %v542_v22 = vsel %vm504_vm1, %v540_v62, %v3079_v53  ;;  %v2352_v38 = vld [vmem:[%s1922_s23 + $0xc0] sm:$0xff] }
  0x66   : > { %v545_v9 = vrot.slane %v2352_v38, 2 }
  0x69   : > { %466 = vrot.lane.b32.xlu1 %v2076_v31, %s1874_s24  ;;  %434 = vrot.lane.b32.xlu0 %v2081_v32, %s1874_s24  ;;  %v403_v31 = vrot.slane %v2315_v30, 1  ;;  %v363_v32 = vrot.slane %v2318_v43, 1 }
  0x6b   : > { %v405_v55 = vsel %vm327_vm0, %v403_v31, %v3076_v12  ;;  %v365_v47 = vsel %vm327_vm0, %v363_v32, %v3077_v21  ;;  %v3083_v12 = vrot.slane %v2121_v63, 2 }
  0x6d   : > { %641 = vrot.lane.b32.xlu1 %v577_v20, %s1875_s25  ;;  %609 = vrot.lane.b32.xlu0 %v537_v40, %s1875_s25 }
  0x71   : > { %643 = vrot.lane.b32.xlu1 %v2098_v45, %s1875_s25  ;;  %611 = vrot.lane.b32.xlu0 %v2103_v46, %s1875_s25  ;;  %v3078_v45 = vrot.slane %v2066_v27, 2 }
  0x73   : > { %v582_v46 = vsel %vm504_vm1, %v580_v61, %v3078_v45  ;;  %v2386_v61 = vld [vmem:[%s1922_s23 + $0x198] sm:$0xff] }
  0x74   : > { %v779_v62 = vrot.slane %v2386_v61, 1 }
  0x75   : > { %468 = vrot.lane.b32.xlu1 %v405_v55, %s1874_s24  ;;  %436 = vrot.lane.b32.xlu0 %v365_v47, %s1874_s24 }
  0x79   : > { %470 = vrot.lane.b32.xlu1 %v2113_v59, %s1874_s24  ;;  %438 = vrot.lane.b32.xlu0 %v2118_v60, %s1874_s24  ;;  %v750_v59 = vrot.slane %v2349_v10, 1  ;;  %v368_v60 = vrot.slane %v2352_v38, 1 }
  0x7b   : > { %v752_v48 = vsel %vm327_vm0, %v750_v59, %v3080_v5  ;;  %v370_v20 = vsel %vm327_vm0, %v368_v60, %v3081_v19 }
  0x7d   : > { %645 = vrot.lane.b32.xlu1 %v582_v46, %s1875_s25  ;;  %613 = vrot.lane.b32.xlu0 %v542_v22, %s1875_s25  ;;  %v3084_v46 = vrot.slane %v2148_v25, 1  ;;  %v790_v22 = vrot.slane %v2386_v61, 2 }
  0x7f   : > { %v781_v53 = vsel %vm327_vm0, %v779_v62, %v3084_v46  ;;  %v1099_v62 = vld [vmem:[%s3043_s1 + $0x10] sm:$0xff] }
  0x81   : > { %647 = vrot.lane.b32.xlu1 %v2140_v33, %s1875_s25  ;;  %615 = vrot.lane.b32.xlu0 %v2145_v34, %s1875_s25  ;;  %v3082_v33 = vrot.slane %v2124_v1, 2  ;;  %v761_v34 = vrot.slane %v2349_v10, 2 }
  0x83   : > { %v547_v40 = vsel %vm504_vm1, %v545_v9, %v3082_v33  ;;  %v763_v55 = vsel %vm504_vm1, %v761_v34, %v3083_v12  ;;  %v3086_v33 = vrot.slane %v2168_v37, 1 }
  0x85   : > { %755 = vrot.lane.b32.xlu1 %v752_v48, %s1874_s24  ;;  %440 = vrot.lane.b32.xlu0 %v370_v20, %s1874_s24  ;;  %v1097_v20 = vld [vmem:[%s3043_s1] sm:$0xff] }
  0x87   : > { %v2375_v31 = vpop.permute.xlu1 %414  ;;  %v413_v32 = vpop.permute.xlu0 %412 }
  0x89   : > { %617 = vrot.lane.b32.xlu1 %v547_v40, %s1875_s25  ;;  %442 = vrot.lane.b32.xlu0 %v2164_v54, %s1874_s24 }
  0x8b   : > { %v2383_v21 = vpop.permute.xlu1 %416  ;;  %v445_v47 = vpop.permute.xlu0 %444 }
  0x8d   : > { %766 = vrot.lane.b32.xlu1 %v763_v55, %s1875_s25  ;;  %757 = vrot.lane.b32.xlu0 %v2179_v24, %s1874_s24  ;;  %v2403_v24 = vld [vmem:[%s1922_s23] sm:$0xff] }
  0x8e   : > { %v505_v34 = vrot.slane %v2403_v24, 2 }
  0x8f   : > { %v2392_v45 = vpop.permute.xlu1 %448  ;;  %v447_v54 = vpop.permute.xlu0 %446 }
  0x91   : > { %768 = vrot.lane.b32.xlu1 %v2184_v23, %s1875_s25  ;;  %619 = vrot.lane.b32.xlu0 %v2195_v35, %s1875_s25  ;;  %v3085_v23 = vrot.slane %v2148_v25, 2  ;;  %v328_v35 = vrot.slane %v2403_v24, 1 }
  0x93   : > { %v622_v59 = vpop.permute.xlu1 %621  ;;  %v590_v60 = vpop.permute.xlu0 %589  ;;  %v792_v5 = vsel %vm504_vm1, %v790_v22, %v3085_v23  ;;  %v330_v40 = vsel %vm327_vm0, %v328_v35, %v3086_v33  ;;  %v684_v35 = vsel %vm681_vm2, %v1931_v2, %v413_v32  ;;  %v685_v2 = vsel %vm681_vm2, %v1925_v0, %v2375_v31 }
  0x94   : > { %v2455_v33 = vsel %vm714_vm3, %v684_v35, %v590_v60  ;;  %v686_v0 = vsel %vm681_vm2, %v1937_v6, %v2383_v21 }
  0x95   : > { %786 = vrot.lane.b32.xlu1 %v2200_v26, %s1874_s24  ;;  %784 = vrot.lane.b32.xlu0 %v781_v53, %s1874_s24  ;;  %v1098_v26 = vld [vmem:[%s3043_s1 + $0x8] sm:$0xff]  ;;  %v3087_v53 = vrot.slane %v2168_v37, 2 }
  0x96   : > { %v1839_v9 = vpack.c.bf16 %v1098_v26, %v1097_v20  ;;  %v700_v20 = vsel %vm681_vm2, %v1943_v8, %v445_v47  ;;  %v701_v8 = vsel %vm681_vm2, %v1948_v11, %v447_v54  ;;  %v702_v11 = vsel %vm681_vm2, %v1952_v13, %v2392_v45 }
  0x97   : > { %v2412_v48 = vpop.permute.xlu1 %450  ;;  %v2414_v19 = vpop.permute.xlu0 %418  ;;  %v507_v22 = vsel %vm504_vm1, %v505_v34, %v3087_v53 }
  0x98   : > { %1840 = vmatprep.subr.bf16.mxu0 %v1839_v9  ;;  %1847 = vmatprep.subr.bf16.mxu1 %v1839_v9  ;;  %v703_v6 = vsel %vm681_vm2, %v1955_v14, %v2412_v48  ;;  %v687_v13 = vsel %vm681_vm2, %v1940_v7, %v2414_v19 }
  0x99   : > { %797 = vrot.lane.b32.xlu1 %v2212_v41, %s1875_s25  ;;  %795 = vrot.lane.b32.xlu0 %v792_v5, %s1875_s25  ;;  %v1100_v41 = vld [vmem:[%s3043_s1 + $0x18] sm:$0xff] }
  0x9a   : > { %1842 = vmatpush3.bf16.msra.mxu0 %v1839_v9  ;;  %1850 = vmatpush3.bf16.msra.mxu1 %v1839_v9  ;;  %v1843_v46 = vpack.c.bf16 %v1100_v41, %v1099_v62 }
  0x9b   : > { %v594_v12 = vpop.permute.xlu1 %593  ;;  %v592_v55 = vpop.permute.xlu0 %591 }
  0x9c   : > { %1844 = vmatprep.subr.bf16.mxu0 %v1843_v46  ;;  %1848 = vmatprep.subr.bf16.mxu1 %v1843_v46  ;;  %v2470_v60 = vsel %vm714_vm3, %v685_v2, %v592_v55  ;;  %v2486_v34 = vsel %vm714_vm3, %v686_v0, %v594_v12 }
  0x9d   : > { %410 = vrot.lane.b32.xlu1 %v2221_v17, %s1874_s24  ;;  %408 = vrot.lane.b32.xlu0 %v330_v40, %s1874_s24  ;;  %v1101_v17 = vld [vmem:[%s3043_s1 + $0x20] sm:$0xf]  ;;  %s2889_s24 = scalar_lea.vmem %s3047_s5, %s1743_s21 }
  0x9e   : > { %1846 = vmatpush3.bf16.msra.mxu0 %v1843_v46  ;;  %1851 = vmatpush3.bf16.msra.mxu1 %v1843_v46 }
  0x9f   : > { %v626_v23 = vpop.permute.xlu1 %625  ;;  %v624_v5 = vpop.permute.xlu0 %623  ;;  %1789 = vmatprep.subr.msk.mxu0 %vm1206_vm4, %v1101_v17  ;;  %1849 = vmatprep.subr.msk.mxu1 %vm1206_vm4, %v1101_v17 }
  0xa0   : > { %v2483_v40 = vsel %vm714_vm3, %v702_v11, %v626_v23 }
  0xa1   : > { %587 = vrot.lane.b32.xlu1 %v2228_v18, %s1875_s25  ;;  %585 = vrot.lane.b32.xlu0 %v507_v22, %s1875_s25  ;;  %v2452_v18 = vsel %vm714_vm3, %v700_v20, %v622_v59  ;;  %v2467_v59 = vsel %vm714_vm3, %v701_v8, %v624_v5 }
  0xa2   : > { %1790 = vmatpush3.msk.msra.mxu0 %vm1206_vm4, %v1101_v17  ;;  %1852 = vmatpush3.msk.msra.mxu1 %vm1206_vm4, %v1101_v17 }
  0xa3   : > { %v628_v26 = vpop.permute.xlu1 %627  ;;  %v596_v9 = vpop.permute.xlu0 %595 }
  0xa4   : > { %v2499_v12 = vsel %vm714_vm3, %v703_v6, %v628_v26  ;;  %v2502_v55 = vsel %vm714_vm3, %v687_v13, %v596_v9 }
  0xa5   : > { %869 = vrot.lane.b32.xlu1 %v2452_v18, %s1876_s11  ;;  %837 = vrot.lane.b32.xlu0 %v2455_v33, %s1876_s11 }
  0xa7   : > { %v453_v32 = vpop.permute.xlu1 %452  ;;  %v421_v47 = vpop.permute.xlu0 %420 }
  0xa8   : > { %v704_v19 = vsel %vm681_vm2, %v2009_v56, %v453_v32  ;;  %v688_v41 = vsel %vm681_vm2, %v2037_v4, %v421_v47 }
  0xa9   : > { %871 = vrot.lane.b32.xlu1 %v2467_v59, %s1876_s11  ;;  %839 = vrot.lane.b32.xlu0 %v2470_v60, %s1876_s11 }
  0xab   : > { %v455_v31 = vpop.permute.xlu1 %454  ;;  %v423_v54 = vpop.permute.xlu0 %422 }
  0xac   : > { %v705_v56 = vsel %vm681_vm2, %v2034_v3, %v455_v31  ;;  %v689_v4 = vsel %vm681_vm2, %v2042_v15, %v423_v54 }
  0xad   : > { %967 = vrot.lane.b32.xlu1 %v2483_v40, %s1877_s12  ;;  %935 = vrot.lane.b32.xlu0 %v2486_v34, %s1877_s12 }
  0xaf   : > { %v630_v21 = vpop.permute.xlu1 %629  ;;  %v598_v45 = vpop.permute.xlu0 %597 }
  0xb0   : > { %v2521_v22 = vsel %vm714_vm3, %v704_v19, %v630_v21  ;;  %v2524_v23 = vsel %vm714_vm3, %v688_v41, %v598_v45 }
  0xb1   : > { %969 = vrot.lane.b32.xlu1 %v2499_v12, %s1877_s12  ;;  %937 = vrot.lane.b32.xlu0 %v2502_v55, %s1877_s12 }
  0xb3   : > { %v632_v62 = vpop.permute.xlu1 %631  ;;  %v600_v14 = vpop.permute.xlu0 %599 }
  0xb4   : > { %v2535_v35 = vsel %vm714_vm3, %v705_v56, %v632_v62  ;;  %v2538_v20 = vsel %vm714_vm3, %v689_v4, %v600_v14 }
  0xb5   : > { %873 = vrot.lane.b32.xlu1 %v2483_v40, %s1876_s11  ;;  %841 = vrot.lane.b32.xlu0 %v2486_v34, %s1876_s11 }
  0xb7   : > { %v457_v7 = vpop.permute.xlu1 %456  ;;  %v425_v48 = vpop.permute.xlu0 %424 }
  0xb8   : > { %v706_v2 = vsel %vm681_vm2, %v2155_v52, %v457_v7  ;;  %v690_v8 = vsel %vm681_vm2, %v2187_v39, %v425_v48 }
  0xb9   : > { %875 = vrot.lane.b32.xlu1 %v2499_v12, %s1876_s11  ;;  %843 = vrot.lane.b32.xlu0 %v2502_v55, %s1876_s11 }
  0xbb   : > { %v459_v46 = vpop.permute.xlu1 %458  ;;  %v427_v53 = vpop.permute.xlu0 %426 }
  0xbc   : > { %v707_v52 = vsel %vm681_vm2, %v2174_v16, %v459_v46  ;;  %v691_v39 = vsel %vm681_vm2, %v2190_v49, %v427_v53 }
  0xbd   : > { %971 = vrot.lane.b32.xlu1 %v2521_v22, %s1877_s12  ;;  %939 = vrot.lane.b32.xlu0 %v2524_v23, %s1877_s12 }
  0xbf   : > { %v634_v5 = vpop.permute.xlu1 %633  ;;  %v602_v17 = vpop.permute.xlu0 %601 }
  0xc0   : > { %v2557_v0 = vsel %vm714_vm3, %v706_v2, %v634_v5  ;;  %v2560_v11 = vsel %vm714_vm3, %v690_v8, %v602_v17 }
  0xc1   : > { %973 = vrot.lane.b32.xlu1 %v2535_v35, %s1877_s12  ;;  %941 = vrot.lane.b32.xlu0 %v2538_v20, %s1877_s12 }
  0xc3   : > { %v636_v26 = vpop.permute.xlu1 %635  ;;  %v604_v9 = vpop.permute.xlu0 %603 }
  0xc4   : > { %v2571_v6 = vsel %vm714_vm3, %v707_v52, %v636_v26  ;;  %v2574_v13 = vsel %vm714_vm3, %v691_v39, %v604_v9 }
  0xc5   : > { %877 = vrot.lane.b32.xlu1 %v2521_v22, %s1876_s11  ;;  %845 = vrot.lane.b32.xlu0 %v2524_v23, %s1876_s11 }
  0xc7   : > { %v461_v3 = vpop.permute.xlu1 %460  ;;  %v429_v15 = vpop.permute.xlu0 %428 }
  0xc8   : > { %v708_v62 = vsel %vm681_vm2, %v2247_v51, %v461_v3  ;;  %v692_v14 = vsel %vm681_vm2, %v2250_v50, %v429_v15 }
  0xc9   : > { %879 = vrot.lane.b32.xlu1 %v2535_v35, %s1876_s11  ;;  %847 = vrot.lane.b32.xlu0 %v2538_v20, %s1876_s11 }
  0xcb   : > { %v463_v32 = vpop.permute.xlu1 %462  ;;  %v431_v47 = vpop.permute.xlu0 %430 }
  0xcc   : > { %v709_v51 = vsel %vm681_vm2, %v1993_v42, %v463_v32  ;;  %v693_v50 = vsel %vm681_vm2, %v1997_v44, %v431_v47 }
  0xcd   : > { %975 = vrot.lane.b32.xlu1 %v2557_v0, %s1877_s12  ;;  %943 = vrot.lane.b32.xlu0 %v2560_v11, %s1877_s12 }
  0xcf   : > { %v638_v31 = vpop.permute.xlu1 %637  ;;  %v606_v54 = vpop.permute.xlu0 %605 }
  0xd0   : > { %v2593_v19 = vsel %vm714_vm3, %v708_v62, %v638_v31  ;;  %v2596_v41 = vsel %vm714_vm3, %v692_v14, %v606_v54 }
  0xd1   : > { %977 = vrot.lane.b32.xlu1 %v2571_v6, %s1877_s12  ;;  %945 = vrot.lane.b32.xlu0 %v2574_v13, %s1877_s12 }
  0xd3   : > { %v640_v21 = vpop.permute.xlu1 %639  ;;  %v608_v45 = vpop.permute.xlu0 %607 }
  0xd4   : > { %v2607_v56 = vsel %vm714_vm3, %v709_v51, %v640_v21  ;;  %v2610_v4 = vsel %vm714_vm3, %v693_v50, %v608_v45 }
  0xd5   : > { %881 = vrot.lane.b32.xlu1 %v2557_v0, %s1876_s11  ;;  %849 = vrot.lane.b32.xlu0 %v2560_v11, %s1876_s11 }
  0xd7   : > { %v465_v16 = vpop.permute.xlu1 %464  ;;  %v433_v49 = vpop.permute.xlu0 %432 }
  0xd8   : > { %v710_v26 = vsel %vm681_vm2, %v2281_v36, %v465_v16  ;;  %v694_v9 = vsel %vm681_vm2, %v2284_v29, %v433_v49 }
  0xd9   : > { %883 = vrot.lane.b32.xlu1 %v2571_v6, %s1876_s11  ;;  %851 = vrot.lane.b32.xlu0 %v2574_v13, %s1876_s11 }
  0xdb   : > { %v467_v7 = vpop.permute.xlu1 %466  ;;  %v435_v48 = vpop.permute.xlu0 %434 }
  0xdc   : > { %v711_v36 = vsel %vm681_vm2, %v2012_v57, %v467_v7  ;;  %v695_v29 = vsel %vm681_vm2, %v2015_v58, %v435_v48 }
  0xdd   : > { %979 = vrot.lane.b32.xlu1 %v2593_v19, %s1877_s12  ;;  %947 = vrot.lane.b32.xlu0 %v2596_v41, %s1877_s12 }
  0xdf   : > { %v642_v46 = vpop.permute.xlu1 %641  ;;  %v610_v53 = vpop.permute.xlu0 %609 }
  0xe0   : > { %v2629_v2 = vsel %vm714_vm3, %v710_v26, %v642_v46  ;;  %v2632_v8 = vsel %vm714_vm3, %v694_v9, %v610_v53 }
  0xe1   : > { %981 = vrot.lane.b32.xlu1 %v2607_v56, %s1877_s12  ;;  %949 = vrot.lane.b32.xlu0 %v2610_v4, %s1877_s12 }
  0xe3   : > { %v644_v5 = vpop.permute.xlu1 %643  ;;  %v612_v17 = vpop.permute.xlu0 %611 }
  0xe4   : > { %v2643_v52 = vsel %vm714_vm3, %v711_v36, %v644_v5  ;;  %v2646_v39 = vsel %vm714_vm3, %v695_v29, %v612_v17 }
  0xe5   : > { %885 = vrot.lane.b32.xlu1 %v2593_v19, %s1876_s11  ;;  %853 = vrot.lane.b32.xlu0 %v2596_v41, %s1876_s11 }
  0xe7   : > { %v469_v42 = vpop.permute.xlu1 %468  ;;  %v437_v44 = vpop.permute.xlu0 %436 }
  0xe8   : > { %v712_v21 = vsel %vm681_vm2, %v2315_v30, %v469_v42  ;;  %v696_v45 = vsel %vm681_vm2, %v2318_v43, %v437_v44 }
  0xe9   : > { %887 = vrot.lane.b32.xlu1 %v2607_v56, %s1876_s11  ;;  %855 = vrot.lane.b32.xlu0 %v2610_v4, %s1876_s11 }
  0xeb   : > { %v471_v3 = vpop.permute.xlu1 %470  ;;  %v439_v15 = vpop.permute.xlu0 %438 }
  0xec   : > { %v713_v30 = vsel %vm681_vm2, %v2066_v27, %v471_v3  ;;  %v697_v43 = vsel %vm681_vm2, %v2069_v28, %v439_v15 }
  0xed   : > { %983 = vrot.lane.b32.xlu1 %v2629_v2, %s1877_s12  ;;  %951 = vrot.lane.b32.xlu0 %v2632_v8, %s1877_s12 }
  0xef   : > { %v646_v32 = vpop.permute.xlu1 %645  ;;  %v614_v47 = vpop.permute.xlu0 %613 }
  0xf0   : > { %v2665_v62 = vsel %vm714_vm3, %v712_v21, %v646_v32  ;;  %v2668_v14 = vsel %vm714_vm3, %v696_v45, %v614_v47 }
  0xf1   : > { %985 = vrot.lane.b32.xlu1 %v2643_v52, %s1877_s12  ;;  %953 = vrot.lane.b32.xlu0 %v2646_v39, %s1877_s12 }
  0xf3   : > { %v648_v31 = vpop.permute.xlu1 %647  ;;  %v616_v54 = vpop.permute.xlu0 %615 }
  0xf4   : > { %v2679_v51 = vsel %vm714_vm3, %v713_v30, %v648_v31  ;;  %v2682_v50 = vsel %vm714_vm3, %v697_v43, %v616_v54 }
  0xf5   : > { %889 = vrot.lane.b32.xlu1 %v2629_v2, %s1876_s11  ;;  %857 = vrot.lane.b32.xlu0 %v2632_v8, %s1876_s11 }
  0xf7   : > { %v756_v57 = vpop.permute.xlu1 %755  ;;  %v441_v58 = vpop.permute.xlu0 %440 }
  0xf8   : > { %v772_v5 = vsel %vm681_vm2, %v2349_v10, %v756_v57  ;;  %v698_v17 = vsel %vm681_vm2, %v2352_v38, %v441_v58 }
  0xf9   : > { %891 = vrot.lane.b32.xlu1 %v2643_v52, %s1876_s11  ;;  %859 = vrot.lane.b32.xlu0 %v2646_v39, %s1876_s11 }
  0xfb   : > { %v618_v16 = vpop.permute.xlu1 %617  ;;  %v443_v49 = vpop.permute.xlu0 %442 }
  0xfc   : > { %v731_v26 = vsel %vm714_vm3, %v698_v17, %v618_v16  ;;  %v699_v3 = vsel %vm681_vm2, %v2124_v1, %v443_v49 }
  0xfd   : > { %987 = vrot.lane.b32.xlu1 %v2665_v62, %s1877_s12  ;;  %955 = vrot.lane.b32.xlu0 %v2668_v14, %s1877_s12 }
  0xff   : > { %v767_v7 = vpop.permute.xlu1 %766  ;;  %v758_v48 = vpop.permute.xlu0 %757 }
 0x100   : > { %v774_v9 = vsel %vm714_vm3, %v772_v5, %v767_v7  ;;  %v773_v15 = vsel %vm681_vm2, %v2121_v63, %v758_v48 }
 0x101   : > { %989 = vrot.lane.b32.xlu1 %v2679_v51, %s1877_s12  ;;  %957 = vrot.lane.b32.xlu0 %v2682_v50, %s1877_s12 }
 0x103   : > { %v769_v46 = vpop.permute.xlu1 %768  ;;  %v620_v53 = vpop.permute.xlu0 %619 }
 0x104   : > { %v775_v38 = vsel %vm714_vm3, %v773_v15, %v769_v46  ;;  %v732_v29 = vsel %vm714_vm3, %v699_v3, %v620_v53 }
 0x105   : > { %893 = vrot.lane.b32.xlu1 %v2665_v62, %s1876_s11  ;;  %861 = vrot.lane.b32.xlu0 %v2668_v14, %s1876_s11 }
 0x107   : > { %v787_v27 = vpop.permute.xlu1 %786  ;;  %v785_v28 = vpop.permute.xlu0 %784 }
 0x108   : > { %v801_v63 = vsel %vm681_vm2, %v2386_v61, %v785_v28  ;;  %v802_v61 = vsel %vm681_vm2, %v2148_v25, %v787_v27 }
 0x109   : > { %895 = vrot.lane.b32.xlu1 %v2679_v51, %s1876_s11  ;;  %863 = vrot.lane.b32.xlu0 %v2682_v50, %s1876_s11 }
 0x10b   : > { %v798_v42 = vpop.permute.xlu1 %797  ;;  %v796_v44 = vpop.permute.xlu0 %795 }
 0x10c   : > { %v803_v58 = vsel %vm714_vm3, %v801_v63, %v796_v44 }
 0x10d   : > { %991 = vrot.lane.b32.xlu1 %v774_v9, %s1877_s12  ;;  %959 = vrot.lane.b32.xlu0 %v731_v26, %s1877_s12 }
 0x10f   : > { %v411_v10 = vpop.permute.xlu1 %410  ;;  %v409_v36 = vpop.permute.xlu0 %408 }
 0x110   : > { %v682_v21 = vsel %vm681_vm2, %v2403_v24, %v409_v36  ;;  %v804_v24 = vsel %vm714_vm3, %v802_v61, %v798_v42  ;;  %v683_v46 = vsel %vm681_vm2, %v2168_v37, %v411_v10 }
 0x111   : > { %993 = vrot.lane.b32.xlu1 %v775_v38, %s1877_s12  ;;  %961 = vrot.lane.b32.xlu0 %v732_v29, %s1877_s12 }
 0x113   : > { %v588_v32 = vpop.permute.xlu1 %587  ;;  %v586_v47 = vpop.permute.xlu0 %585 }
 0x114   : > { %v715_v45 = vsel %vm714_vm3, %v682_v21, %v586_v47  ;;  %v716_v25 = vsel %vm714_vm3, %v683_v46, %v588_v32 }
 0x115   : > { %897 = vrot.lane.b32.xlu1 %v774_v9, %s1876_s11  ;;  %865 = vrot.lane.b32.xlu0 %v731_v26, %s1876_s11 }
 0x117   : > { %v870_v1 = vpop.permute.xlu1 %869  ;;  %v838_v31 = vpop.permute.xlu0 %837 }
 0x118   : > { %v1048_v16 = vsel %vm1031_vm5, %v731_v26, %v870_v1  ;;  %v1032_v49 = vsel %vm1031_vm5, %v715_v45, %v838_v31 }
 0x119   : > { %899 = vrot.lane.b32.xlu1 %v775_v38, %s1876_s11  ;;  %867 = vrot.lane.b32.xlu0 %v732_v29, %s1876_s11 }
 0x11b   : > { %v872_v54 = vpop.permute.xlu1 %871  ;;  %v840_v57 = vpop.permute.xlu0 %839 }
 0x11c   : > { %v1049_v53 = vsel %vm1031_vm5, %v732_v29, %v872_v54  ;;  %v1033_v27 = vsel %vm1031_vm5, %v716_v25, %v840_v57 }
 0x11d   : > { %995 = vrot.lane.b32.xlu1 %v803_v58, %s1877_s12  ;;  %963 = vrot.lane.b32.xlu0 %v2452_v18, %s1877_s12 }
 0x11f   : > { %v968_v30 = vpop.permute.xlu1 %967  ;;  %v936_v43 = vpop.permute.xlu0 %935 }
 0x120   : > { %v1081_v7 = vsel %vm1064_vm6, %v1048_v16, %v968_v30  ;;  %v1065_v48 = vsel %vm1064_vm6, %v1032_v49, %v936_v43 }
 0x121   : > { %997 = vrot.lane.b32.xlu1 %v804_v24, %s1877_s12  ;;  %1815 = vmatprep.mubr.msk.f32.mxu1 %vm1109_vm7, %v1081_v7 }
 0x122   : > { %965 = vrot.lane.b32.xlu0 %v2467_v59, %s1877_s12  ;;  %1791 = vmatprep.mubr.msk.f32.mxu0 %vm1109_vm7, %v1065_v48 }
 0x123   : > { %v970_v28 = vpop.permute.xlu1 %969  ;;  %v938_v5 = vpop.permute.xlu0 %937 }
 0x124   : > { %v1082_v17 = vsel %vm1064_vm6, %v1049_v53, %v970_v28  ;;  %v1066_v37 = vsel %vm1064_vm6, %v1033_v27, %v938_v5 }
 0x125   : > { %1792 = vmatmul.mubr.msk.f32.vlgmr.msra.gmra.mrb[0].mxu0 %vm1109_vm7, %v1066_v37  ;;  %1816 = vmatmul.mubr.msk.f32.vlgmr.msra.gmra.mrb[0].mxu1 %vm1109_vm7, %v1082_v17 }
 0x127   : > { %v874_v42 = vpop.permute.xlu1 %873  ;;  %v842_v44 = vpop.permute.xlu0 %841 }
 0x128   : > { %v1050_v3 = vsel %vm1031_vm5, %v2452_v18, %v874_v42  ;;  %v1034_v15 = vsel %vm1031_vm5, %v2455_v33, %v842_v44 }
 0x12b   : > { %v876_v26 = vpop.permute.xlu1 %875  ;;  %v844_v9 = vpop.permute.xlu0 %843 }
 0x12c   : > { %v1051_v32 = vsel %vm1031_vm5, %v2467_v59, %v876_v26  ;;  %v1035_v47 = vsel %vm1031_vm5, %v2470_v60, %v844_v9 }
 0x12f   : > { %v972_v10 = vpop.permute.xlu1 %971  ;;  %v940_v36 = vpop.permute.xlu0 %939 }
 0x130   : > { %v1083_v38 = vsel %vm1064_vm6, %v1050_v3, %v972_v10  ;;  %v1067_v29 = vsel %vm1064_vm6, %v1034_v15, %v940_v36 }
 0x131   : > { %1794 = vmatprep.mubr.msk.f32.mxu0 %vm1109_vm7, %v1067_v29  ;;  %1818 = vmatprep.mubr.msk.f32.mxu1 %vm1109_vm7, %v1083_v38 }
 0x133   : > { %v974_v18 = vpop.permute.xlu1 %973  ;;  %v942_v1 = vpop.permute.xlu0 %941 }
 0x134   : > { %v1084_v33 = vsel %vm1064_vm6, %v1051_v32, %v974_v18  ;;  %v1068_v31 = vsel %vm1064_vm6, %v1035_v47, %v942_v1 }
 0x135   : > { %1795 = vmatmul.mubr.msk.f32.gmra.mrb[2].mxu0 %vm1109_vm7, %v1068_v31  ;;  %1819 = vmatmul.mubr.msk.f32.gmra.mrb[2].mxu1 %vm1109_vm7, %v1084_v33 }
 0x137   : > { %v878_v63 = vpop.permute.xlu1 %877  ;;  %v846_v54 = vpop.permute.xlu0 %845 }
 0x138   : > { %v1052_v59 = vsel %vm1031_vm5, %v2483_v40, %v878_v63  ;;  %v1036_v60 = vsel %vm1031_vm5, %v2486_v34, %v846_v54 }
 0x13b   : > { %v880_v57 = vpop.permute.xlu1 %879  ;;  %v848_v58 = vpop.permute.xlu0 %847 }
 0x13c   : > { %v1053_v49 = vsel %vm1031_vm5, %v2499_v12, %v880_v57  ;;  %v1037_v30 = vsel %vm1031_vm5, %v2502_v55, %v848_v58 }
 0x13f   : > { %v976_v21 = vpop.permute.xlu1 %975  ;;  %v944_v45 = vpop.permute.xlu0 %943 }
 0x140   : > { %v1085_v61 = vsel %vm1064_vm6, %v1052_v59, %v976_v21  ;;  %v1069_v16 = vsel %vm1064_vm6, %v1036_v60, %v944_v45 }
 0x141   : > { %1797 = vmatprep.mubr.msk.f32.mxu0 %vm1109_vm7, %v1069_v16  ;;  %1821 = vmatprep.mubr.msk.f32.mxu1 %vm1109_vm7, %v1085_v61 }
 0x143   : > { %v978_v40 = vpop.permute.xlu1 %977  ;;  %v946_v43 = vpop.permute.xlu0 %945 }
 0x144   : > { %v1086_v34 = vsel %vm1064_vm6, %v1053_v49, %v978_v40  ;;  %v1070_v24 = vsel %vm1064_vm6, %v1037_v30, %v946_v43 }
 0x145   : > { %1798 = vmatmul.mubr.msk.f32.gmra.mrb[4].mxu0 %vm1109_vm7, %v1070_v24  ;;  %1822 = vmatmul.mubr.msk.f32.gmra.mrb[4].mxu1 %vm1109_vm7, %v1086_v34 }
 0x147   : > { %v882_v7 = vpop.permute.xlu1 %881  ;;  %v850_v48 = vpop.permute.xlu0 %849 }
 0x148   : > { %v1054_v12 = vsel %vm1031_vm5, %v2521_v22, %v882_v7  ;;  %v1038_v55 = vsel %vm1031_vm5, %v2524_v23, %v850_v48 }
 0x14b   : > { %v884_v46 = vpop.permute.xlu1 %883  ;;  %v852_v25 = vpop.permute.xlu0 %851 }
 0x14c   : > { %v1055_v17 = vsel %vm1031_vm5, %v2535_v35, %v884_v46  ;;  %v1039_v37 = vsel %vm1031_vm5, %v2538_v20, %v852_v25 }
 0x14f   : > { %v980_v53 = vpop.permute.xlu1 %979  ;;  %v948_v27 = vpop.permute.xlu0 %947 }
 0x150   : > { %v1087_v28 = vsel %vm1064_vm6, %v1054_v12, %v980_v53  ;;  %v1071_v5 = vsel %vm1064_vm6, %v1038_v55, %v948_v27 }
 0x151   : > { %1800 = vmatprep.mubr.msk.f32.mxu0 %vm1109_vm7, %v1071_v5  ;;  %1824 = vmatprep.mubr.msk.f32.mxu1 %vm1109_vm7, %v1087_v28 }
 0x153   : > { %v982_v22 = vpop.permute.xlu1 %981  ;;  %v950_v42 = vpop.permute.xlu0 %949 }
 0x154   : > { %v1088_v23 = vsel %vm1064_vm6, %v1055_v17, %v982_v22  ;;  %v1072_v44 = vsel %vm1064_vm6, %v1039_v37, %v950_v42 }
 0x155   : > { %1801 = vmatmul.mubr.msk.f32.gmra.mrb[6].mxu0 %vm1109_vm7, %v1072_v44  ;;  %1825 = vmatmul.mubr.msk.f32.gmra.mrb[6].mxu1 %vm1109_vm7, %v1088_v23 }
 0x157   : > { %v886_v26 = vpop.permute.xlu1 %885  ;;  %v854_v9 = vpop.permute.xlu0 %853 }
 0x158   : > { %v1056_v35 = vsel %vm1031_vm5, %v2557_v0, %v886_v26  ;;  %v1040_v20 = vsel %vm1031_vm5, %v2560_v11, %v854_v9 }
 0x15b   : > { %v888_v3 = vpop.permute.xlu1 %887  ;;  %v856_v15 = vpop.permute.xlu0 %855 }
 0x15c   : > { %v1057_v32 = vsel %vm1031_vm5, %v2571_v6, %v888_v3  ;;  %v1041_v47 = vsel %vm1031_vm5, %v2574_v13, %v856_v15  ;;  %v2861_v3 = vld [vmem:[%s3044_s2] ss:$0 sm:$0xff] }
 0x15f   : > { %v984_v10 = vpop.permute.xlu1 %983  ;;  %v952_v36 = vpop.permute.xlu0 %951 }
 0x160   : > { %v1089_v38 = vsel %vm1064_vm6, %v1056_v35, %v984_v10  ;;  %v1073_v29 = vsel %vm1064_vm6, %v1040_v20, %v952_v36 }
 0x161   : > { %1803 = vmatprep.mubr.msk.f32.mxu0 %vm1109_vm7, %v1073_v29  ;;  %1827 = vmatprep.mubr.msk.f32.mxu1 %vm1109_vm7, %v1089_v38  ;;  %v2873_v38 = vld [vmem:[%s3046_s4] ss:$0 sm:$0xff] }
 0x163   : > { %v986_v0 = vpop.permute.xlu1 %985  ;;  %v954_v18 = vpop.permute.xlu0 %953 }
 0x164   : > { %v1090_v11 = vsel %vm1064_vm6, %v1057_v32, %v986_v0  ;;  %v1074_v1 = vsel %vm1064_vm6, %v1041_v47, %v954_v18 }
 0x165   : > { %1804 = vmatmul.mubr.msk.f32.gmra.mrb[8].mxu0 %vm1109_vm7, %v1074_v1  ;;  %1828 = vmatmul.mubr.msk.f32.gmra.mrb[8].mxu1 %vm1109_vm7, %v1090_v11 }
 0x167   : > { %v890_v33 = vpop.permute.xlu1 %889  ;;  %v858_v31 = vpop.permute.xlu0 %857 }
 0x168   : > { %v1058_v6 = vsel %vm1031_vm5, %v2593_v19, %v890_v33  ;;  %v1042_v13 = vsel %vm1031_vm5, %v2596_v41, %v858_v31 }
 0x16b   : > { %v892_v63 = vpop.permute.xlu1 %891  ;;  %v860_v54 = vpop.permute.xlu0 %859 }
 0x16c   : > { %v1059_v21 = vsel %vm1031_vm5, %v2607_v56, %v892_v63  ;;  %v1043_v45 = vsel %vm1031_vm5, %v2610_v4, %v860_v54 }
 0x16f   : > { %v988_v57 = vpop.permute.xlu1 %987  ;;  %v956_v58 = vpop.permute.xlu0 %955 }
 0x170   : > { %v1091_v59 = vsel %vm1064_vm6, %v1058_v6, %v988_v57  ;;  %v1075_v60 = vsel %vm1064_vm6, %v1042_v13, %v956_v58 }
 0x171   : > { %1806 = vmatprep.mubr.msk.f32.mxu0 %vm1109_vm7, %v1075_v60  ;;  %1830 = vmatprep.mubr.msk.f32.mxu1 %vm1109_vm7, %v1091_v59 }
 0x173   : > { %v990_v19 = vpop.permute.xlu1 %989  ;;  %v958_v61 = vpop.permute.xlu0 %957 }
 0x174   : > { %v1092_v41 = vsel %vm1064_vm6, %v1059_v21, %v990_v19  ;;  %v1076_v16 = vsel %vm1064_vm6, %v1043_v45, %v958_v61 }
 0x175   : > { %1807 = vmatmul.mubr.msk.f32.gmra.mrb[10].mxu0 %vm1109_vm7, %v1076_v16  ;;  %1831 = vmatmul.mubr.msk.f32.gmra.mrb[10].mxu1 %vm1109_vm7, %v1092_v41 }
 0x177   : > { %v894_v49 = vpop.permute.xlu1 %893  ;;  %v862_v30 = vpop.permute.xlu0 %861 }
 0x178   : > { %v1060_v56 = vsel %vm1031_vm5, %v2629_v2, %v894_v49  ;;  %v1044_v4 = vsel %vm1031_vm5, %v2632_v8, %v862_v30 }
 0x17b   : > { %v896_v40 = vpop.permute.xlu1 %895  ;;  %v864_v43 = vpop.permute.xlu0 %863 }
 0x17c   : > { %v1061_v46 = vsel %vm1031_vm5, %v2643_v52, %v896_v40  ;;  %v1045_v25 = vsel %vm1031_vm5, %v2646_v39, %v864_v43 }
 0x17f   : > { %v992_v34 = vpop.permute.xlu1 %991  ;;  %v960_v24 = vpop.permute.xlu0 %959 }
 0x180   : > { %v1093_v7 = vsel %vm1064_vm6, %v1060_v56, %v992_v34  ;;  %v1077_v48 = vsel %vm1064_vm6, %v1044_v4, %v960_v24 }
 0x181   : > { %1809 = vmatprep.mubr.msk.f32.mxu0 %vm1109_vm7, %v1077_v48  ;;  %1833 = vmatprep.mubr.msk.f32.mxu1 %vm1109_vm7, %v1093_v7 }
 0x183   : > { %v994_v2 = vpop.permute.xlu1 %993  ;;  %v962_v12 = vpop.permute.xlu0 %961 }
 0x184   : > { %v1094_v8 = vsel %vm1064_vm6, %v1061_v46, %v994_v2  ;;  %v1078_v55 = vsel %vm1064_vm6, %v1045_v25, %v962_v12 }
 0x185   : > { %1810 = vmatmul.mubr.msk.f32.gmra.mrb[12].mxu0 %vm1109_vm7, %v1078_v55  ;;  %1834 = vmatmul.mubr.msk.f32.gmra.mrb[12].mxu1 %vm1109_vm7, %v1094_v8 }
 0x187   : > { %v898_v53 = vpop.permute.xlu1 %897  ;;  %v866_v27 = vpop.permute.xlu0 %865 }
 0x188   : > { %v1062_v52 = vsel %vm1031_vm5, %v2665_v62, %v898_v53  ;;  %v1046_v39 = vsel %vm1031_vm5, %v2668_v14, %v866_v27 }
 0x18b   : > { %v900_v28 = vpop.permute.xlu1 %899  ;;  %v868_v5 = vpop.permute.xlu0 %867 }
 0x18c   : > { %v1063_v23 = vsel %vm1031_vm5, %v2679_v51, %v900_v28  ;;  %v1047_v62 = vsel %vm1031_vm5, %v2682_v50, %v868_v5  ;;  %v2866_v50 = vld [vmem:[%s3045_s3] ss:$0 sm:$0xff] }
 0x18f   : > { %v996_v17 = vpop.permute.xlu1 %995  ;;  %v964_v37 = vpop.permute.xlu0 %963 }
 0x190   : > { %v1095_v22 = vsel %vm1064_vm6, %v1062_v52, %v996_v17  ;;  %v1079_v42 = vsel %vm1064_vm6, %v1046_v39, %v964_v37 }
 0x191   : > { %1812 = vmatprep.mubr.msk.f32.mxu0 %vm1109_vm7, %v1079_v42  ;;  %1836 = vmatprep.mubr.msk.f32.mxu1 %vm1109_vm7, %v1095_v22 }
 0x193   : > { %v998_v44 = vpop.permute.xlu1 %997 }
 0x194   : > { %v1096_v26 = vsel %vm1064_vm6, %v1063_v23, %v998_v44  ;;  %v966_v14 = vpop.permute.xlu0 %965 }
 0x195   : > { %v1080_v9 = vsel %vm1064_vm6, %v1047_v62, %v966_v14  ;;  %1837 = vmatmul.mubr.msk.f32.gmra.mrb[14].mxu1 %vm1109_vm7, %v1096_v26 }
 0x196   : > { %1813 = vmatmul.mubr.msk.f32.gmra.mrb[14].mxu0 %vm1109_vm7, %v1080_v9 }
 0x1f8   : > { %v1793_v51 = vpop.f32.mrb[0].mxu0  ;;  %v1817_v15 = vpop.f32.mrb[0].mxu1 }
 0x1f9   : > { %v1282_v35 = vadd.f32 %v1793_v51, %v2861_v3  ;;  %v1362_v20 = vadd.f32 %v1817_v15, %v2861_v3  ;;  %v1276_v10 = vpop.f32.mrb[1].mxu0  ;;  %v1356_v36 = vpop.f32.mrb[1].mxu1 }
 0x1fa   : > { %v1277_v29 = vadd.f32 %v2861_v3, %v1276_v10  ;;  %v1357_v32 = vadd.f32 %v2861_v3, %v1356_v36 }
 0x1fb   : > { %v1443_v47 = vmul.f32 %v2866_v50, %v1282_v35  ;;  %v1459_v0 = vmul.f32 %v2866_v50, %v1362_v20 }
 0x1fc   : > { %v1442_v18 = vmul.f32 %v2866_v50, %v1277_v29  ;;  %v1458_v11 = vmul.f32 %v2866_v50, %v1357_v32 }
 0x1fd   : > { %v1482_v1 = vadd.f32 %v2873_v38, %v1443_v47  ;;  %v1498_v33 = vadd.f32 %v2873_v38, %v1459_v0 }
 0x1fe   : > { %v1481_v31 = vadd.f32 %v2873_v38, %v1442_v18  ;;  %v1497_v63 = vadd.f32 %v2873_v38, %v1458_v11 }
 0x1ff   : > { %vm1514_vm9 = vcmp.ge.f32.partialorder %v1482_v1, 0.0  ;;  %v1546_v54 = vmul.f32 0.2, %v1482_v1  ;;  %vm1530_vm10 = vcmp.ge.f32.partialorder %v1498_v33, 0.0  ;;  %v1562_v6 = vmul.f32 0.2, %v1498_v33 }
 0x200   : > { %vm1513_vm11 = vcmp.ge.f32.partialorder %v1481_v31, 0.0  ;;  %v1545_v13 = vmul.f32 0.2, %v1481_v31  ;;  %vm1529_vm12 = vcmp.ge.f32.partialorder %v1497_v63, 0.0  ;;  %v1561_v57 = vmul.f32 0.2, %v1497_v63 }
 0x201   : > { %v1578_v58 = vsel %vm1514_vm9, %v1482_v1, %v1546_v54  ;;  %v1594_v59 = vsel %vm1530_vm10, %v1498_v33, %v1562_v6 }
 0x202   : > { %1611 = vst.msk [vmem:[%s2889_s24 + $0x8] sm:$0xff] %vm1609_vm8, %v1578_v58  ;;  %1627 = vst.msk [vmem:[%s2889_s24 + $0x88] sm:$0xff] %vm1609_vm8, %v1594_v59  ;;  %v1577_v60 = vsel %vm1513_vm11, %v1481_v31, %v1545_v13  ;;  %v1593_v21 = vsel %vm1529_vm12, %v1497_v63, %v1561_v57 }
 0x203   : > { %1610 = vst.msk [vmem:[%s2889_s24] sm:$0xff] %vm1609_vm8, %v1577_v60  ;;  %1626 = vst.msk [vmem:[%s2889_s24 + $0x80] sm:$0xff] %vm1609_vm8, %v1593_v21 }
 0x208   : > { %v1796_v45 = vpop.f32.mrb[2].mxu0  ;;  %v1820_v19 = vpop.f32.mrb[2].mxu1 }
 0x209   : > { %v1292_v61 = vadd.f32 %v1796_v45, %v2861_v3  ;;  %v1372_v41 = vadd.f32 %v1820_v19, %v2861_v3  ;;  %v1286_v16 = vpop.f32.mrb[3].mxu0  ;;  %v1366_v49 = vpop.f32.mrb[3].mxu1 }
 0x20a   : > { %v1287_v30 = vadd.f32 %v2861_v3, %v1286_v16  ;;  %v1367_v40 = vadd.f32 %v2861_v3, %v1366_v49 }
 0x20b   : > { %v1445_v43 = vmul.f32 %v2866_v50, %v1292_v61  ;;  %v1461_v56 = vmul.f32 %v2866_v50, %v1372_v41 }
 0x20c   : > { %v1444_v4 = vmul.f32 %v2866_v50, %v1287_v30  ;;  %v1460_v34 = vmul.f32 %v2866_v50, %v1367_v40 }
 0x20d   : > { %v1484_v24 = vadd.f32 %v2873_v38, %v1445_v43  ;;  %v1500_v7 = vadd.f32 %v2873_v38, %v1461_v56 }
 0x20e   : > { %v1483_v48 = vadd.f32 %v2873_v38, %v1444_v4  ;;  %v1499_v46 = vadd.f32 %v2873_v38, %v1460_v34 }
 0x20f   : > { %vm1516_vm13 = vcmp.ge.f32.partialorder %v1484_v24, 0.0  ;;  %v1548_v25 = vmul.f32 0.2, %v1484_v24  ;;  %vm1532_vm14 = vcmp.ge.f32.partialorder %v1500_v7, 0.0  ;;  %v1564_v2 = vmul.f32 0.2, %v1500_v7 }
 0x210   : > { %vm1515_vm15 = vcmp.ge.f32.partialorder %v1483_v48, 0.0  ;;  %v1547_v12 = vmul.f32 0.2, %v1483_v48  ;;  %vm1531_vm0 = vcmp.ge.f32.partialorder %v1499_v46, 0.0  ;;  %v1563_v8 = vmul.f32 0.2, %v1499_v46 }
 0x211   : > { %v1580_v55 = vsel %vm1516_vm13, %v1484_v24, %v1548_v25  ;;  %v1596_v53 = vsel %vm1532_vm14, %v1500_v7, %v1564_v2 }
 0x212   : > { %1613 = vst.msk [vmem:[%s2889_s24 + $0x18] sm:$0xff] %vm1609_vm8, %v1580_v55  ;;  %1629 = vst.msk [vmem:[%s2889_s24 + $0x98] sm:$0xff] %vm1609_vm8, %v1596_v53  ;;  %v1579_v27 = vsel %vm1515_vm15, %v1483_v48, %v1547_v12  ;;  %v1595_v28 = vsel %vm1531_vm0, %v1499_v46, %v1563_v8 }
 0x213   : > { %1612 = vst.msk [vmem:[%s2889_s24 + $0x10] sm:$0xff] %vm1609_vm8, %v1579_v27  ;;  %1628 = vst.msk [vmem:[%s2889_s24 + $0x90] sm:$0xff] %vm1609_vm8, %v1595_v28 }
 0x218   : > { %v1799_v5 = vpop.f32.mrb[4].mxu0  ;;  %v1823_v52 = vpop.f32.mrb[4].mxu1 }
 0x219   : > { %v1302_v39 = vadd.f32 %v1799_v5, %v2861_v3  ;;  %v1382_v17 = vadd.f32 %v1823_v52, %v2861_v3  ;;  %v1296_v37 = vpop.f32.mrb[5].mxu0  ;;  %v1376_v22 = vpop.f32.mrb[5].mxu1 }
 0x21a   : > { %v1297_v42 = vadd.f32 %v2861_v3, %v1296_v37  ;;  %v1377_v23 = vadd.f32 %v2861_v3, %v1376_v22 }
 0x21b   : > { %v1447_v44 = vmul.f32 %v2866_v50, %v1302_v39  ;;  %v1463_v62 = vmul.f32 %v2866_v50, %v1382_v17 }
 0x21c   : > { %v1446_v26 = vmul.f32 %v2866_v50, %v1297_v42  ;;  %v1462_v14 = vmul.f32 %v2866_v50, %v1377_v23 }
 0x21d   : > { %v1486_v9 = vadd.f32 %v2873_v38, %v1447_v44  ;;  %v1502_v51 = vadd.f32 %v2873_v38, %v1463_v62 }
 0x21e   : > { %v1485_v15 = vadd.f32 %v2873_v38, %v1446_v26  ;;  %v1501_v35 = vadd.f32 %v2873_v38, %v1462_v14 }
 0x21f   : > { %vm1518_vm1 = vcmp.ge.f32.partialorder %v1486_v9, 0.0  ;;  %v1550_v20 = vmul.f32 0.2, %v1486_v9  ;;  %vm1534_vm2 = vcmp.ge.f32.partialorder %v1502_v51, 0.0  ;;  %v1566_v10 = vmul.f32 0.2, %v1502_v51 }
 0x220   : > { %vm1517_vm3 = vcmp.ge.f32.partialorder %v1485_v15, 0.0  ;;  %v1549_v36 = vmul.f32 0.2, %v1485_v15  ;;  %vm1533_vm4 = vcmp.ge.f32.partialorder %v1501_v35, 0.0  ;;  %v1565_v29 = vmul.f32 0.2, %v1501_v35 }
 0x221   : > { %v1582_v32 = vsel %vm1518_vm1, %v1486_v9, %v1550_v20  ;;  %v1598_v47 = vsel %vm1534_vm2, %v1502_v51, %v1566_v10 }
 0x222   : > { %1615 = vst.msk [vmem:[%s2889_s24 + $0x28] sm:$0xff] %vm1609_vm8, %v1582_v32  ;;  %1631 = vst.msk [vmem:[%s2889_s24 + $0xa8] sm:$0xff] %vm1609_vm8, %v1598_v47  ;;  %v1581_v0 = vsel %vm1517_vm3, %v1485_v15, %v1549_v36  ;;  %v1597_v18 = vsel %vm1533_vm4, %v1501_v35, %v1565_v29 }
 0x223   : > { %1614 = vst.msk [vmem:[%s2889_s24 + $0x20] sm:$0xff] %vm1609_vm8, %v1581_v0  ;;  %1630 = vst.msk [vmem:[%s2889_s24 + $0xa0] sm:$0xff] %vm1609_vm8, %v1597_v18 }
 0x228   : > { %v1802_v11 = vpop.f32.mrb[6].mxu0  ;;  %v1826_v1 = vpop.f32.mrb[6].mxu1 }
 0x229   : > { %v1312_v33 = vadd.f32 %v1802_v11, %v2861_v3  ;;  %v1392_v31 = vadd.f32 %v1826_v1, %v2861_v3  ;;  %v1306_v63 = vpop.f32.mrb[7].mxu0  ;;  %v1386_v54 = vpop.f32.mrb[7].mxu1 }
 0x22a   : > { %v1307_v6 = vadd.f32 %v2861_v3, %v1306_v63  ;;  %v1387_v13 = vadd.f32 %v2861_v3, %v1386_v54 }
 0x22b   : > { %v1449_v57 = vmul.f32 %v2866_v50, %v1312_v33  ;;  %v1465_v58 = vmul.f32 %v2866_v50, %v1392_v31 }
 0x22c   : > { %v1448_v59 = vmul.f32 %v2866_v50, %v1307_v6  ;;  %v1464_v60 = vmul.f32 %v2866_v50, %v1387_v13 }
 0x22d   : > { %v1488_v21 = vadd.f32 %v2873_v38, %v1449_v57  ;;  %v1504_v45 = vadd.f32 %v2873_v38, %v1465_v58 }
 0x22e   : > { %v1487_v19 = vadd.f32 %v2873_v38, %v1448_v59  ;;  %v1503_v61 = vadd.f32 %v2873_v38, %v1464_v60 }
 0x22f   : > { %vm1520_vm5 = vcmp.ge.f32.partialorder %v1488_v21, 0.0  ;;  %v1552_v41 = vmul.f32 0.2, %v1488_v21  ;;  %vm1536_vm6 = vcmp.ge.f32.partialorder %v1504_v45, 0.0  ;;  %v1568_v16 = vmul.f32 0.2, %v1504_v45 }
 0x230   : > { %vm1519_vm7 = vcmp.ge.f32.partialorder %v1487_v19, 0.0  ;;  %v1551_v49 = vmul.f32 0.2, %v1487_v19  ;;  %vm1535_vm9 = vcmp.ge.f32.partialorder %v1503_v61, 0.0  ;;  %v1567_v30 = vmul.f32 0.2, %v1503_v61 }
 0x231   : > { %v1584_v40 = vsel %vm1520_vm5, %v1488_v21, %v1552_v41  ;;  %v1600_v43 = vsel %vm1536_vm6, %v1504_v45, %v1568_v16 }
 0x232   : > { %1617 = vst.msk [vmem:[%s2889_s24 + $0x38] sm:$0xff] %vm1609_vm8, %v1584_v40  ;;  %1633 = vst.msk [vmem:[%s2889_s24 + $0xb8] sm:$0xff] %vm1609_vm8, %v1600_v43  ;;  %v1583_v56 = vsel %vm1519_vm7, %v1487_v19, %v1551_v49  ;;  %v1599_v4 = vsel %vm1535_vm9, %v1503_v61, %v1567_v30 }
 0x233   : > { %1616 = vst.msk [vmem:[%s2889_s24 + $0x30] sm:$0xff] %vm1609_vm8, %v1583_v56  ;;  %1632 = vst.msk [vmem:[%s2889_s24 + $0xb0] sm:$0xff] %vm1609_vm8, %v1599_v4 }
 0x238   : > { %v1805_v34 = vpop.f32.mrb[8].mxu0  ;;  %v1829_v24 = vpop.f32.mrb[8].mxu1 }
 0x239   : > { %v1322_v7 = vadd.f32 %v1805_v34, %v2861_v3  ;;  %v1402_v48 = vadd.f32 %v1829_v24, %v2861_v3  ;;  %v1316_v46 = vpop.f32.mrb[9].mxu0  ;;  %v1396_v25 = vpop.f32.mrb[9].mxu1 }
 0x23a   : > { %v1317_v2 = vadd.f32 %v2861_v3, %v1316_v46  ;;  %v1397_v12 = vadd.f32 %v2861_v3, %v1396_v25 }
 0x23b   : > { %v1451_v8 = vmul.f32 %v2866_v50, %v1322_v7  ;;  %v1467_v55 = vmul.f32 %v2866_v50, %v1402_v48 }
 0x23c   : > { %v1450_v53 = vmul.f32 %v2866_v50, %v1317_v2  ;;  %v1466_v27 = vmul.f32 %v2866_v50, %v1397_v12 }
 0x23d   : > { %v1490_v28 = vadd.f32 %v2873_v38, %v1451_v8  ;;  %v1506_v5 = vadd.f32 %v2873_v38, %v1467_v55 }
 0x23e   : > { %v1489_v52 = vadd.f32 %v2873_v38, %v1450_v53  ;;  %v1505_v39 = vadd.f32 %v2873_v38, %v1466_v27 }
 0x23f   : > { %vm1522_vm10 = vcmp.ge.f32.partialorder %v1490_v28, 0.0  ;;  %v1554_v17 = vmul.f32 0.2, %v1490_v28  ;;  %vm1538_vm11 = vcmp.ge.f32.partialorder %v1506_v5, 0.0  ;;  %v1570_v37 = vmul.f32 0.2, %v1506_v5 }
 0x240   : > { %vm1521_vm12 = vcmp.ge.f32.partialorder %v1489_v52, 0.0  ;;  %v1553_v22 = vmul.f32 0.2, %v1489_v52  ;;  %vm1537_vm13 = vcmp.ge.f32.partialorder %v1505_v39, 0.0  ;;  %v1569_v42 = vmul.f32 0.2, %v1505_v39 }
 0x241   : > { %v1586_v23 = vsel %vm1522_vm10, %v1490_v28, %v1554_v17  ;;  %v1602_v44 = vsel %vm1538_vm11, %v1506_v5, %v1570_v37 }
 0x242   : > { %1619 = vst.msk [vmem:[%s2889_s24 + $0x48] sm:$0xff] %vm1609_vm8, %v1586_v23  ;;  %1635 = vst.msk [vmem:[%s2889_s24 + $0xc8] sm:$0xff] %vm1609_vm8, %v1602_v44  ;;  %v1585_v62 = vsel %vm1521_vm12, %v1489_v52, %v1553_v22  ;;  %v1601_v26 = vsel %vm1537_vm13, %v1505_v39, %v1569_v42 }
 0x243   : > { %1618 = vst.msk [vmem:[%s2889_s24 + $0x40] sm:$0xff] %vm1609_vm8, %v1585_v62  ;;  %1634 = vst.msk [vmem:[%s2889_s24 + $0xc0] sm:$0xff] %vm1609_vm8, %v1601_v26 }
 0x248   : > { %v1808_v14 = vpop.f32.mrb[10].mxu0  ;;  %v1832_v9 = vpop.f32.mrb[10].mxu1 }
 0x249   : > { %v1332_v51 = vadd.f32 %v1808_v14, %v2861_v3  ;;  %v1412_v15 = vadd.f32 %v1832_v9, %v2861_v3  ;;  %v1326_v35 = vpop.f32.mrb[11].mxu0  ;;  %v1406_v20 = vpop.f32.mrb[11].mxu1 }
 0x24a   : > { %v1327_v10 = vadd.f32 %v2861_v3, %v1326_v35  ;;  %v1407_v36 = vadd.f32 %v2861_v3, %v1406_v20 }
 0x24b   : > { %v1453_v29 = vmul.f32 %v2866_v50, %v1332_v51  ;;  %v1469_v32 = vmul.f32 %v2866_v50, %v1412_v15 }
 0x24c   : > { %v1452_v47 = vmul.f32 %v2866_v50, %v1327_v10  ;;  %v1468_v0 = vmul.f32 %v2866_v50, %v1407_v36 }
 0x24d   : > { %v1492_v18 = vadd.f32 %v2873_v38, %v1453_v29  ;;  %v1508_v11 = vadd.f32 %v2873_v38, %v1469_v32 }
 0x24e   : > { %v1491_v1 = vadd.f32 %v2873_v38, %v1452_v47  ;;  %v1507_v33 = vadd.f32 %v2873_v38, %v1468_v0 }
 0x24f   : > { %vm1524_vm14 = vcmp.ge.f32.partialorder %v1492_v18, 0.0  ;;  %v1556_v31 = vmul.f32 0.2, %v1492_v18  ;;  %vm1540_vm15 = vcmp.ge.f32.partialorder %v1508_v11, 0.0  ;;  %v1572_v63 = vmul.f32 0.2, %v1508_v11 }
 0x250   : > { %vm1523_vm0 = vcmp.ge.f32.partialorder %v1491_v1, 0.0  ;;  %v1555_v54 = vmul.f32 0.2, %v1491_v1  ;;  %vm1539_vm1 = vcmp.ge.f32.partialorder %v1507_v33, 0.0  ;;  %v1571_v6 = vmul.f32 0.2, %v1507_v33 }
 0x251   : > { %v1588_v13 = vsel %vm1524_vm14, %v1492_v18, %v1556_v31  ;;  %v1604_v57 = vsel %vm1540_vm15, %v1508_v11, %v1572_v63 }
 0x252   : > { %1621 = vst.msk [vmem:[%s2889_s24 + $0x58] sm:$0xff] %vm1609_vm8, %v1588_v13  ;;  %1637 = vst.msk [vmem:[%s2889_s24 + $0xd8] sm:$0xff] %vm1609_vm8, %v1604_v57  ;;  %v1587_v58 = vsel %vm1523_vm0, %v1491_v1, %v1555_v54  ;;  %v1603_v59 = vsel %vm1539_vm1, %v1507_v33, %v1571_v6 }
 0x253   : > { %1620 = vst.msk [vmem:[%s2889_s24 + $0x50] sm:$0xff] %vm1609_vm8, %v1587_v58  ;;  %1636 = vst.msk [vmem:[%s2889_s24 + $0xd0] sm:$0xff] %vm1609_vm8, %v1603_v59 }
 0x258   : > { %v1811_v60 = vpop.f32.mrb[12].mxu0  ;;  %v1835_v21 = vpop.f32.mrb[12].mxu1 }
 0x259   : > { %v1342_v45 = vadd.f32 %v1811_v60, %v2861_v3  ;;  %v1422_v19 = vadd.f32 %v1835_v21, %v2861_v3  ;;  %v1336_v61 = vpop.f32.mrb[13].mxu0  ;;  %v1416_v41 = vpop.f32.mrb[13].mxu1 }
 0x25a   : > { %v1337_v16 = vadd.f32 %v2861_v3, %v1336_v61  ;;  %v1417_v49 = vadd.f32 %v2861_v3, %v1416_v41 }
 0x25b   : > { %v1455_v30 = vmul.f32 %v2866_v50, %v1342_v45  ;;  %v1471_v40 = vmul.f32 %v2866_v50, %v1422_v19 }
 0x25c   : > { %v1454_v43 = vmul.f32 %v2866_v50, %v1337_v16  ;;  %v1470_v56 = vmul.f32 %v2866_v50, %v1417_v49 }
 0x25d   : > { %v1494_v4 = vadd.f32 %v2873_v38, %v1455_v30  ;;  %v1510_v34 = vadd.f32 %v2873_v38, %v1471_v40 }
 0x25e   : > { %v1493_v24 = vadd.f32 %v2873_v38, %v1454_v43  ;;  %v1509_v7 = vadd.f32 %v2873_v38, %v1470_v56 }
 0x25f   : > { %vm1526_vm2 = vcmp.ge.f32.partialorder %v1494_v4, 0.0  ;;  %v1558_v48 = vmul.f32 0.2, %v1494_v4  ;;  %vm1542_vm3 = vcmp.ge.f32.partialorder %v1510_v34, 0.0  ;;  %v1574_v46 = vmul.f32 0.2, %v1510_v34 }
 0x260   : > { %vm1525_vm4 = vcmp.ge.f32.partialorder %v1493_v24, 0.0  ;;  %v1557_v25 = vmul.f32 0.2, %v1493_v24  ;;  %vm1541_vm5 = vcmp.ge.f32.partialorder %v1509_v7, 0.0  ;;  %v1573_v2 = vmul.f32 0.2, %v1509_v7 }
 0x261   : > { %v1590_v12 = vsel %vm1526_vm2, %v1494_v4, %v1558_v48  ;;  %v1606_v8 = vsel %vm1542_vm3, %v1510_v34, %v1574_v46 }
 0x262   : > { %1623 = vst.msk [vmem:[%s2889_s24 + $0x68] sm:$0xff] %vm1609_vm8, %v1590_v12  ;;  %1639 = vst.msk [vmem:[%s2889_s24 + $0xe8] sm:$0xff] %vm1609_vm8, %v1606_v8  ;;  %v1589_v55 = vsel %vm1525_vm4, %v1493_v24, %v1557_v25  ;;  %v1605_v53 = vsel %vm1541_vm5, %v1509_v7, %v1573_v2 }
 0x263   : > { %1622 = vst.msk [vmem:[%s2889_s24 + $0x60] sm:$0xff] %vm1609_vm8, %v1589_v55  ;;  %1638 = vst.msk [vmem:[%s2889_s24 + $0xe0] sm:$0xff] %vm1609_vm8, %v1605_v53 }
 0x268   : > { %v1838_v27 = vpop.f32.mrb[14].mxu1 }
 0x269   : > { %v1814_v28 = vpop.f32.mrb[14].mxu0  ;;  %v1432_v5 = vadd.f32 %v1838_v27, %v2861_v3  ;;  %v1426_v52 = vpop.f32.mrb[15].mxu1 }
 0x26a   : > { %v1352_v39 = vadd.f32 %v1814_v28, %v2861_v3  ;;  %v1346_v17 = vpop.f32.mrb[15].mxu0  ;;  %v1427_v37 = vadd.f32 %v2861_v3, %v1426_v52 }
 0x26b   : > { %v1473_v22 = vmul.f32 %v2866_v50, %v1432_v5  ;;  %v1347_v42 = vadd.f32 %v2861_v3, %v1346_v17 }
 0x26c   : > { %v1457_v23 = vmul.f32 %v2866_v50, %v1352_v39  ;;  %v1472_v44 = vmul.f32 %v2866_v50, %v1427_v37 }
 0x26d   : > { %v1512_v62 = vadd.f32 %v2873_v38, %v1473_v22  ;;  %v1456_v26 = vmul.f32 %v2866_v50, %v1347_v42 }
 0x26e   : > { %v1496_v14 = vadd.f32 %v2873_v38, %v1457_v23  ;;  %v1511_v9 = vadd.f32 %v2873_v38, %v1472_v44 }
 0x26f   : > { %vm1544_vm6 = vcmp.ge.f32.partialorder %v1512_v62, 0.0  ;;  %v1576_v51 = vmul.f32 0.2, %v1512_v62  ;;  %v1495_v3 = vadd.f32 %v2873_v38, %v1456_v26 }
 0x270   : > { %vm1528_vm7 = vcmp.ge.f32.partialorder %v1496_v14, 0.0  ;;  %v1560_v15 = vmul.f32 0.2, %v1496_v14  ;;  %vm1543_vm9 = vcmp.ge.f32.partialorder %v1511_v9, 0.0  ;;  %v1575_v35 = vmul.f32 0.2, %v1511_v9 }
 0x271   : > { %v1608_v20 = vsel %vm1544_vm6, %v1512_v62, %v1576_v51  ;;  %vm1527_vm10 = vcmp.ge.f32.partialorder %v1495_v3, 0.0  ;;  %v1559_v10 = vmul.f32 0.2, %v1495_v3 }
 0x272   : > { %v1592_v36 = vsel %vm1528_vm7, %v1496_v14, %v1560_v15  ;;  %1641 = vst.msk [vmem:[%s2889_s24 + $0xf8] sm:$0xff] %vm1609_vm8, %v1608_v20  ;;  %v1607_v50 = vsel %vm1543_vm9, %v1511_v9, %v1575_v35 }
 0x273   : > { %1625 = vst.msk [vmem:[%s2889_s24 + $0x78] sm:$0xff] %vm1609_vm8, %v1592_v36  ;;  %v1591_v29 = vsel %vm1527_vm10, %v1495_v3, %v1559_v10  ;;  %1640 = vst.msk [vmem:[%s2889_s24 + $0xf0] sm:$0xff] %vm1609_vm8, %v1607_v50 }
 0x274   : > { %1624 = vst.msk [vmem:[%s2889_s24 + $0x70] sm:$0xff] %vm1609_vm8, %v1591_v29 }
 0x275 PF: > { %s15_s18 = sadd.s32 1, %s1872_s18  }
 0x276   : > { %p12_p4 = scmp.ge.s32.totalorder %s15_s18, 4  }
 0x278   :  { %14 = sbr.rel (!%p12_p4) target bundleno = 1 (0x1), region = 70 }

// kernel: decoder_block.2
= control target key start
LH: loop header
LB: loop body
LE: loop exit
PB: predicated region body
PF: predicated region fallthrough
CT: control target
= control target key end

     0   :  { %s1804_s12 = smov 0   ;;  %s2849_s0 = inlined_call_operand.vmem [shape: f32[2,18,18,4], index: 0, kind: input, shape index: {}]   ;;  %s2850_s1 = inlined_call_operand.vmem [shape: f32[36,32], index: 1, kind: input, shape index: {}]   ;;  %s2851_s2 = inlined_call_operand.vmem [shape: f32[1,32], index: 2, kind: input, shape index: {}]   ;;  %s2852_s3 = inlined_call_operand.vmem [shape: f32[2,2,32], index: 3, kind: output, shape index: {}]  }
   0x1 LB: > { %s1607_s13 = sadd.s32 4294967295, %s1778_s12   ;;  %p1611_p0 = scmp.ge.s32.totalorder %s1778_s12, 1  ;;  %s1778_s12 = sphi %s1804_s12, %s13_s12  }
   0x2   : > { %p137_p1 = scmp.lt.s32.totalorder %s1778_s12, 3 }
   0x4   : > { %p138_p2 = pnand %p1611_p0, %p137_p1 }
   0x5   : > { %p160_p3 = scmp.lt.s32.totalorder (!%p138_p2), %s1607_s13, 1  ;;  %vm271_vm0 = vcmask (!%p138_p2), 1046528   ;;  %vm448_vm1 = vcmask (!%p138_p2), 1045504   ;;  %s1780_s18 = smov (!%p138_p2), 4   ;;  %vm625_vm2 = vcmask (!%p138_p2), 31744   ;;  %vm658_vm3 = vcmask (!%p138_p2), 64512  }
   0x6   : > { %141 = sbr.rel (%p138_p2) target bundleno = 643 (0x283), region = 32  ;;  %s1781_s19 = smov (!%p138_p2), 8   ;;  %vm1150_vm4 = vcmask (!%p138_p2), 1043456   ;;  %vm975_vm5 = vcmask (!%p138_p2), 97280   ;;  %vm1008_vm6 = vcmask (!%p138_p2), 195584   ;;  %vm1053_vm7 = vcmask (!%p138_p2), 293888  }
   0x7   : > { %s1782_s30 = smov (!%p138_p2), 12   ;;  %s1783_s4 = smov (!%p138_p2), 24   ;;  %vm1379_vm8 = vcmask (!%p138_p2), 261120   ;;  %vm1550_vm9 = vcmask (!%p138_p2), 1040384   ;;  %vm1552_vm10 = vcmask (!%p138_p2), 254976  }
   0xd   : > { %s2886_s13 = smov (!%p160_p3, %s1607_s13), 1 }
   0xe   : > { %s1759_s14 = smul.u32 432, %s2886_s13  ;;  %s1613_s7 = sshll.u32 %s2886_s13, 1 }
   0xf   : > { %s168_s10 = scalar_lea.vmem %s2852_s3, %s1613_s7 }
  0x10   : > { %s1818_s17 = scalar_lea.vmem %s2849_s0, %s1759_s14 }
  0x11   : > { %v1821_v0 = vld [vmem:[%s1818_s17 + $0x30] sm:$0xff]  ;;  %v1824_v1 = vld [vmem:[%s1818_s17 + $0x38] sm:$0xff]  ;;  %v1832_v5 = vld [vmem:[%s1818_s17 + $0x20] sm:$0xff] }
  0x12   : > { %v1827_v2 = vld [vmem:[%s1818_s17 + $0x18] sm:$0xff]  ;;  %v282_v3 = vrot.slane %v1821_v0, 1  ;;  %v283_v4 = vrot.slane %v1824_v1, 1  ;;  %v278_v8 = vrot.slane %v1832_v5, 1  ;;  %v455_v9 = vrot.slane %v1832_v5, 2  ;;  %v1853_v24 = vld [vmem:[%s1818_s17 + $0x50] sm:$0xff] }
  0x13   : > { %v277_v6 = vrot.slane %v1827_v2, 1  ;;  %v454_v7 = vrot.slane %v1827_v2, 2  ;;  %v174_v10 = vld [vmem:[%s1818_s17 + $0x28] sm:$0x3]  ;;  %v177_v13 = vld [vmem:[%s1818_s17 + $0x40] sm:$0x3] }
  0x14   : > { %v284_v11 = vsel %vm271_vm0, %v282_v3, %v283_v4  ;;  %v280_v12 = vrot.slane %v174_v10, 1  ;;  %v457_v16 = vrot.slane %v174_v10, 2  ;;  %v285_v18 = vrot.slane %v177_v13, 1  ;;  %v180_v25 = vld [vmem:[%s1818_s17 + $0x58] sm:$0x3]  ;;  %v1857_v26 = vld [vmem:[%s1818_s17 + $0x48] sm:$0xff] }
  0x15   : > { %360 = vrot.lane.b32.xlu1 %v284_v11, %s1780_s18  ;;  %v279_v14 = vsel %vm271_vm0, %v277_v6, %v278_v8  ;;  %v456_v15 = vsel %vm448_vm1, %v454_v7, %v455_v9  ;;  %v460_v20 = vrot.slane %v1824_v1, 2  ;;  %v462_v21 = vrot.slane %v177_v13, 2  ;;  %v1870_v35 = vld [vmem:[%s1818_s17 + $0x68] sm:$0xff]  ;;  %v183_v36 = vld [vmem:[%s1818_s17 + $0x70] sm:$0x3]  ;;  %v1874_v37 = vld [vmem:[%s1818_s17 + $0xe0] sm:$0xff] }
  0x16   : > { %356 = vrot.lane.b32.xlu0 %v279_v14, %s1780_s18  ;;  %v281_v17 = vsel %vm271_vm0, %v278_v8, %v280_v12  ;;  %v458_v19 = vsel %vm448_vm1, %v455_v9, %v457_v16  ;;  %v286_v22 = vsel %vm271_vm0, %v283_v4, %v285_v18  ;;  %v459_v23 = vrot.slane %v1821_v0, 2  ;;  %v198_v40 = vld [vmem:[%s1818_s17 + $0xe8] sm:$0x3]  ;;  %v1880_v41 = vld [vmem:[%s1818_s17 + $0x60] sm:$0xff]  ;;  %v1886_v45 = vld [vmem:[%s1818_s17 + $0xf8] sm:$0xff] }
  0x17   : > { %v463_v27 = vsel %vm448_vm1, %v460_v20, %v462_v21  ;;  %v288_v28 = vrot.slane %v1853_v24, 1  ;;  %v290_v29 = vrot.slane %v180_v25, 1  ;;  %v287_v31 = vrot.slane %v1857_v26, 1  ;;  %v201_v46 = vld [vmem:[%s1818_s17 + $0x100] sm:$0x3]  ;;  %v1895_v53 = vld [vmem:[%s1818_s17 + $0x110] sm:$0xff] }
  0x18   : > { %v461_v30 = vsel %vm448_vm1, %v459_v23, %v460_v20  ;;  %v465_v33 = vrot.slane %v1853_v24, 2  ;;  %v467_v34 = vrot.slane %v180_v25, 2  ;;  %v464_v39 = vrot.slane %v1857_v26, 2  ;;  %v204_v57 = vld [vmem:[%s1818_s17 + $0x118] sm:$0x3]  ;;  %v1908_v60 = vld [vmem:[%s1818_s17 + $0x80] sm:$0xff] }
  0x19   : > { %533 = vrot.lane.b32.xlu1 %v456_v15, %s1781_s19  ;;  %v291_v32 = vsel %vm271_vm0, %v288_v28, %v290_v29  ;;  %v289_v38 = vsel %vm271_vm0, %v287_v31, %v288_v28  ;;  %v293_v42 = vrot.slane %v1870_v35, 1  ;;  %v295_v43 = vrot.slane %v183_v36, 1  ;;  %v1911_v61 = vld [vmem:[%s1818_s17 + $0x88] sm:$0x3]  ;;  %v207_v9 = vld [vmem:[%s1818_s17 + $0x130] sm:$0x3] }
  0x1a   : > { %358 = vrot.lane.b32.xlu0 %v281_v17, %s1780_s18  ;;  %v318_v44 = vrot.slane %v1874_v37, 1  ;;  %v468_v47 = vsel %vm448_vm1, %v465_v33, %v467_v34  ;;  %v320_v48 = vrot.slane %v198_v40, 1  ;;  %v495_v49 = vrot.slane %v1874_v37, 2  ;;  %v1927_v8 = vld [vmem:[%s1818_s17 + $0x128] sm:$0xff]  ;;  %v1933_v12 = vld [vmem:[%s1818_s17 + $0x78] sm:$0xff]  ;;  %v1943_v18 = vld [vmem:[%s1818_s17 + $0x140] sm:$0xff] }
  0x1b   : > { %v466_v50 = vsel %vm448_vm1, %v464_v39, %v465_v33  ;;  %v292_v51 = vrot.slane %v1880_v41, 1  ;;  %v497_v52 = vrot.slane %v198_v40, 2  ;;  %v323_v55 = vrot.slane %v1886_v45, 1  ;;  %v210_v23 = vld [vmem:[%s1818_s17 + $0x148] sm:$0x3]  ;;  %v1971_v34 = vld [vmem:[%s1818_s17 + $0x158] sm:$0xff] }
  0x1c   : > { %v1900_v54 = vsel %vm271_vm0, %v318_v44, %v320_v48  ;;  %v325_v56 = vrot.slane %v201_v46, 1  ;;  %v296_v58 = vsel %vm271_vm0, %v293_v42, %v295_v43  ;;  %v470_v59 = vrot.slane %v1870_v35, 2  ;;  %v1976_v39 = vld [vmem:[%s1818_s17 + $0x98] sm:$0xff] }
  0x1d   : > { %535 = vrot.lane.b32.xlu1 %v458_v19, %s1781_s19  ;;  %v1916_v62 = vsel %vm448_vm1, %v495_v49, %v497_v52  ;;  %v500_v63 = vrot.slane %v1886_v45, 2  ;;  %v472_v3 = vrot.slane %v183_v36, 2  ;;  %v502_v6 = vrot.slane %v201_v46, 2  ;;  %v213_v36 = vld [vmem:[%s1818_s17 + $0x160] sm:$0x3] }
  0x1e   : > { %362 = vrot.lane.b32.xlu0 %v286_v22, %s1780_s18  ;;  %v1923_v4 = vsel %vm271_vm0, %v323_v55, %v325_v56  ;;  %v2867_v7 = vrot.slane %v1895_v53, 1  ;;  %v294_v10 = vsel %vm271_vm0, %v292_v51, %v293_v42  ;;  %v469_v11 = vrot.slane %v1880_v41, 2  ;;  %v1991_v51 = vld [vmem:[%s1818_s17 + $0x170] sm:$0xff] }
  0x1f   : > { %v330_v13 = vrot.slane %v204_v57, 1  ;;  %v2864_v14 = vrot.slane %v1895_v53, 2  ;;  %v298_v15 = vrot.slane %v1908_v60, 1  ;;  %v1940_v16 = vsel %vm448_vm1, %v500_v63, %v502_v6  ;;  %v2005_v6 = vld [vmem:[%s1818_s17 + $0x90] sm:$0xff] }
  0x20   : > { %v507_v17 = vrot.slane %v204_v57, 2  ;;  %v300_v19 = vrot.slane %v1911_v61, 1  ;;  %v2860_v21 = vrot.slane %v1927_v8, 1  ;;  %v335_v22 = vrot.slane %v207_v9, 1 }
  0x21   : > { %539 = vrot.lane.b32.xlu1 %v463_v27, %s1781_s19  ;;  %v1950_v20 = vsel %vm271_vm0, %v2867_v7, %v330_v13  ;;  %v473_v25 = vsel %vm448_vm1, %v470_v59, %v472_v3  ;;  %v297_v27 = vrot.slane %v1933_v12, 1  ;;  %v2859_v29 = vrot.slane %v1927_v8, 2  ;;  %v2120_v7 = vld [vmem:[%s1818_s17 + $0xc0] sm:$0xff] }
  0x22   : > { %537 = vrot.lane.b32.xlu0 %v461_v30, %s1781_s19  ;;  %v1960_v28 = vsel %vm448_vm1, %v2864_v14, %v507_v17  ;;  %v471_v30 = vsel %vm448_vm1, %v469_v11, %v470_v59  ;;  %v1967_v31 = vsel %vm271_vm0, %v2860_v21, %v335_v22  ;;  %v2858_v33 = vrot.slane %v1943_v18, 1  ;;  %v216_v59 = vld [vmem:[%s1818_s17 + $0x178] sm:$0x3] }
  0x23   : > { %v340_v40 = vrot.slane %v210_v23, 1  ;;  %v2857_v42 = vrot.slane %v1943_v18, 2  ;;  %v477_v43 = vrot.slane %v1911_v61, 2  ;;  %v474_v46 = vrot.slane %v1933_v12, 2 }
  0x24   : > { %v301_v52 = vsel %vm271_vm0, %v298_v15, %v300_v19  ;;  %v2856_v57 = vrot.slane %v1971_v34, 1  ;;  %v299_v61 = vsel %vm271_vm0, %v297_v27, %v298_v15  ;;  %v303_v3 = vrot.slane %v1976_v39, 1 }
  0x25   : > { %366 = vrot.lane.b32.xlu1 %v291_v32, %s1780_s18  ;;  %v512_v32 = vrot.slane %v207_v9, 2  ;;  %v1998_v56 = vsel %vm271_vm0, %v2858_v33, %v340_v40  ;;  %v522_v15 = vrot.slane %v213_v36, 2  ;;  %v2853_v17 = vrot.slane %v1991_v51, 1 }
  0x26   : > { %364 = vrot.lane.b32.xlu0 %v289_v38, %s1780_s18  ;;  %v475_v38 = vrot.slane %v1908_v60, 2  ;;  %v350_v19 = vrot.slane %v216_v59, 1  ;;  %v2855_v22 = vrot.slane %v1991_v51, 2 }
  0x27   : > { %v1988_v48 = vsel %vm448_vm1, %v2859_v29, %v512_v32  ;;  %v2031_v32 = vld [vmem:[%s1818_s17 + $0x188] sm:$0xff] }
  0x28   : > { %v476_v40 = vsel %vm448_vm1, %v474_v46, %v475_v38  ;;  %v479_v46 = vrot.slane %v2005_v6, 2 }
  0x29   : > { %543 = vrot.lane.b32.xlu1 %v468_v47, %s1781_s19  ;;  %v1983_v47 = vld [vmem:[%s1818_s17 + $0xa0] sm:$0x3] }
  0x2a   : > { %541 = vrot.lane.b32.xlu0 %v466_v50, %s1781_s19  ;;  %v517_v50 = vrot.slane %v210_v23, 2  ;;  %v305_v11 = vrot.slane %v1983_v47, 1  ;;  %v478_v23 = vsel %vm448_vm1, %v475_v38, %v477_v43  ;;  %v2041_v43 = vld [vmem:[%s1818_s17 + $0x8] sm:$0xff]  ;;  %v482_v38 = vrot.slane %v1983_v47, 2 }
  0x2b   : > { %v222_v47 = vld [vmem:[%s1818_s17 + $0x1a8] sm:$0x3]  ;;  %v2865_v33 = vrot.slane %v2041_v43, 2 }
  0x2c   : > { %v2010_v9 = vsel %vm448_vm1, %v2857_v42, %v517_v50  ;;  %v2038_v50 = vsel %vm271_vm0, %v2853_v17, %v350_v19  ;;  %v2861_v19 = vrot.slane %v2031_v32, 1 }
  0x2d   : > { %370 = vrot.lane.b32.xlu1 %v296_v58, %s1780_s18  ;;  %v345_v58 = vrot.slane %v213_v36, 1  ;;  %v219_v36 = vld [vmem:[%s1818_s17 + $0x190] sm:$0x3] }
  0x2e   : > { %368 = vrot.lane.b32.xlu0 %v294_v10, %s1780_s18  ;;  %v2854_v10 = vrot.slane %v1971_v34, 2  ;;  %v708_v29 = vrot.slane %v219_v36, 2 }
  0x2f   : > { %v2017_v13 = vsel %vm271_vm0, %v2856_v57, %v345_v58  ;;  %v306_v58 = vsel %vm271_vm0, %v303_v3, %v305_v11  ;;  %v697_v11 = vrot.slane %v219_v36, 1  ;;  %v192_v57 = vld [vmem:[%s1818_s17 + $0xb8] sm:$0x3] }
  0x30   : > { %v2028_v27 = vsel %vm448_vm1, %v2854_v10, %v522_v15  ;;  %v2055_v15 = vld [vmem:[%s1818_s17 + $0xb0] sm:$0xff]  ;;  %v2862_v10 = vrot.slane %v2041_v43, 1 }
  0x31   : > { %547 = vrot.lane.b32.xlu1 %v473_v25, %s1781_s19  ;;  %v302_v25 = vrot.slane %v2005_v6, 1  ;;  %v2070_v42 = vsel %vm271_vm0, %v2861_v19, %v697_v11  ;;  %v726_v19 = vrot.slane %v222_v47, 1 }
  0x32   : > { %545 = vrot.lane.b32.xlu0 %v471_v30, %s1781_s19  ;;  %v527_v30 = vrot.slane %v216_v59, 2  ;;  %v480_v59 = vrot.slane %v1976_v39, 2 }
  0x33   : > { %v304_v17 = vsel %vm271_vm0, %v302_v25, %v303_v3  ;;  %v308_v3 = vrot.slane %v2055_v15, 1  ;;  %v2075_v25 = vld [vmem:[%s1818_s17 + $0xa8] sm:$0xff] }
  0x34   : > { %v307_v14 = vrot.slane %v2075_v25, 1 }
  0x35   : > { %374 = vrot.lane.b32.xlu1 %v301_v52, %s1780_s18  ;;  %v171_v52 = vld [vmem:[%s1818_s17 + $0x10] sm:$0x3] }
  0x36   : > { %372 = vrot.lane.b32.xlu0 %v299_v61, %s1780_s18  ;;  %v2049_v61 = vsel %vm448_vm1, %v2855_v22, %v527_v30  ;;  %v2863_v30 = vrot.slane %v2031_v32, 2  ;;  %v275_v22 = vrot.slane %v171_v52, 1 }
  0x38   : > { %v2080_v21 = vsel %vm271_vm0, %v2862_v10, %v275_v22  ;;  %v2086_v11 = vsel %vm448_vm1, %v2863_v30, %v708_v29  ;;  %v483_v22 = vsel %vm448_vm1, %v480_v59, %v482_v38  ;;  %v737_v29 = vrot.slane %v222_v47, 2 }
  0x39   : > { %551 = vrot.lane.b32.xlu1 %v478_v23, %s1781_s19  ;;  %v2063_v23 = vld [vmem:[%s1818_s17 + $0x1a0] sm:$0xff]  ;;  %v481_v30 = vsel %vm448_vm1, %v479_v46, %v480_v59  ;;  %v485_v59 = vrot.slane %v2055_v15, 2  ;;  %v487_v46 = vrot.slane %v192_v57, 2  ;;  %v309_v47 = vsel %vm271_vm0, %v307_v14, %v308_v3 }
  0x3a   : > { %549 = vrot.lane.b32.xlu0 %v476_v40, %s1781_s19  ;;  %v452_v40 = vrot.slane %v171_v52, 2  ;;  %v2866_v52 = vrot.slane %v2063_v23, 1  ;;  %v2868_v10 = vrot.slane %v2063_v23, 2  ;;  %v312_v14 = vrot.slane %v2120_v7, 1 }
  0x3c   : > { %v2091_v36 = vsel %vm448_vm1, %v2865_v33, %v452_v40  ;;  %v2102_v40 = vsel %vm271_vm0, %v2866_v52, %v726_v19  ;;  %v484_v33 = vrot.slane %v2075_v25, 2  ;;  %v2116_v19 = vld [vmem:[%s1818_s17 + $0xc8] sm:$0xff]  ;;  %v195_v52 = vld [vmem:[%s1818_s17 + $0xd0] sm:$0x3] }
  0x3d   : > { %378 = vrot.lane.b32.xlu1 %v306_v58, %s1780_s18  ;;  %v310_v58 = vrot.slane %v192_v57, 1 }
  0x3e   : > { %376 = vrot.lane.b32.xlu0 %v304_v17, %s1780_s18  ;;  %v2107_v17 = vsel %vm448_vm1, %v2868_v10, %v737_v29  ;;  %v486_v57 = vsel %vm448_vm1, %v484_v33, %v485_v59  ;;  %v490_v29 = vrot.slane %v2116_v19, 2  ;;  %v2135_v10 = vld [vmem:[%s1818_s17 + $0xd8] sm:$0xff] }
  0x3f   : > { %v311_v38 = vsel %vm271_vm0, %v308_v3, %v310_v58  ;;  %v315_v58 = vrot.slane %v195_v52, 1 }
  0x41   : > { %555 = vrot.lane.b32.xlu1 %v483_v22, %s1781_s19  ;;  %v313_v22 = vrot.slane %v2116_v19, 1 }
  0x42   : > { %553 = vrot.lane.b32.xlu0 %v481_v30, %s1781_s19  ;;  %v488_v30 = vsel %vm448_vm1, %v485_v59, %v487_v46  ;;  %v489_v46 = vrot.slane %v2120_v7, 2 }
  0x43   : > { %v316_v3 = vsel %vm271_vm0, %v313_v22, %v315_v58  ;;  %v2149_v58 = vld [vmem:[%s1818_s17 + $0xf0] sm:$0xff] }
  0x44   : > { %v491_v59 = vsel %vm448_vm1, %v489_v46, %v490_v29  ;;  %v2871_v46 = vrot.slane %v1927_v8, 1 }
  0x45   : > { %382 = vrot.lane.b32.xlu1 %v311_v38, %s1780_s18  ;;  %v492_v38 = vrot.slane %v195_v52, 2 }
  0x46   : > { %380 = vrot.lane.b32.xlu0 %v309_v47, %s1780_s18  ;;  %v314_v47 = vsel %vm271_vm0, %v312_v14, %v313_v22  ;;  %v494_v22 = vrot.slane %v2135_v10, 2  ;;  %v322_v14 = vrot.slane %v2149_v58, 1 }
  0x47   : > { %v493_v33 = vsel %vm448_vm1, %v490_v29, %v492_v38  ;;  %v2183_v38 = vld [vmem:[%s1818_s17 + $0x120] sm:$0xff] }
  0x49   : > { %559 = vrot.lane.b32.xlu1 %v488_v30, %s1781_s19  ;;  %v317_v30 = vrot.slane %v2135_v10, 1 }
  0x4a   : > { %557 = vrot.lane.b32.xlu0 %v486_v57, %s1781_s19  ;;  %v496_v57 = vsel %vm448_vm1, %v494_v22, %v495_v49  ;;  %v2873_v22 = vrot.slane %v1943_v18, 1 }
  0x4b   : > { %v319_v52 = vsel %vm271_vm0, %v317_v30, %v318_v44  ;;  %v324_v44 = vsel %vm271_vm0, %v322_v14, %v323_v55  ;;  %v2869_v55 = vrot.slane %v1895_v53, 1  ;;  %v2872_v30 = vrot.slane %v1927_v8, 2  ;;  %v2217_v14 = vld [vmem:[%s1818_s17 + $0x150] sm:$0xff] }
  0x4d   : > { %386 = vrot.lane.b32.xlu1 %v316_v3, %s1780_s18  ;;  %v2166_v3 = vld [vmem:[%s1818_s17 + $0x108] sm:$0xff] }
  0x4e   : > { %384 = vrot.lane.b32.xlu0 %v314_v47, %s1780_s18  ;;  %v332_v47 = vrot.slane %v2183_v38, 1 }
  0x51   : > { %563 = vrot.lane.b32.xlu1 %v493_v33, %s1781_s19  ;;  %v334_v33 = vsel %vm271_vm0, %v332_v47, %v2871_v46  ;;  %v2254_v46 = vld [vmem:[%s1818_s17 + $0x180] sm:$0xff] }
  0x52   : > { %561 = vrot.lane.b32.xlu0 %v491_v59, %s1781_s19  ;;  %v2200_v59 = vld [vmem:[%s1818_s17 + $0x138] sm:$0xff] }
  0x55   : > { %390 = vrot.lane.b32.xlu1 %v1900_v54, %s1780_s18  ;;  %v499_v54 = vrot.slane %v2149_v58, 2 }
  0x56   : > { %388 = vrot.lane.b32.xlu0 %v319_v52, %s1780_s18  ;;  %v337_v52 = vrot.slane %v2200_v59, 1 }
  0x57   : > { %v501_v49 = vsel %vm448_vm1, %v499_v54, %v500_v63  ;;  %v2870_v63 = vrot.slane %v1895_v53, 2  ;;  %v342_v54 = vrot.slane %v2217_v14, 1 }
  0x59   : > { %567 = vrot.lane.b32.xlu1 %v1916_v62, %s1781_s19  ;;  %v327_v62 = vrot.slane %v2166_v3, 1 }
  0x5a   : > { %565 = vrot.lane.b32.xlu0 %v496_v57, %s1781_s19  ;;  %v339_v57 = vsel %vm271_vm0, %v337_v52, %v2873_v22  ;;  %v2879_v22 = vrot.slane %v2041_v43, 1 }
  0x5b   : > { %v329_v29 = vsel %vm271_vm0, %v327_v62, %v2869_v55  ;;  %v2234_v55 = vld [vmem:[%s1818_s17 + $0x168] sm:$0xff] }
  0x5c   : > { %v524_v47 = vrot.slane %v2234_v55, 2 }
  0x5d   : > { %394 = vrot.lane.b32.xlu1 %v1923_v4, %s1780_s18  ;;  %v504_v4 = vrot.slane %v2166_v3, 2 }
  0x5e   : > { %392 = vrot.lane.b32.xlu0 %v324_v44, %s1780_s18  ;;  %v2874_v44 = vrot.slane %v1943_v18, 2 }
  0x61   : > { %571 = vrot.lane.b32.xlu1 %v1940_v16, %s1781_s19  ;;  %v506_v16 = vsel %vm448_vm1, %v504_v4, %v2870_v63  ;;  %v2877_v63 = vrot.slane %v1991_v51, 1 }
  0x62   : > { %569 = vrot.lane.b32.xlu0 %v501_v49, %s1781_s19  ;;  %v2875_v49 = vrot.slane %v1971_v34, 1 }
  0x64   : > { %v344_v62 = vsel %vm271_vm0, %v342_v54, %v2875_v49 }
  0x65   : > { %398 = vrot.lane.b32.xlu1 %v1950_v20, %s1780_s18  ;;  %v509_v20 = vrot.slane %v2183_v38, 2 }
  0x66   : > { %396 = vrot.lane.b32.xlu0 %v329_v29, %s1780_s18  ;;  %v2876_v29 = vrot.slane %v1971_v34, 2 }
  0x69   : > { %575 = vrot.lane.b32.xlu1 %v1960_v28, %s1781_s19  ;;  %v511_v28 = vsel %vm448_vm1, %v509_v20, %v2872_v30  ;;  %v2878_v20 = vrot.slane %v1991_v51, 2 }
  0x6a   : > { %573 = vrot.lane.b32.xlu0 %v506_v16, %s1781_s19 }
  0x6b   : > { %v526_v30 = vsel %vm448_vm1, %v524_v47, %v2878_v20  ;;  %v2293_v20 = vld [vmem:[%s1818_s17 + $0x198] sm:$0xff] }
  0x6d   : > { %402 = vrot.lane.b32.xlu1 %v1967_v31, %s1780_s18  ;;  %v514_v31 = vrot.slane %v2200_v59, 2 }
  0x6e   : > { %400 = vrot.lane.b32.xlu0 %v334_v33, %s1780_s18 }
  0x71   : > { %579 = vrot.lane.b32.xlu1 %v1988_v48, %s1781_s19  ;;  %v516_v48 = vsel %vm448_vm1, %v514_v31, %v2874_v44  ;;  %v2880_v44 = vrot.slane %v2031_v32, 1 }
  0x72   : > { %577 = vrot.lane.b32.xlu0 %v511_v28, %s1781_s19  ;;  %v694_v28 = vrot.slane %v2254_v46, 1 }
  0x75   : > { %406 = vrot.lane.b32.xlu1 %v1998_v56, %s1780_s18  ;;  %v519_v56 = vrot.slane %v2217_v14, 2 }
  0x76   : > { %404 = vrot.lane.b32.xlu0 %v339_v57, %s1780_s18  ;;  %v705_v57 = vrot.slane %v2254_v46, 2 }
  0x77   : > { %v521_v4 = vsel %vm448_vm1, %v519_v56, %v2876_v29 }
  0x79   : > { %583 = vrot.lane.b32.xlu1 %v2010_v9, %s1781_s19  ;;  %v347_v9 = vrot.slane %v2234_v55, 1 }
  0x7a   : > { %581 = vrot.lane.b32.xlu0 %v516_v48, %s1781_s19  ;;  %v696_v48 = vsel %vm271_vm0, %v694_v28, %v2880_v44  ;;  %v1043_v28 = vld [vmem:[%s2850_s1 + $0x10] sm:$0xff] }
  0x7b   : > { %v349_v16 = vsel %vm271_vm0, %v347_v9, %v2877_v63  ;;  %v1042_v9 = vld [vmem:[%s2850_s1 + $0x8] sm:$0xff]  ;;  %v2882_v63 = vrot.slane %v2041_v43, 2 }
  0x7d   : > { %410 = vrot.lane.b32.xlu1 %v2017_v13, %s1780_s18  ;;  %v2251_v13 = vld [vmem:[%s1818_s17] sm:$0xff] }
  0x7e   : > { %408 = vrot.lane.b32.xlu0 %v344_v62, %s1780_s18  ;;  %v272_v33 = vrot.slane %v2251_v13, 1  ;;  %v449_v62 = vrot.slane %v2251_v13, 2 }
  0x81   : > { %587 = vrot.lane.b32.xlu1 %v2028_v27, %s1781_s19 }
  0x82   : > { %585 = vrot.lane.b32.xlu0 %v521_v4, %s1781_s19  ;;  %v1041_v4 = vld [vmem:[%s2850_s1] sm:$0xff] }
  0x83   : > { %v1745_v47 = vpack.c.bf16 %v1042_v9, %v1041_v4  ;;  %v734_v4 = vrot.slane %v2293_v20, 2 }
  0x85   : > { %414 = vrot.lane.b32.xlu1 %v2038_v50, %s1780_s18  ;;  %v274_v50 = vsel %vm271_vm0, %v272_v33, %v2879_v22  ;;  %1746 = vmatprep.subr.bf16.mxu0 %v1745_v47  ;;  %v723_v22 = vrot.slane %v2293_v20, 1 }
  0x86   : > { %412 = vrot.lane.b32.xlu0 %v349_v16, %s1780_s18  ;;  %v451_v16 = vsel %vm448_vm1, %v449_v62, %v2882_v63  ;;  %1753 = vmatprep.subr.bf16.mxu1 %v1745_v47 }
  0x87   : > { %v361_v27 = vpop.permute.xlu1 %360  ;;  %1748 = vmatpush3.bf16.msra.mxu0 %v1745_v47  ;;  %1756 = vmatpush3.bf16.msra.mxu1 %v1745_v47 }
  0x88   : > { %v357_v52 = vpop.permute.xlu0 %356  ;;  %v630_v9 = vsel %vm625_vm2, %v1821_v0, %v361_v27  ;;  %v2884_v0 = vrot.slane %v2063_v23, 2 }
  0x89   : > { %591 = vrot.lane.b32.xlu1 %v2049_v61, %s1781_s19  ;;  %v2881_v61 = vrot.slane %v2031_v32, 2 }
  0x8a   : > { %589 = vrot.lane.b32.xlu0 %v526_v30, %s1781_s19  ;;  %v736_v27 = vsel %vm448_vm1, %v734_v4, %v2884_v0 }
  0x8b   : > { %v534_v31 = vpop.permute.xlu1 %533  ;;  %v707_v49 = vsel %vm448_vm1, %v705_v57, %v2881_v61  ;;  %v1045_v61 = vld [vmem:[%s2850_s1 + $0x20] sm:$0xf] }
  0x8c   : > { %v359_v54 = vpop.permute.xlu0 %358 }
  0x8d   : > { %352 = vrot.lane.b32.xlu1 %v274_v50, %s1780_s18 }
  0x8e   : > { %699 = vrot.lane.b32.xlu0 %v696_v48, %s1780_s18  ;;  %v2883_v48 = vrot.slane %v2063_v23, 1 }
  0x8f   : > { %v536_v56 = vpop.permute.xlu1 %535 }
  0x90   : > { %v363_v29 = vpop.permute.xlu0 %362 }
  0x91   : > { %710 = vrot.lane.b32.xlu1 %v707_v49, %s1781_s19 }
  0x92   : > { %701 = vrot.lane.b32.xlu0 %v2070_v42, %s1780_s18  ;;  %v1044_v42 = vld [vmem:[%s2850_s1 + $0x18] sm:$0xff] }
  0x93   : > { %v540_v33 = vpop.permute.xlu1 %539  ;;  %v1749_v50 = vpack.c.bf16 %v1044_v42, %v1043_v28 }
  0x94   : > { %v538_v30 = vpop.permute.xlu0 %537 }
  0x95   : > { %529 = vrot.lane.b32.xlu1 %v451_v16, %s1781_s19  ;;  %1750 = vmatprep.subr.bf16.mxu0 %v1749_v50 }
  0x96   : > { %354 = vrot.lane.b32.xlu0 %v2080_v21, %s1780_s18  ;;  %1754 = vmatprep.subr.bf16.mxu1 %v1749_v50  ;;  %v725_v21 = vsel %vm271_vm0, %v723_v22, %v2883_v48 }
  0x97   : > { %v367_v57 = vpop.permute.xlu1 %366  ;;  %1752 = vmatpush3.bf16.msra.mxu0 %v1749_v50  ;;  %1757 = vmatpush3.bf16.msra.mxu1 %v1749_v50 }
  0x98   : > { %v365_v44 = vpop.permute.xlu0 %364  ;;  %1695 = vmatprep.subr.msk.mxu0 %vm1150_vm4, %v1045_v61  ;;  %1755 = vmatprep.subr.msk.mxu1 %vm1150_vm4, %v1045_v61 }
  0x99   : > { %531 = vrot.lane.b32.xlu1 %v2091_v36, %s1781_s19  ;;  %v628_v36 = vsel %vm625_vm2, %v1827_v2, %v357_v52  ;;  %v629_v2 = vsel %vm625_vm2, %v1832_v5, %v359_v54 }
  0x9a   : > { %712 = vrot.lane.b32.xlu0 %v2086_v11, %s1781_s19  ;;  %v2318_v11 = vsel %vm658_vm3, %v628_v36, %v534_v31  ;;  %v2329_v31 = vsel %vm658_vm3, %v630_v9, %v538_v30  ;;  %v2332_v16 = vsel %vm658_vm3, %v629_v2, %v536_v56  ;;  %v631_v56 = vsel %vm625_vm2, %v1824_v1, %v363_v29 }
  0x9b   : > { %v544_v49 = vpop.permute.xlu1 %543  ;;  %1696 = vmatpush3.msk.msra.mxu0 %vm1150_vm4, %v1045_v61  ;;  %1758 = vmatpush3.msk.msra.mxu1 %vm1150_vm4, %v1045_v61  ;;  %v2347_v28 = vsel %vm658_vm3, %v631_v56, %v540_v33  ;;  %v633_v1 = vsel %vm625_vm2, %v1853_v24, %v367_v57  ;;  %v632_v29 = vsel %vm625_vm2, %v1857_v26, %v365_v44 }
  0x9c   : > { %v542_v62 = vpop.permute.xlu0 %541 }
  0x9d   : > { %728 = vrot.lane.b32.xlu1 %v725_v21, %s1780_s18  ;;  %v2365_v50 = vsel %vm658_vm3, %v632_v29, %v542_v62 }
  0x9e   : > { %781 = vrot.lane.b32.xlu0 %v2318_v11, %s1782_s30 }
  0x9f   : > { %v371_v63 = vpop.permute.xlu1 %370 }
  0xa0   : > { %v369_v52 = vpop.permute.xlu0 %368  ;;  %v635_v24 = vsel %vm625_vm2, %v1870_v35, %v371_v63 }
  0xa1   : > { %879 = vrot.lane.b32.xlu1 %v2329_v31, %s1783_s4  ;;  %v634_v57 = vsel %vm625_vm2, %v1880_v41, %v369_v52 }
  0xa2   : > { %783 = vrot.lane.b32.xlu0 %v2332_v16, %s1782_s30 }
  0xa3   : > { %v548_v47 = vpop.permute.xlu1 %547 }
  0xa4   : > { %v546_v5 = vpop.permute.xlu0 %545  ;;  %v2380_v61 = vsel %vm658_vm3, %v635_v24, %v548_v47 }
  0xa5   : > { %739 = vrot.lane.b32.xlu1 %v736_v27, %s1781_s19 }
  0xa6   : > { %730 = vrot.lane.b32.xlu0 %v2102_v40, %s1780_s18 }
  0xa7   : > { %v375_v54 = vpop.permute.xlu1 %374 }
  0xa8   : > { %v373_v30 = vpop.permute.xlu0 %372  ;;  %v637_v35 = vsel %vm625_vm2, %v1908_v60, %v375_v54 }
  0xa9   : > { %741 = vrot.lane.b32.xlu1 %v2107_v17, %s1781_s19  ;;  %v2362_v17 = vsel %vm658_vm3, %v633_v1, %v544_v49  ;;  %v2383_v49 = vsel %vm658_vm3, %v634_v57, %v546_v5  ;;  %v636_v4 = vsel %vm625_vm2, %v1933_v12, %v373_v30 }
  0xaa   : > { %881 = vrot.lane.b32.xlu0 %v2347_v28, %s1783_s4 }
  0xab   : > { %v552_v42 = vpop.permute.xlu1 %551 }
  0xac   : > { %v550_v22 = vpop.permute.xlu0 %549  ;;  %v2398_v63 = vsel %vm658_vm3, %v637_v35, %v552_v42 }
  0xad   : > { %787 = vrot.lane.b32.xlu1 %v2347_v28, %s1782_s30  ;;  %v2401_v2 = vsel %vm658_vm3, %v636_v4, %v550_v22 }
  0xae   : > { %785 = vrot.lane.b32.xlu0 %v2329_v31, %s1782_s30 }
  0xaf   : > { %v379_v40 = vpop.permute.xlu1 %378 }
  0xb0   : > { %v377_v33 = vpop.permute.xlu0 %376  ;;  %v639_v60 = vsel %vm625_vm2, %v1976_v39, %v379_v40 }
  0xb1   : > { %885 = vrot.lane.b32.xlu1 %v2362_v17, %s1783_s4  ;;  %v638_v27 = vsel %vm625_vm2, %v2005_v6, %v377_v33 }
  0xb2   : > { %883 = vrot.lane.b32.xlu0 %v2365_v50, %s1783_s4 }
  0xb3   : > { %v556_v48 = vpop.permute.xlu1 %555 }
  0xb4   : > { %v554_v21 = vpop.permute.xlu0 %553  ;;  %v2416_v5 = vsel %vm658_vm3, %v639_v60, %v556_v48 }
  0xb5   : > { %791 = vrot.lane.b32.xlu1 %v2362_v17, %s1782_s30  ;;  %v2419_v54 = vsel %vm658_vm3, %v638_v27, %v554_v21 }
  0xb6   : > { %789 = vrot.lane.b32.xlu0 %v2365_v50, %s1782_s30 }
  0xb7   : > { %v383_v26 = vpop.permute.xlu1 %382 }
  0xb8   : > { %v381_v44 = vpop.permute.xlu0 %380  ;;  %v641_v39 = vsel %vm625_vm2, %v2055_v15, %v383_v26 }
  0xb9   : > { %889 = vrot.lane.b32.xlu1 %v2380_v61, %s1783_s4  ;;  %v640_v42 = vsel %vm625_vm2, %v2075_v25, %v381_v44 }
  0xba   : > { %887 = vrot.lane.b32.xlu0 %v2383_v49, %s1783_s4 }
  0xbb   : > { %v560_v36 = vpop.permute.xlu1 %559 }
  0xbc   : > { %v558_v62 = vpop.permute.xlu0 %557  ;;  %v2434_v1 = vsel %vm658_vm3, %v641_v39, %v560_v36 }
  0xbd   : > { %795 = vrot.lane.b32.xlu1 %v2380_v61, %s1782_s30  ;;  %v2437_v40 = vsel %vm658_vm3, %v640_v42, %v558_v62 }
  0xbe   : > { %793 = vrot.lane.b32.xlu0 %v2383_v49, %s1782_s30 }
  0xbf   : > { %v387_v41 = vpop.permute.xlu1 %386 }
  0xc0   : > { %v385_v9 = vpop.permute.xlu0 %384  ;;  %v643_v15 = vsel %vm625_vm2, %v2116_v19, %v387_v41 }
  0xc1   : > { %893 = vrot.lane.b32.xlu1 %v2398_v63, %s1783_s4  ;;  %v642_v48 = vsel %vm625_vm2, %v2120_v7, %v385_v9 }
  0xc2   : > { %891 = vrot.lane.b32.xlu0 %v2401_v2, %s1783_s4 }
  0xc3   : > { %v564_v52 = vpop.permute.xlu1 %563 }
  0xc4   : > { %v562_v0 = vpop.permute.xlu0 %561  ;;  %v2452_v21 = vsel %vm658_vm3, %v643_v15, %v564_v52 }
  0xc5   : > { %799 = vrot.lane.b32.xlu1 %v2398_v63, %s1782_s30  ;;  %v2455_v26 = vsel %vm658_vm3, %v642_v48, %v562_v0 }
  0xc6   : > { %797 = vrot.lane.b32.xlu0 %v2401_v2, %s1782_s30 }
  0xc7   : > { %v391_v12 = vpop.permute.xlu1 %390 }
  0xc8   : > { %v389_v47 = vpop.permute.xlu0 %388  ;;  %v645_v7 = vsel %vm625_vm2, %v1874_v37, %v391_v12 }
  0xc9   : > { %897 = vrot.lane.b32.xlu1 %v2416_v5, %s1783_s4  ;;  %v644_v36 = vsel %vm625_vm2, %v2135_v10, %v389_v47 }
  0xca   : > { %895 = vrot.lane.b32.xlu0 %v2419_v54, %s1783_s4 }
  0xcb   : > { %v568_v56 = vpop.permute.xlu1 %567 }
  0xcc   : > { %v566_v30 = vpop.permute.xlu0 %565  ;;  %v2470_v62 = vsel %vm658_vm3, %v645_v7, %v568_v56 }
  0xcd   : > { %803 = vrot.lane.b32.xlu1 %v2416_v5, %s1782_s30  ;;  %v2473_v41 = vsel %vm658_vm3, %v644_v36, %v566_v30 }
  0xce   : > { %801 = vrot.lane.b32.xlu0 %v2419_v54, %s1782_s30 }
  0xcf   : > { %v395_v6 = vpop.permute.xlu1 %394 }
  0xd0   : > { %v393_v22 = vpop.permute.xlu0 %392  ;;  %v647_v37 = vsel %vm625_vm2, %v1886_v45, %v395_v6 }
  0xd1   : > { %901 = vrot.lane.b32.xlu1 %v2434_v1, %s1783_s4  ;;  %v646_v52 = vsel %vm625_vm2, %v2149_v58, %v393_v22 }
  0xd2   : > { %899 = vrot.lane.b32.xlu0 %v2437_v40, %s1783_s4 }
  0xd3   : > { %v572_v29 = vpop.permute.xlu1 %571 }
  0xd4   : > { %v570_v33 = vpop.permute.xlu0 %569  ;;  %v2488_v0 = vsel %vm658_vm3, %v647_v37, %v572_v29 }
  0xd5   : > { %807 = vrot.lane.b32.xlu1 %v2434_v1, %s1782_s30  ;;  %v2491_v12 = vsel %vm658_vm3, %v646_v52, %v570_v33 }
  0xd6   : > { %805 = vrot.lane.b32.xlu0 %v2437_v40, %s1782_s30 }
  0xd7   : > { %v399_v25 = vpop.permute.xlu1 %398 }
  0xd8   : > { %v397_v24 = vpop.permute.xlu0 %396  ;;  %v649_v45 = vsel %vm625_vm2, %v1895_v53, %v399_v25 }
  0xd9   : > { %905 = vrot.lane.b32.xlu1 %v2452_v21, %s1783_s4  ;;  %v648_v56 = vsel %vm625_vm2, %v2166_v3, %v397_v24 }
  0xda   : > { %903 = vrot.lane.b32.xlu0 %v2455_v26, %s1783_s4 }
  0xdb   : > { %v576_v57 = vpop.permute.xlu1 %575 }
  0xdc   : > { %v574_v44 = vpop.permute.xlu0 %573  ;;  %v2506_v30 = vsel %vm658_vm3, %v649_v45, %v576_v57 }
  0xdd   : > { %811 = vrot.lane.b32.xlu1 %v2452_v21, %s1782_s30  ;;  %v2509_v6 = vsel %vm658_vm3, %v648_v56, %v574_v44 }
  0xde   : > { %809 = vrot.lane.b32.xlu0 %v2455_v26, %s1782_s30 }
  0xdf   : > { %v403_v19 = vpop.permute.xlu1 %402 }
  0xe0   : > { %v401_v35 = vpop.permute.xlu0 %400  ;;  %v651_v53 = vsel %vm625_vm2, %v1927_v8, %v403_v19 }
  0xe1   : > { %909 = vrot.lane.b32.xlu1 %v2470_v62, %s1783_s4  ;;  %v650_v29 = vsel %vm625_vm2, %v2183_v38, %v401_v35 }
  0xe2   : > { %907 = vrot.lane.b32.xlu0 %v2473_v41, %s1783_s4 }
  0xe3   : > { %v580_v4 = vpop.permute.xlu1 %579 }
  0xe4   : > { %v578_v9 = vpop.permute.xlu0 %577  ;;  %v2524_v33 = vsel %vm658_vm3, %v651_v53, %v580_v4 }
  0xe5   : > { %815 = vrot.lane.b32.xlu1 %v2470_v62, %s1782_s30  ;;  %v2527_v25 = vsel %vm658_vm3, %v650_v29, %v578_v9 }
  0xe6   : > { %813 = vrot.lane.b32.xlu0 %v2473_v41, %s1782_s30 }
  0xe7   : > { %v407_v10 = vpop.permute.xlu1 %406 }
  0xe8   : > { %v405_v60 = vpop.permute.xlu0 %404  ;;  %v653_v8 = vsel %vm625_vm2, %v1943_v18, %v407_v10 }
  0xe9   : > { %913 = vrot.lane.b32.xlu1 %v2488_v0, %s1783_s4  ;;  %v652_v57 = vsel %vm625_vm2, %v2200_v59, %v405_v60 }
  0xea   : > { %911 = vrot.lane.b32.xlu0 %v2491_v12, %s1783_s4 }
  0xeb   : > { %v584_v27 = vpop.permute.xlu1 %583 }
  0xec   : > { %v582_v47 = vpop.permute.xlu0 %581  ;;  %v2542_v44 = vsel %vm658_vm3, %v653_v8, %v584_v27 }
  0xed   : > { %819 = vrot.lane.b32.xlu1 %v2488_v0, %s1782_s30  ;;  %v2545_v19 = vsel %vm658_vm3, %v652_v57, %v582_v47 }
  0xee   : > { %817 = vrot.lane.b32.xlu0 %v2491_v12, %s1782_s30 }
  0xef   : > { %v411_v58 = vpop.permute.xlu1 %410 }
  0xf0   : > { %v409_v39 = vpop.permute.xlu0 %408  ;;  %v655_v18 = vsel %vm625_vm2, %v1971_v34, %v411_v58 }
  0xf1   : > { %917 = vrot.lane.b32.xlu1 %v2506_v30, %s1783_s4  ;;  %v654_v4 = vsel %vm625_vm2, %v2217_v14, %v409_v39 }
  0xf2   : > { %915 = vrot.lane.b32.xlu0 %v2509_v6, %s1783_s4 }
  0xf3   : > { %v588_v42 = vpop.permute.xlu1 %587 }
  0xf4   : > { %v586_v22 = vpop.permute.xlu0 %585  ;;  %v2560_v9 = vsel %vm658_vm3, %v655_v18, %v588_v42 }
  0xf5   : > { %823 = vrot.lane.b32.xlu1 %v2506_v30, %s1782_s30  ;;  %v2563_v10 = vsel %vm658_vm3, %v654_v4, %v586_v22 }
  0xf6   : > { %821 = vrot.lane.b32.xlu0 %v2509_v6, %s1782_s30 }
  0xf7   : > { %v415_v3 = vpop.permute.xlu1 %414 }
  0xf8   : > { %v413_v15 = vpop.permute.xlu0 %412  ;;  %v657_v34 = vsel %vm625_vm2, %v1991_v51, %v415_v3 }
  0xf9   : > { %921 = vrot.lane.b32.xlu1 %v2524_v33, %s1783_s4  ;;  %v656_v27 = vsel %vm625_vm2, %v2234_v55, %v413_v15 }
  0xfa   : > { %919 = vrot.lane.b32.xlu0 %v2527_v25, %s1783_s4 }
  0xfb   : > { %v592_v48 = vpop.permute.xlu1 %591 }
  0xfc   : > { %v590_v24 = vpop.permute.xlu0 %589  ;;  %v2578_v47 = vsel %vm658_vm3, %v657_v34, %v592_v48 }
  0xfd   : > { %827 = vrot.lane.b32.xlu1 %v2524_v33, %s1782_s30  ;;  %v2581_v58 = vsel %vm658_vm3, %v656_v27, %v590_v24 }
  0xfe   : > { %825 = vrot.lane.b32.xlu0 %v2527_v25, %s1782_s30 }
  0xff   : > { %v353_v38 = vpop.permute.xlu1 %352 }
 0x100   : > { %v700_v7 = vpop.permute.xlu0 %699  ;;  %v626_v56 = vsel %vm625_vm2, %v2251_v13, %v353_v38 }
 0x101   : > { %925 = vrot.lane.b32.xlu1 %v2542_v44, %s1783_s4  ;;  %v716_v3 = vsel %vm625_vm2, %v2254_v46, %v700_v7 }
 0x102   : > { %923 = vrot.lane.b32.xlu0 %v2545_v19, %s1783_s4 }
 0x103   : > { %v711_v36 = vpop.permute.xlu1 %710 }
 0x104   : > { %v702_v35 = vpop.permute.xlu0 %701  ;;  %v718_v48 = vsel %vm658_vm3, %v716_v3, %v711_v36 }
 0x105   : > { %831 = vrot.lane.b32.xlu1 %v2542_v44, %s1782_s30  ;;  %v717_v13 = vsel %vm625_vm2, %v2031_v32, %v702_v35 }
 0x106   : > { %829 = vrot.lane.b32.xlu0 %v2545_v19, %s1782_s30 }
 0x107   : > { %v530_v59 = vpop.permute.xlu1 %529 }
 0x108   : > { %v355_v37 = vpop.permute.xlu0 %354  ;;  %v659_v51 = vsel %vm658_vm3, %v626_v56, %v530_v59 }
 0x109   : > { %929 = vrot.lane.b32.xlu1 %v2560_v9, %s1783_s4  ;;  %v627_v24 = vsel %vm625_vm2, %v2041_v43, %v355_v37 }
 0x10a   : > { %927 = vrot.lane.b32.xlu0 %v2563_v10, %s1783_s4 }
 0x10b   : > { %v532_v52 = vpop.permute.xlu1 %531 }
 0x10c   : > { %v713_v60 = vpop.permute.xlu0 %712  ;;  %v660_v8 = vsel %vm658_vm3, %v627_v24, %v532_v52 }
 0x10d   : > { %835 = vrot.lane.b32.xlu1 %v2560_v9, %s1782_s30  ;;  %v719_v29 = vsel %vm658_vm3, %v717_v13, %v713_v60 }
 0x10e   : > { %833 = vrot.lane.b32.xlu0 %v2563_v10, %s1782_s30 }
 0x10f   : > { %v729_v14 = vpop.permute.xlu1 %728 }
 0x110   : > { %v782_v45 = vpop.permute.xlu0 %781  ;;  %v745_v36 = vsel %vm625_vm2, %v2293_v20, %v729_v14 }
 0x111   : > { %933 = vrot.lane.b32.xlu1 %v2578_v47, %s1783_s4  ;;  %v976_v55 = vsel %vm975_vm5, %v659_v51, %v782_v45 }
 0x112   : > { %931 = vrot.lane.b32.xlu0 %v2581_v58, %s1783_s4 }
 0x113   : > { %v880_v39 = vpop.permute.xlu1 %879 }
 0x114   : > { %v784_v42 = vpop.permute.xlu0 %783  ;;  %v1009_v22 = vsel %vm1008_vm6, %v976_v55, %v880_v39 }
 0x115   : > { %839 = vrot.lane.b32.xlu1 %v2578_v47, %s1782_s30  ;;  %1697 = vmatprep.mubr.msk.f32.mxu0 %vm1053_vm7, %v1009_v22  ;;  %v977_v32 = vsel %vm975_vm5, %v660_v8, %v784_v42 }
 0x116   : > { %837 = vrot.lane.b32.xlu0 %v2581_v58, %s1782_s30 }
 0x117   : > { %v740_v53 = vpop.permute.xlu1 %739 }
 0x118   : > { %v731_v15 = vpop.permute.xlu0 %730  ;;  %v747_v59 = vsel %vm658_vm3, %v745_v36, %v740_v53 }
 0x119   : > { %937 = vrot.lane.b32.xlu1 %v719_v29, %s1783_s4  ;;  %v746_v7 = vsel %vm625_vm2, %v2063_v23, %v731_v15 }
 0x11a   : > { %935 = vrot.lane.b32.xlu0 %v718_v48, %s1783_s4 }
 0x11b   : > { %v742_v38 = vpop.permute.xlu1 %741 }
 0x11c   : > { %v882_v57 = vpop.permute.xlu0 %881  ;;  %v748_v35 = vsel %vm658_vm3, %v746_v7, %v742_v38 }
 0x11d   : > { %v1010_v46 = vsel %vm1008_vm6, %v977_v32, %v882_v57  ;;  %843 = vrot.lane.b32.xlu1 %v719_v29, %s1782_s30 }
 0x11e   : > { %841 = vrot.lane.b32.xlu0 %v718_v48, %s1782_s30  ;;  %1698 = vmatmul.mubr.msk.f32.vlgmr.msra.gmra.mrb[0].mxu0 %vm1053_vm7, %v1010_v46 }
 0x11f   : > { %v788_v43 = vpop.permute.xlu1 %787 }
 0x120   : > { %v786_v18 = vpop.permute.xlu0 %785  ;;  %v979_v4 = vsel %vm975_vm5, %v2332_v16, %v788_v43 }
 0x121   : > { %941 = vrot.lane.b32.xlu1 %v748_v35, %s1783_s4  ;;  %v978_v23 = vsel %vm975_vm5, %v2318_v11, %v786_v18 }
 0x122   : > { %939 = vrot.lane.b32.xlu0 %v747_v59, %s1783_s4 }
 0x123   : > { %v886_v37 = vpop.permute.xlu1 %885 }
 0x124   : > { %v884_v52 = vpop.permute.xlu0 %883  ;;  %v1012_v60 = vsel %vm1008_vm6, %v979_v4, %v886_v37 }
 0x125   : > { %v1011_v20 = vsel %vm1008_vm6, %v978_v23, %v884_v52 }
 0x126   : > { %1700 = vmatprep.mubr.msk.f32.mxu0 %vm1053_vm7, %v1011_v20 }
 0x127   : > { %1701 = vmatmul.mubr.msk.f32.gmra.mrb[2].mxu0 %vm1053_vm7, %v1012_v60  ;;  %v792_v34 = vpop.permute.xlu1 %791 }
 0x128   : > { %v790_v14 = vpop.permute.xlu0 %789  ;;  %v981_v27 = vsel %vm975_vm5, %v2347_v28, %v792_v34 }
 0x129   : > { %v980_v16 = vsel %vm975_vm5, %v2329_v31, %v790_v14 }
 0x12b   : > { %v890_v45 = vpop.permute.xlu1 %889 }
 0x12c   : > { %v888_v56 = vpop.permute.xlu0 %887  ;;  %v1014_v11 = vsel %vm1008_vm6, %v981_v27, %v890_v45 }
 0x12d   : > { %v1013_v51 = vsel %vm1008_vm6, %v980_v16, %v888_v56 }
 0x12e   : > { %1703 = vmatprep.mubr.msk.f32.mxu0 %vm1053_vm7, %v1013_v51 }
 0x12f   : > { %1704 = vmatmul.mubr.msk.f32.gmra.mrb[4].mxu0 %vm1053_vm7, %v1014_v11  ;;  %v796_v55 = vpop.permute.xlu1 %795 }
 0x130   : > { %v794_v39 = vpop.permute.xlu0 %793  ;;  %v983_v42 = vsel %vm975_vm5, %v2362_v17, %v796_v55 }
 0x131   : > { %v982_v28 = vsel %vm975_vm5, %v2365_v50, %v794_v39 }
 0x133   : > { %v894_v22 = vpop.permute.xlu1 %893 }
 0x134   : > { %v892_v13 = vpop.permute.xlu0 %891  ;;  %v1016_v31 = vsel %vm1008_vm6, %v983_v42, %v894_v22 }
 0x135   : > { %v1015_v53 = vsel %vm1008_vm6, %v982_v28, %v892_v13 }
 0x136   : > { %1706 = vmatprep.mubr.msk.f32.mxu0 %vm1053_vm7, %v1015_v53 }
 0x137   : > { %1707 = vmatmul.mubr.msk.f32.gmra.mrb[6].mxu0 %vm1053_vm7, %v1016_v31  ;;  %v800_v3 = vpop.permute.xlu1 %799 }
 0x138   : > { %v798_v29 = vpop.permute.xlu0 %797  ;;  %v985_v15 = vsel %vm975_vm5, %v2380_v61, %v800_v3 }
 0x139   : > { %v984_v17 = vsel %vm975_vm5, %v2383_v49, %v798_v29 }
 0x13b   : > { %v898_v48 = vpop.permute.xlu1 %897 }
 0x13c   : > { %v896_v24 = vpop.permute.xlu0 %895  ;;  %v1018_v50 = vsel %vm1008_vm6, %v985_v15, %v898_v48 }
 0x13d   : > { %v1017_v8 = vsel %vm1008_vm6, %v984_v17, %v896_v24 }
 0x13e   : > { %1709 = vmatprep.mubr.msk.f32.mxu0 %vm1053_vm7, %v1017_v8 }
 0x13f   : > { %1710 = vmatmul.mubr.msk.f32.gmra.mrb[8].mxu0 %vm1053_vm7, %v1018_v50  ;;  %v804_v38 = vpop.permute.xlu1 %803 }
 0x140   : > { %v802_v32 = vpop.permute.xlu0 %801  ;;  %v987_v57 = vsel %vm975_vm5, %v2398_v63, %v804_v38 }
 0x141   : > { %v986_v61 = vsel %vm975_vm5, %v2401_v2, %v802_v32 }
 0x143   : > { %v902_v46 = vpop.permute.xlu1 %901 }
 0x144   : > { %v900_v7 = vpop.permute.xlu0 %899  ;;  %v1020_v49 = vsel %vm1008_vm6, %v987_v57, %v902_v46 }
 0x145   : > { %v1019_v43 = vsel %vm1008_vm6, %v986_v61, %v900_v7 }
 0x146   : > { %1712 = vmatprep.mubr.msk.f32.mxu0 %vm1053_vm7, %v1019_v43 }
 0x147   : > { %1713 = vmatmul.mubr.msk.f32.gmra.mrb[10].mxu0 %vm1053_vm7, %v1020_v49  ;;  %v808_v36 = vpop.permute.xlu1 %807 }
 0x148   : > { %v806_v35 = vpop.permute.xlu0 %805  ;;  %v989_v18 = vsel %vm975_vm5, %v2416_v5, %v808_v36 }
 0x149   : > { %v988_v63 = vsel %vm975_vm5, %v2419_v54, %v806_v35 }
 0x14b   : > { %v906_v59 = vpop.permute.xlu1 %905 }
 0x14c   : > { %v904_v4 = vpop.permute.xlu0 %903  ;;  %v1022_v2 = vsel %vm1008_vm6, %v989_v18, %v906_v59 }
 0x14d   : > { %v1021_v37 = vsel %vm1008_vm6, %v988_v63, %v904_v4 }
 0x14e   : > { %1715 = vmatprep.mubr.msk.f32.mxu0 %vm1053_vm7, %v1021_v37 }
 0x14f   : > { %1716 = vmatmul.mubr.msk.f32.gmra.mrb[12].mxu0 %vm1053_vm7, %v1022_v2  ;;  %v812_v23 = vpop.permute.xlu1 %811 }
 0x150   : > { %v810_v52 = vpop.permute.xlu0 %809  ;;  %v991_v60 = vsel %vm975_vm5, %v2434_v1, %v812_v23 }
 0x151   : > { %v990_v5 = vsel %vm975_vm5, %v2437_v40, %v810_v52 }
 0x153   : > { %v910_v20 = vpop.permute.xlu1 %909 }
 0x154   : > { %v908_v34 = vpop.permute.xlu0 %907  ;;  %v1024_v54 = vsel %vm1008_vm6, %v991_v60, %v910_v20 }
 0x155   : > { %v1023_v14 = vsel %vm1008_vm6, %v990_v5, %v908_v34 }
 0x156   : > { %1718 = vmatprep.mubr.msk.f32.mxu0 %vm1053_vm7, %v1023_v14 }
 0x157   : > { %1719 = vmatmul.mubr.msk.f32.gmra.mrb[14].mxu0 %vm1053_vm7, %v1024_v54  ;;  %v816_v27 = vpop.permute.xlu1 %815 }
 0x158   : > { %v814_v45 = vpop.permute.xlu0 %813  ;;  %v993_v16 = vsel %vm975_vm5, %v2452_v21, %v816_v27 }
 0x159   : > { %v992_v1 = vsel %vm975_vm5, %v2455_v26, %v814_v45 }
 0x15b   : > { %v914_v56 = vpop.permute.xlu1 %913 }
 0x15c   : > { %v912_v11 = vpop.permute.xlu0 %911  ;;  %v1026_v40 = vsel %vm1008_vm6, %v993_v16, %v914_v56  ;;  %v2744_v16 = vld [vmem:[%s2851_s2] ss:$0 sm:$0xff] }
 0x15d   : > { %v1025_v51 = vsel %vm1008_vm6, %v992_v1, %v912_v11 }
 0x15e   : > { %1721 = vmatprep.mubr.msk.f32.mxu1 %vm1053_vm7, %v1025_v51 }
 0x15f   : > { %1722 = vmatmul.mubr.msk.f32.vlgmr.msra.gmra.mrb[0].mxu1 %vm1053_vm7, %v1026_v40  ;;  %v820_v55 = vpop.permute.xlu1 %819 }
 0x160   : > { %v818_v39 = vpop.permute.xlu0 %817  ;;  %v995_v42 = vsel %vm975_vm5, %v2470_v62, %v820_v55 }
 0x161   : > { %v994_v21 = vsel %vm975_vm5, %v2473_v41, %v818_v39 }
 0x163   : > { %v918_v22 = vpop.permute.xlu1 %917 }
 0x164   : > { %v916_v28 = vpop.permute.xlu0 %915  ;;  %v1028_v26 = vsel %vm1008_vm6, %v995_v42, %v918_v22 }
 0x165   : > { %v1027_v13 = vsel %vm1008_vm6, %v994_v21, %v916_v28 }
 0x166   : > { %1724 = vmatprep.mubr.msk.f32.mxu1 %vm1053_vm7, %v1027_v13 }
 0x167   : > { %1725 = vmatmul.mubr.msk.f32.gmra.mrb[2].mxu1 %vm1053_vm7, %v1028_v26  ;;  %v824_v31 = vpop.permute.xlu1 %823 }
 0x168   : > { %v822_v53 = vpop.permute.xlu0 %821  ;;  %v997_v3 = vsel %vm975_vm5, %v2488_v0, %v824_v31 }
 0x169   : > { %v996_v62 = vsel %vm975_vm5, %v2491_v12, %v822_v53 }
 0x16b   : > { %v922_v29 = vpop.permute.xlu1 %921 }
 0x16c   : > { %v920_v15 = vpop.permute.xlu0 %919  ;;  %v1030_v41 = vsel %vm1008_vm6, %v997_v3, %v922_v29 }
 0x16d   : > { %v1029_v48 = vsel %vm1008_vm6, %v996_v62, %v920_v15 }
 0x16e   : > { %1727 = vmatprep.mubr.msk.f32.mxu1 %vm1053_vm7, %v1029_v48 }
 0x16f   : > { %1728 = vmatmul.mubr.msk.f32.gmra.mrb[4].mxu1 %vm1053_vm7, %v1030_v41  ;;  %v828_v17 = vpop.permute.xlu1 %827 }
 0x170   : > { %v826_v24 = vpop.permute.xlu0 %825  ;;  %v999_v50 = vsel %vm975_vm5, %v2506_v30, %v828_v17 }
 0x171   : > { %v998_v0 = vsel %vm975_vm5, %v2509_v6, %v826_v24 }
 0x173   : > { %v926_v8 = vpop.permute.xlu1 %925 }
 0x174   : > { %v924_v38 = vpop.permute.xlu0 %923  ;;  %v1032_v12 = vsel %vm1008_vm6, %v999_v50, %v926_v8 }
 0x175   : > { %v1031_v32 = vsel %vm1008_vm6, %v998_v0, %v924_v38 }
 0x176   : > { %1730 = vmatprep.mubr.msk.f32.mxu1 %vm1053_vm7, %v1031_v32 }
 0x177   : > { %1731 = vmatmul.mubr.msk.f32.gmra.mrb[6].mxu1 %vm1053_vm7, %v1032_v12  ;;  %v832_v57 = vpop.permute.xlu1 %831 }
 0x178   : > { %v830_v46 = vpop.permute.xlu0 %829  ;;  %v1001_v61 = vsel %vm975_vm5, %v2524_v33, %v832_v57 }
 0x179   : > { %v1000_v30 = vsel %vm975_vm5, %v2527_v25, %v830_v46 }
 0x17b   : > { %v930_v7 = vpop.permute.xlu1 %929 }
 0x17c   : > { %v928_v49 = vpop.permute.xlu0 %927  ;;  %v1034_v6 = vsel %vm1008_vm6, %v1001_v61, %v930_v7 }
 0x17d   : > { %v1033_v43 = vsel %vm1008_vm6, %v1000_v30, %v928_v49 }
 0x17e   : > { %1733 = vmatprep.mubr.msk.f32.mxu1 %vm1053_vm7, %v1033_v43 }
 0x17f   : > { %1734 = vmatmul.mubr.msk.f32.gmra.mrb[8].mxu1 %vm1053_vm7, %v1034_v6  ;;  %v836_v36 = vpop.permute.xlu1 %835 }
 0x180   : > { %v834_v35 = vpop.permute.xlu0 %833  ;;  %v1003_v18 = vsel %vm975_vm5, %v2542_v44, %v836_v36 }
 0x181   : > { %v1002_v33 = vsel %vm975_vm5, %v2545_v19, %v834_v35 }
 0x183   : > { %v934_v59 = vpop.permute.xlu1 %933 }
 0x184   : > { %v932_v63 = vpop.permute.xlu0 %931  ;;  %v1036_v25 = vsel %vm1008_vm6, %v1003_v18, %v934_v59 }
 0x185   : > { %v1035_v4 = vsel %vm1008_vm6, %v1002_v33, %v932_v63 }
 0x186   : > { %1736 = vmatprep.mubr.msk.f32.mxu1 %vm1053_vm7, %v1035_v4 }
 0x187   : > { %1737 = vmatmul.mubr.msk.f32.gmra.mrb[10].mxu1 %vm1053_vm7, %v1036_v25  ;;  %v840_v2 = vpop.permute.xlu1 %839 }
 0x188   : > { %v838_v37 = vpop.permute.xlu0 %837  ;;  %v1005_v23 = vsel %vm975_vm5, %v2560_v9, %v840_v2 }
 0x189   : > { %v1004_v44 = vsel %vm975_vm5, %v2563_v10, %v838_v37 }
 0x18b   : > { %v938_v52 = vpop.permute.xlu1 %937 }
 0x18c   : > { %v936_v60 = vpop.permute.xlu0 %935  ;;  %v1038_v19 = vsel %vm1008_vm6, %v1005_v23, %v938_v52 }
 0x18d   : > { %v1037_v20 = vsel %vm1008_vm6, %v1004_v44, %v936_v60 }
 0x18e   : > { %1739 = vmatprep.mubr.msk.f32.mxu1 %vm1053_vm7, %v1037_v20 }
 0x18f   : > { %1740 = vmatmul.mubr.msk.f32.gmra.mrb[12].mxu1 %vm1053_vm7, %v1038_v19  ;;  %v844_v5 = vpop.permute.xlu1 %843 }
 0x190   : > { %v842_v34 = vpop.permute.xlu0 %841  ;;  %v1007_v54 = vsel %vm975_vm5, %v2578_v47, %v844_v5 }
 0x191   : > { %v1006_v9 = vsel %vm975_vm5, %v2581_v58, %v842_v34 }
 0x193   : > { %v942_v14 = vpop.permute.xlu1 %941 }
 0x194   : > { %v940_v27 = vpop.permute.xlu0 %939  ;;  %v1040_v10 = vsel %vm1008_vm6, %v1007_v54, %v942_v14 }
 0x195   : > { %v1039_v45 = vsel %vm1008_vm6, %v1006_v9, %v940_v27 }
 0x196   : > { %1742 = vmatprep.mubr.msk.f32.mxu1 %vm1053_vm7, %v1039_v45 }
 0x197   : > { %1743 = vmatmul.mubr.msk.f32.gmra.mrb[14].mxu1 %vm1053_vm7, %v1040_v10 }
 0x1f1   : > { %v1699_v56 = vpop.f32.mrb[0].mxu0 }
 0x1f2   : > { %v1226_v47 = vadd.f32 %v1699_v56, %v2744_v16  ;;  %v1220_v1 = vpop.f32.mrb[1].mxu0 }
 0x1f3   : > { %v1221_v58 = vadd.f32 %v2744_v16, %v1220_v1 }
 0x1f4   : > { %v1381_v11 = vsel %vm1379_vm8, %v1226_v47, 0.0  ;;  %v1450_v40 = vmul.f32 %v1226_v47, %v1226_v47 }
 0x1f5   : > { %v1380_v51 = vsel %vm1379_vm8, %v1221_v58, 0.0  ;;  %v1449_v55 = vmul.f32 %v1221_v58, %v1221_v58 }
 0x1f6   : > { %v1482_v39 = vsel %vm1379_vm8, %v1450_v40, 0.0  ;;  %v1382_v42 = vadd.f32 %v1381_v11, %v1380_v51 }
 0x1f7   : > { %v1481_v22 = vsel %vm1379_vm8, %v1449_v55, 0.0 }
 0x1f8   : > { %v1483_v21 = vadd.f32 %v1482_v39, %v1481_v22 }
 0x1fa   : > { %v1702_v28 = vpop.f32.mrb[2].mxu0 }
 0x1fb   : > { %v1236_v26 = vadd.f32 %v1702_v28, %v2744_v16  ;;  %v1230_v13 = vpop.f32.mrb[3].mxu0 }
 0x1fc   : > { %v1231_v31 = vadd.f32 %v2744_v16, %v1230_v13 }
 0x1fd   : > { %v1452_v53 = vmul.f32 %v1236_v26, %v1236_v26  ;;  %v1385_v15 = vsel %vm1379_vm8, %v1236_v26, 0.0 }
 0x1fe   : > { %v1383_v3 = vsel %vm1379_vm8, %v1231_v31, 0.0  ;;  %v1451_v29 = vmul.f32 %v1231_v31, %v1231_v31 }
 0x1ff   : > { %v1384_v62 = vadd.f32 %v1383_v3, %v1382_v42  ;;  %v1486_v24 = vsel %vm1379_vm8, %v1452_v53, 0.0 }
 0x200   : > { %v1484_v41 = vsel %vm1379_vm8, %v1451_v29, 0.0 }
 0x201   : > { %v1485_v48 = vadd.f32 %v1484_v41, %v1483_v21  ;;  %v1386_v17 = vadd.f32 %v1385_v15, %v1384_v62 }
 0x202   : > { %v1705_v50 = vpop.f32.mrb[4].mxu0 }
 0x203   : > { %v1246_v8 = vadd.f32 %v1705_v50, %v2744_v16  ;;  %v1240_v0 = vpop.f32.mrb[5].mxu0  ;;  %v1487_v38 = vadd.f32 %v1486_v24, %v1485_v48 }
 0x204   : > { %v1241_v12 = vadd.f32 %v2744_v16, %v1240_v0 }
 0x205   : > { %v1454_v32 = vmul.f32 %v1246_v8, %v1246_v8  ;;  %v1389_v7 = vsel %vm1379_vm8, %v1246_v8, 0.0 }
 0x206   : > { %v1387_v57 = vsel %vm1379_vm8, %v1241_v12, 0.0  ;;  %v1453_v46 = vmul.f32 %v1241_v12, %v1241_v12 }
 0x207   : > { %v1388_v61 = vadd.f32 %v1387_v57, %v1386_v17  ;;  %v1490_v43 = vsel %vm1379_vm8, %v1454_v32, 0.0 }
 0x208   : > { %v1488_v30 = vsel %vm1379_vm8, %v1453_v46, 0.0 }
 0x209   : > { %v1489_v49 = vadd.f32 %v1488_v30, %v1487_v38  ;;  %v1390_v6 = vadd.f32 %v1389_v7, %v1388_v61 }
 0x20a   : > { %v1708_v36 = vpop.f32.mrb[6].mxu0 }
 0x20b   : > { %v1256_v35 = vadd.f32 %v1708_v36, %v2744_v16  ;;  %v1250_v18 = vpop.f32.mrb[7].mxu0  ;;  %v1491_v59 = vadd.f32 %v1490_v43, %v1489_v49 }
 0x20c   : > { %v1251_v33 = vadd.f32 %v2744_v16, %v1250_v18 }
 0x20d   : > { %v1456_v63 = vmul.f32 %v1256_v35, %v1256_v35  ;;  %v1393_v37 = vsel %vm1379_vm8, %v1256_v35, 0.0 }
 0x20e   : > { %v1391_v25 = vsel %vm1379_vm8, %v1251_v33, 0.0  ;;  %v1455_v4 = vmul.f32 %v1251_v33, %v1251_v33 }
 0x20f   : > { %v1392_v2 = vadd.f32 %v1391_v25, %v1390_v6  ;;  %v1494_v60 = vsel %vm1379_vm8, %v1456_v63, 0.0 }
 0x210   : > { %v1492_v23 = vsel %vm1379_vm8, %v1455_v4, 0.0 }
 0x211   : > { %v1493_v52 = vadd.f32 %v1492_v23, %v1491_v59  ;;  %v1394_v44 = vadd.f32 %v1393_v37, %v1392_v2 }
 0x212   : > { %v1711_v19 = vpop.f32.mrb[8].mxu0 }
 0x213   : > { %v1266_v20 = vadd.f32 %v1711_v19, %v2744_v16  ;;  %v1260_v5 = vpop.f32.mrb[9].mxu0  ;;  %v1495_v34 = vadd.f32 %v1494_v60, %v1493_v52 }
 0x214   : > { %v1261_v54 = vadd.f32 %v2744_v16, %v1260_v5 }
 0x215   : > { %v1458_v14 = vmul.f32 %v1266_v20, %v1266_v20  ;;  %v1397_v45 = vsel %vm1379_vm8, %v1266_v20, 0.0 }
 0x216   : > { %v1395_v9 = vsel %vm1379_vm8, %v1261_v54, 0.0  ;;  %v1457_v27 = vmul.f32 %v1261_v54, %v1261_v54 }
 0x217   : > { %v1396_v10 = vadd.f32 %v1395_v9, %v1394_v44  ;;  %v1498_v58 = vsel %vm1379_vm8, %v1458_v14, 0.0 }
 0x218   : > { %v1496_v56 = vsel %vm1379_vm8, %v1457_v27, 0.0 }
 0x219   : > { %v1497_v47 = vadd.f32 %v1496_v56, %v1495_v34  ;;  %v1398_v1 = vadd.f32 %v1397_v45, %v1396_v10 }
 0x21a   : > { %v1714_v11 = vpop.f32.mrb[10].mxu0 }
 0x21b   : > { %v1276_v40 = vadd.f32 %v1714_v11, %v2744_v16  ;;  %v1270_v51 = vpop.f32.mrb[11].mxu0  ;;  %v1499_v55 = vadd.f32 %v1498_v58, %v1497_v47 }
 0x21c   : > { %v1271_v39 = vadd.f32 %v2744_v16, %v1270_v51 }
 0x21d   : > { %v1460_v42 = vmul.f32 %v1276_v40, %v1276_v40  ;;  %v1401_v26 = vsel %vm1379_vm8, %v1276_v40, 0.0 }
 0x21e   : > { %v1399_v22 = vsel %vm1379_vm8, %v1271_v39, 0.0  ;;  %v1459_v21 = vmul.f32 %v1271_v39, %v1271_v39 }
 0x21f   : > { %v1400_v28 = vadd.f32 %v1399_v22, %v1398_v1  ;;  %v1502_v3 = vsel %vm1379_vm8, %v1460_v42, 0.0 }
 0x220   : > { %v1500_v13 = vsel %vm1379_vm8, %v1459_v21, 0.0 }
 0x221   : > { %v1501_v31 = vadd.f32 %v1500_v13, %v1499_v55  ;;  %v1402_v53 = vadd.f32 %v1401_v26, %v1400_v28 }
 0x222   : > { %v1717_v29 = vpop.f32.mrb[12].mxu0 }
 0x223   : > { %v1286_v62 = vadd.f32 %v1717_v29, %v2744_v16  ;;  %v1280_v15 = vpop.f32.mrb[13].mxu0  ;;  %v1503_v41 = vadd.f32 %v1502_v3, %v1501_v31 }
 0x224   : > { %v1281_v48 = vadd.f32 %v2744_v16, %v1280_v15 }
 0x225   : > { %v1462_v17 = vmul.f32 %v1286_v62, %v1286_v62  ;;  %v1405_v0 = vsel %vm1379_vm8, %v1286_v62, 0.0 }
 0x226   : > { %v1403_v24 = vsel %vm1379_vm8, %v1281_v48, 0.0  ;;  %v1461_v50 = vmul.f32 %v1281_v48, %v1281_v48 }
 0x227   : > { %v1404_v8 = vadd.f32 %v1403_v24, %v1402_v53  ;;  %v1506_v57 = vsel %vm1379_vm8, %v1462_v17, 0.0 }
 0x228   : > { %v1504_v38 = vsel %vm1379_vm8, %v1461_v50, 0.0 }
 0x229   : > { %v1505_v12 = vadd.f32 %v1504_v38, %v1503_v41  ;;  %v1406_v32 = vadd.f32 %v1405_v0, %v1404_v8 }
 0x22a   : > { %v1720_v46 = vpop.f32.mrb[14].mxu0 }
 0x22b   : > { %v1296_v61 = vadd.f32 %v1720_v46, %v2744_v16  ;;  %v1290_v7 = vpop.f32.mrb[15].mxu0  ;;  %v1507_v30 = vadd.f32 %v1506_v57, %v1505_v12 }
 0x22c   : > { %v1291_v49 = vadd.f32 %v2744_v16, %v1290_v7 }
 0x22d   : > { %v1464_v6 = vmul.f32 %v1296_v61, %v1296_v61  ;;  %v1409_v18 = vsel %vm1379_vm8, %v1296_v61, 0.0 }
 0x22e   : > { %v1407_v43 = vsel %vm1379_vm8, %v1291_v49, 0.0  ;;  %v1463_v36 = vmul.f32 %v1291_v49, %v1291_v49 }
 0x22f   : > { %v1408_v35 = vadd.f32 %v1407_v43, %v1406_v32  ;;  %v1510_v25 = vsel %vm1379_vm8, %v1464_v6, 0.0 }
 0x230   : > { %v1508_v59 = vsel %vm1379_vm8, %v1463_v36, 0.0 }
 0x231   : > { %v1509_v33 = vadd.f32 %v1508_v59, %v1507_v30  ;;  %v1410_v63 = vadd.f32 %v1409_v18, %v1408_v35 }
 0x232   : > { %v1723_v4 = vpop.f32.mrb[0].mxu1 }
 0x233   : > { %v1306_v2 = vadd.f32 %v1723_v4, %v2744_v16  ;;  %v1300_v37 = vpop.f32.mrb[1].mxu1  ;;  %v1511_v23 = vadd.f32 %v1510_v25, %v1509_v33 }
 0x234   : > { %v1301_v52 = vadd.f32 %v2744_v16, %v1300_v37 }
 0x235   : > { %v1466_v44 = vmul.f32 %v1306_v2, %v1306_v2  ;;  %v1413_v5 = vsel %vm1379_vm8, %v1306_v2, 0.0 }
 0x236   : > { %v1411_v60 = vsel %vm1379_vm8, %v1301_v52, 0.0  ;;  %v1465_v19 = vmul.f32 %v1301_v52, %v1301_v52 }
 0x237   : > { %v1412_v20 = vadd.f32 %v1411_v60, %v1410_v63  ;;  %v1514_v9 = vsel %vm1379_vm8, %v1466_v44, 0.0 }
 0x238   : > { %v1512_v34 = vsel %vm1379_vm8, %v1465_v19, 0.0 }
 0x239   : > { %v1513_v54 = vadd.f32 %v1512_v34, %v1511_v23  ;;  %v1414_v14 = vadd.f32 %v1413_v5, %v1412_v20 }
 0x23a   : > { %v1726_v27 = vpop.f32.mrb[2].mxu1 }
 0x23b   : > { %v1316_v10 = vadd.f32 %v1726_v27, %v2744_v16  ;;  %v1310_v45 = vpop.f32.mrb[3].mxu1  ;;  %v1515_v56 = vadd.f32 %v1514_v9, %v1513_v54 }
 0x23c   : > { %v1311_v47 = vadd.f32 %v2744_v16, %v1310_v45 }
 0x23d   : > { %v1468_v1 = vmul.f32 %v1316_v10, %v1316_v10  ;;  %v1417_v51 = vsel %vm1379_vm8, %v1316_v10, 0.0 }
 0x23e   : > { %v1415_v58 = vsel %vm1379_vm8, %v1311_v47, 0.0  ;;  %v1467_v11 = vmul.f32 %v1311_v47, %v1311_v47 }
 0x23f   : > { %v1416_v40 = vadd.f32 %v1415_v58, %v1414_v14  ;;  %v1518_v22 = vsel %vm1379_vm8, %v1468_v1, 0.0 }
 0x240   : > { %v1516_v55 = vsel %vm1379_vm8, %v1467_v11, 0.0 }
 0x241   : > { %v1517_v39 = vadd.f32 %v1516_v55, %v1515_v56  ;;  %v1418_v42 = vadd.f32 %v1417_v51, %v1416_v40 }
 0x242   : > { %v1729_v21 = vpop.f32.mrb[4].mxu1 }
 0x243   : > { %v1326_v28 = vadd.f32 %v1729_v21, %v2744_v16  ;;  %v1320_v26 = vpop.f32.mrb[5].mxu1  ;;  %v1519_v13 = vadd.f32 %v1518_v22, %v1517_v39 }
 0x244   : > { %v1321_v31 = vadd.f32 %v2744_v16, %v1320_v26 }
 0x245   : > { %v1470_v53 = vmul.f32 %v1326_v28, %v1326_v28  ;;  %v1421_v15 = vsel %vm1379_vm8, %v1326_v28, 0.0 }
 0x246   : > { %v1419_v3 = vsel %vm1379_vm8, %v1321_v31, 0.0  ;;  %v1469_v29 = vmul.f32 %v1321_v31, %v1321_v31 }
 0x247   : > { %v1420_v62 = vadd.f32 %v1419_v3, %v1418_v42  ;;  %v1522_v24 = vsel %vm1379_vm8, %v1470_v53, 0.0 }
 0x248   : > { %v1520_v41 = vsel %vm1379_vm8, %v1469_v29, 0.0 }
 0x249   : > { %v1521_v48 = vadd.f32 %v1520_v41, %v1519_v13  ;;  %v1422_v17 = vadd.f32 %v1421_v15, %v1420_v62 }
 0x24a   : > { %v1732_v50 = vpop.f32.mrb[6].mxu1 }
 0x24b   : > { %v1336_v8 = vadd.f32 %v1732_v50, %v2744_v16  ;;  %v1330_v0 = vpop.f32.mrb[7].mxu1  ;;  %v1523_v38 = vadd.f32 %v1522_v24, %v1521_v48 }
 0x24c   : > { %v1331_v12 = vadd.f32 %v2744_v16, %v1330_v0 }
 0x24d   : > { %v1472_v32 = vmul.f32 %v1336_v8, %v1336_v8  ;;  %v1425_v7 = vsel %vm1379_vm8, %v1336_v8, 0.0 }
 0x24e   : > { %v1423_v57 = vsel %vm1379_vm8, %v1331_v12, 0.0  ;;  %v1471_v46 = vmul.f32 %v1331_v12, %v1331_v12 }
 0x24f   : > { %v1424_v61 = vadd.f32 %v1423_v57, %v1422_v17  ;;  %v1526_v43 = vsel %vm1379_vm8, %v1472_v32, 0.0 }
 0x250   : > { %v1524_v30 = vsel %vm1379_vm8, %v1471_v46, 0.0 }
 0x251   : > { %v1525_v49 = vadd.f32 %v1524_v30, %v1523_v38  ;;  %v1426_v6 = vadd.f32 %v1425_v7, %v1424_v61 }
 0x252   : > { %v1735_v36 = vpop.f32.mrb[8].mxu1 }
 0x253   : > { %v1346_v35 = vadd.f32 %v1735_v36, %v2744_v16  ;;  %v1340_v18 = vpop.f32.mrb[9].mxu1  ;;  %v1527_v59 = vadd.f32 %v1526_v43, %v1525_v49 }
 0x254   : > { %v1341_v33 = vadd.f32 %v2744_v16, %v1340_v18 }
 0x255   : > { %v1474_v63 = vmul.f32 %v1346_v35, %v1346_v35  ;;  %v1429_v37 = vsel %vm1379_vm8, %v1346_v35, 0.0 }
 0x256   : > { %v1427_v25 = vsel %vm1379_vm8, %v1341_v33, 0.0  ;;  %v1473_v4 = vmul.f32 %v1341_v33, %v1341_v33 }
 0x257   : > { %v1428_v2 = vadd.f32 %v1427_v25, %v1426_v6  ;;  %v1530_v60 = vsel %vm1379_vm8, %v1474_v63, 0.0 }
 0x258   : > { %v1528_v23 = vsel %vm1379_vm8, %v1473_v4, 0.0 }
 0x259   : > { %v1529_v52 = vadd.f32 %v1528_v23, %v1527_v59  ;;  %v1430_v44 = vadd.f32 %v1429_v37, %v1428_v2 }
 0x25a   : > { %v1738_v19 = vpop.f32.mrb[10].mxu1 }
 0x25b   : > { %v1356_v20 = vadd.f32 %v1738_v19, %v2744_v16  ;;  %v1350_v5 = vpop.f32.mrb[11].mxu1  ;;  %v1531_v34 = vadd.f32 %v1530_v60, %v1529_v52 }
 0x25c   : > { %v1351_v54 = vadd.f32 %v2744_v16, %v1350_v5 }
 0x25d   : > { %v1476_v14 = vmul.f32 %v1356_v20, %v1356_v20  ;;  %v1433_v45 = vsel %vm1379_vm8, %v1356_v20, 0.0 }
 0x25e   : > { %v1431_v9 = vsel %vm1379_vm8, %v1351_v54, 0.0  ;;  %v1475_v27 = vmul.f32 %v1351_v54, %v1351_v54 }
 0x25f   : > { %v1432_v10 = vadd.f32 %v1431_v9, %v1430_v44  ;;  %v1534_v58 = vsel %vm1379_vm8, %v1476_v14, 0.0 }
 0x260   : > { %v1532_v56 = vsel %vm1379_vm8, %v1475_v27, 0.0 }
 0x261   : > { %v1533_v47 = vadd.f32 %v1532_v56, %v1531_v34  ;;  %v1434_v1 = vadd.f32 %v1433_v45, %v1432_v10 }
 0x262   : > { %v1741_v11 = vpop.f32.mrb[12].mxu1 }
 0x263   : > { %v1366_v40 = vadd.f32 %v1741_v11, %v2744_v16  ;;  %v1360_v51 = vpop.f32.mrb[13].mxu1  ;;  %v1535_v55 = vadd.f32 %v1534_v58, %v1533_v47 }
 0x264   : > { %v1361_v39 = vadd.f32 %v2744_v16, %v1360_v51 }
 0x265   : > { %v1478_v42 = vmul.f32 %v1366_v40, %v1366_v40  ;;  %v1437_v26 = vsel %vm1379_vm8, %v1366_v40, 0.0 }
 0x266   : > { %v1435_v22 = vsel %vm1379_vm8, %v1361_v39, 0.0  ;;  %v1477_v21 = vmul.f32 %v1361_v39, %v1361_v39 }
 0x267   : > { %v1436_v28 = vadd.f32 %v1435_v22, %v1434_v1  ;;  %v1538_v3 = vsel %vm1379_vm8, %v1478_v42, 0.0 }
 0x268   : > { %v1536_v13 = vsel %vm1379_vm8, %v1477_v21, 0.0 }
 0x269   : > { %v1537_v31 = vadd.f32 %v1536_v13, %v1535_v55  ;;  %v1438_v53 = vadd.f32 %v1437_v26, %v1436_v28 }
 0x26a   : > { %v1744_v29 = vpop.f32.mrb[14].mxu1 }
 0x26b   : > { %v1376_v62 = vadd.f32 %v1744_v29, %v2744_v16  ;;  %v1370_v15 = vpop.f32.mrb[15].mxu1  ;;  %v1539_v41 = vadd.f32 %v1538_v3, %v1537_v31 }
 0x26c   : > { %v1371_v48 = vadd.f32 %v2744_v16, %v1370_v15 }
 0x26d   : > { %v1480_v17 = vmul.f32 %v1376_v62, %v1376_v62  ;;  %v1441_v0 = vsel %vm1379_vm8, %v1376_v62, 0.0 }
 0x26e   : > { %v1439_v24 = vsel %vm1379_vm8, %v1371_v48, 0.0  ;;  %v1479_v50 = vmul.f32 %v1371_v48, %v1371_v48 }
 0x26f   : > { %v1440_v8 = vadd.f32 %v1439_v24, %v1438_v53  ;;  %v1542_v57 = vsel %vm1379_vm8, %v1480_v17, 0.0 }
 0x270   : > { %v1540_v38 = vsel %vm1379_vm8, %v1479_v50, 0.0 }
 0x271   : > { %v1442_v12 = vadd.f32 %v1441_v0, %v1440_v8  ;;  %v1541_v32 = vadd.f32 %v1540_v38, %v1539_v41 }
 0x273   : > { %v1443_v46 = vrot.slane %v1442_v12, 4  ;;  %v1543_v61 = vadd.f32 %v1542_v57, %v1541_v32 }
 0x275   : > { %v1444_v7 = vadd.f32 %v1443_v46, %v1442_v12  ;;  %v1544_v30 = vrot.slane %v1543_v61, 4 }
 0x277   : > { %v1445_v49 = vrot.slane %v1444_v7, 2  ;;  %v1545_v16 = vadd.f32 %v1544_v30, %v1543_v61 }
 0x279   : > { %v1446_v6 = vadd.f32 %v1445_v49, %v1444_v7  ;;  %v1546_v43 = vrot.slane %v1545_v16, 2 }
 0x27b   : > { %v1447_v36 = vrot.slane %v1446_v6, 1  ;;  %v1547_v35 = vadd.f32 %v1546_v43, %v1545_v16 }
 0x27d   : > { %v1548_v18 = vrot.slane %v1547_v35, 1  ;;  %v1448_v59 = vadd.f32 %v1447_v36, %v1446_v6 }
 0x27f   : > { %v1549_v33 = vadd.f32 %v1548_v18, %v1547_v35 }
 0x281   : > { %v1551_v63 = vsel %vm1550_vm9, %v1448_v59, %v1549_v33 }
 0x282   : > { %1553 = vst.msk [vmem:[%s168_s10] sm:$0x3] %vm1552_vm10, %v1551_v63 }
 0x283 PF: > { %s13_s12 = sadd.s32 1, %s1778_s12  }
 0x284   : > { %p10_p4 = scmp.ge.s32.totalorder %s13_s12, 4  }
 0x286   :  { %12 = sbr.rel (!%p10_p4) target bundleno = 1 (0x1), region = 62 }

</bundles_post_ra>
